<compile_context>
chip_gen: v7x
topology: tpu7x:2x2x1
jax: 0.10.0
libtpu: 0.0.40
codegen_flags: <defaults>
</compile_context>

<pallas_src>
import functools

import jax
import jax.numpy as jnp
from jax.experimental import pallas as pl
from jax.experimental.pallas import tpu as pltpu

# Keep the pure-JAX reference matmuls at full f32 precision so the numerical
# check against the kernel is meaningful.
jax.config.update("jax_default_matmul_precision", "highest")


# ----------------------------------------------------------------------------
# Fused kernel: all LSTM layers + output head in one gridless pallas_call.
# ----------------------------------------------------------------------------
def _fused_lstm_model_kernel(*refs, num_layers, seq_len, batch, hidden_size):
    T, B, H = seq_len, batch, hidden_size

    x_ref = refs[0]                                   # (B*T, D0), rows = b*T + t
    layer_refs = refs[1:1 + 3 * num_layers]           # per layer: w_ih_t, w_hh_t, b
    w1_ref, b1_ref, w2_ref, b2_ref = refs[1 + 3 * num_layers:5 + 3 * num_layers]
    out_ref = refs[5 + 3 * num_layers]                # (B, output_size)
    seq_sc = refs[6 + 3 * num_layers]                 # VMEM (B*T, H) inter-layer scratch

    inp2d = x_ref[...]                                # (B*T, D_layer), batch-major

    h = None
    for layer in range(num_layers):
        w_ih = layer_refs[3 * layer][...]             # (D_layer, 4H)
        w_hh = layer_refs[3 * layer + 1][...]         # (H, 4H)
        b = layer_refs[3 * layer + 2][...]            # (1, 4H) = b_ih + b_hh
        last_layer = (layer + 1 == num_layers)

        # (1) Hoisted input projection for ALL timesteps: one MXU matmul.
        pre = jnp.dot(inp2d, w_ih, preferred_element_type=jnp.float32) + b   # (B*T, 4H)
        pre = pre.reshape(B, T, 4 * H)                # batch-major -> per-t (B, 4H) slices

        # (2) Serial recurrence: only h_{t-1} @ W_hh on the critical path.
        h = jnp.zeros((B, H), jnp.float32)
        c = jnp.zeros((B, H), jnp.float32)
        for t in range(T):                            # fully unrolled (T static, small)
            gates = pre[:, t, :]                      # (B, 4H)
            if t > 0:                                 # h == 0 at t == 0: skip the matmul
                gates = gates + jnp.dot(h, w_hh, preferred_element_type=jnp.float32)
            i_g = jax.nn.sigmoid(gates[:, 0 * H:1 * H])
            f_g = jax.nn.sigmoid(gates[:, 1 * H:2 * H])
            g_g = jnp.tanh(gates[:, 2 * H:3 * H])
            o_g = jax.nn.sigmoid(gates[:, 3 * H:4 * H])
            c = f_g * c + i_g * g_g
            h = o_g * jnp.tanh(c)
            if not last_layer:
                # Stash h_t as the next layer's input, batch-major rows b*T + t.
                for bb in range(B):
                    seq_sc[bb * T + t:bb * T + t + 1, :] = h[bb:bb + 1, :]

        if not last_layer:
            inp2d = seq_sc[...]                       # (B*T, H) for the next layer

    # Output head on out[:, -1, :]: Linear -> LeakyReLU(0.05) -> Linear -> LeakyReLU(0.05)
    y = jnp.dot(h, w1_ref[...], preferred_element_type=jnp.float32) + b1_ref[...]
    y = jnp.where(y > 0, y, 0.05 * y)
    z = jnp.dot(y, w2_ref[...], preferred_element_type=jnp.float32) + b2_ref[...]
    out_ref[...] = jnp.where(z > 0, z, 0.05 * z)


def lstm_model_forward(params, x_btd):
    """Full LstmModel forward. x_btd: (B, T, input_size), batch_first."""
    B, T, D = x_btd.shape
    lstm_params = params["lstm"]
    num_layers = len(lstm_params)
    H = lstm_params[0]["w_hh_t"].shape[0]
    out_size = params["w2_t"].shape[1]

    # Free row-major reshape (no XLA transpose / extra HBM round trip).
    inputs = [x_btd.astype(jnp.float32).reshape(B * T, D)]
    for lp in lstm_params:
        inputs += [lp["w_ih_t"], lp["w_hh_t"], lp["b"]]
    inputs += [params["w1_t"], params["b1"], params["w2_t"], params["b2"]]

    kernel = functools.partial(
        _fused_lstm_model_kernel,
        num_layers=num_layers, seq_len=T, batch=B, hidden_size=H)

    return pl.pallas_call(
        kernel,
        out_shape=jax.ShapeDtypeStruct((B, out_size), jnp.float32),
        # Everything is tiny (<0.2 MiB total): keep all operands fully resident
        # in VMEM; single invocation, no grid, no pipelining overhead.
        in_specs=[pl.BlockSpec(memory_space=pltpu.MemorySpace.VMEM)] * len(inputs),
        out_specs=pl.BlockSpec(memory_space=pltpu.MemorySpace.VMEM),
        scratch_shapes=[pltpu.VMEM((B * T, H), jnp.float32)],
        # TODO(synk): if T/B/H ever scale up, chunk the hoisted projection over
        # T, split the batch across TensorCores (v7x), and set an explicit
        # vmem_limit_bytes so the fused design fits v7x's 64 MiB VMEM.
    )(*inputs)


# ----------------------------------------------------------------------------
# Parameter init (deterministic, mirrors PyTorch layouts, pre-transposed).
# ----------------------------------------------------------------------------
def init_params(key, input_size, hidden_size, num_layers, output_size,
                linear_layer_size):
    params = {"lstm": []}
    scale = 1.0 / jnp.sqrt(hidden_size)
    for layer in range(num_layers):
        in_sz = input_size if layer == 0 else hidden_size
        key, k1, k2, k3, k4 = jax.random.split(key, 5)
        w_ih = jax.random.uniform(k1, (4 * hidden_size, in_sz),
                                  minval=-scale, maxval=scale)
        w_hh = jax.random.uniform(k2, (4 * hidden_size, hidden_size),
                                  minval=-scale, maxval=scale)
        b_ih = jax.random.uniform(k3, (4 * hidden_size,), minval=-scale, maxval=scale)
        b_hh = jax.random.uniform(k4, (4 * hidden_size,), minval=-scale, maxval=scale)
        params["lstm"].append({
            "w_ih_t": w_ih.T.astype(jnp.float32),            # (in, 4H)
            "w_hh_t": w_hh.T.astype(jnp.float32),            # (H, 4H)
            "b": (b_ih + b_hh).reshape(1, -1).astype(jnp.float32),
        })
    key, k1, k2, k3, k4 = jax.random.split(key, 5)
    s1 = 1.0 / jnp.sqrt(hidden_size)
    s2 = 1.0 / jnp.sqrt(linear_layer_size)
    params["w1_t"] = jax.random.uniform(
        k1, (hidden_size, linear_layer_size), minval=-s1, maxval=s1).astype(jnp.float32)
    params["b1"] = jax.random.uniform(
        k2, (1, linear_layer_size), minval=-s1, maxval=s1).astype(jnp.float32)
    params["w2_t"] = jax.random.uniform(
        k3, (linear_layer_size, output_size), minval=-s2, maxval=s2).astype(jnp.float32)
    params["b2"] = jax.random.uniform(
        k4, (1, output_size), minval=-s2, maxval=s2).astype(jnp.float32)
    return params


# ----------------------------------------------------------------------------
# Pure-JAX reference (mirrors the PyTorch module) for a numerical check.
# ----------------------------------------------------------------------------
def reference_forward(params, x_btd):
    x = x_btd.astype(jnp.float32)
    B, T, _ = x.shape
    out_seq = x
    for lp in params["lstm"]:
        H = lp["w_hh_t"].shape[0]
        h = jnp.zeros((B, H), jnp.float32)
        c = jnp.zeros((B, H), jnp.float32)
        ys = []
        for t in range(T):
            g = out_seq[:, t, :] @ lp["w_ih_t"] + h @ lp["w_hh_t"] + lp["b"]
            i_g = jax.nn.sigmoid(g[:, :H])
            f_g = jax.nn.sigmoid(g[:, H:2 * H])
            g_g = jnp.tanh(g[:, 2 * H:3 * H])
            o_g = jax.nn.sigmoid(g[:, 3 * H:])
            c = f_g * c + i_g * g_g
            h = o_g * jnp.tanh(c)
            ys.append(h)
        out_seq = jnp.stack(ys, axis=1)
    y = out_seq[:, -1, :] @ params["w1_t"] + params["b1"]
    y = jnp.where(y > 0, y, 0.05 * y)
    z = y @ params["w2_t"] + params["b2"]
    return jnp.where(z > 0, z, 0.05 * z)


if __name__ == "__main__":
    batch, seq = 2, 8
    input_size, hidden_size, num_layers = 16, 32, 2
    linear_layer_size, output_size = 32, 4

    key = jax.random.PRNGKey(0)
    k_params, k_x = jax.random.split(key)
    params = init_params(k_params, input_size, hidden_size, num_layers,
                         output_size, linear_layer_size)
    x = jax.random.normal(k_x, (batch, seq, input_size), dtype=jnp.float32)

    fwd = jax.jit(lstm_model_forward)
    out = fwd(params, x)
    jax.block_until_ready(out)
    assert out.shape == (batch, output_size), out.shape

    ref = reference_forward(params, x)
    max_err = float(jnp.max(jnp.abs(out - ref)))
    assert jnp.allclose(out, ref, rtol=1e-3, atol=1e-4), max_err

    print("KERNEL_OK")
</pallas_src>

<mosaic_0001>
module attributes {stable_mosaic.version = 11 : i64} {
  func.func @_fused_lstm_model_kernel(%arg0: memref<16x16xf32, #tpu.memory_space<vmem>>, %arg1: memref<16x128xf32, #tpu.memory_space<vmem>>, %arg2: memref<32x128xf32, #tpu.memory_space<vmem>>, %arg3: memref<1x128xf32, #tpu.memory_space<vmem>>, %arg4: memref<32x128xf32, #tpu.memory_space<vmem>>, %arg5: memref<32x128xf32, #tpu.memory_space<vmem>>, %arg6: memref<1x128xf32, #tpu.memory_space<vmem>>, %arg7: memref<32x32xf32, #tpu.memory_space<vmem>>, %arg8: memref<1x32xf32, #tpu.memory_space<vmem>>, %arg9: memref<32x4xf32, #tpu.memory_space<vmem>>, %arg10: memref<1x4xf32, #tpu.memory_space<vmem>>, %arg11: memref<2x4xf32, #tpu.memory_space<vmem>>, %arg12: memref<16x32xf32, #tpu.memory_space<vmem>>) attributes {dimension_semantics = [], scalar_prefetch = 0 : i64, scratch_operands = 1 : i64, tpu.core_type = #tpu.core_type<tc>} {
    %c0 = arith.constant 0 : index
    %c0_0 = arith.constant 0 : index
    %0 = vector.load %arg0[%c0, %c0_0] : memref<16x16xf32, #tpu.memory_space<vmem>>, vector<16x16xf32>
    %c0_1 = arith.constant 0 : index
    %c0_2 = arith.constant 0 : index
    %1 = vector.load %arg1[%c0_1, %c0_2] : memref<16x128xf32, #tpu.memory_space<vmem>>, vector<16x128xf32>
    %c0_3 = arith.constant 0 : index
    %c0_4 = arith.constant 0 : index
    %2 = vector.load %arg2[%c0_3, %c0_4] : memref<32x128xf32, #tpu.memory_space<vmem>>, vector<32x128xf32>
    %c0_5 = arith.constant 0 : index
    %c0_6 = arith.constant 0 : index
    %3 = vector.load %arg3[%c0_5, %c0_6] : memref<1x128xf32, #tpu.memory_space<vmem>>, vector<1x128xf32>
    %cst = arith.constant dense<0.000000e+00> : vector<16x128xf32>
    %4 = tpu.matmul %0, %1, %cst {dimension_numbers = #tpu.dot_dimension_numbers<[1], [0], [0], [1], [0, 0, 1, 1], [], []>, precision = #tpu.contract_precision<fp32>} : vector<16x16xf32>, vector<16x128xf32>, vector<16x128xf32> -> vector<16x128xf32>
    %5 = vector.broadcast %3 : vector<1x128xf32> to vector<16x128xf32>
    %6 = arith.addf %4, %5 : vector<16x128xf32>
    %7 = vector.shape_cast %6 : vector<16x128xf32> to vector<2x8x128xf32>
    %cst_7 = arith.constant 0.000000e+00 : f32
    %8 = vector.broadcast %cst_7 : f32 to vector<2x32xf32>
    %9 = vector.extract_strided_slice %7 {offsets = [0, 0, 0], sizes = [2, 1, 128], strides = [1, 1, 1]} : vector<2x8x128xf32> to vector<2x1x128xf32>
    %10 = vector.shape_cast %9 : vector<2x1x128xf32> to vector<2x128xf32>
    %11 = vector.extract_strided_slice %10 {offsets = [0, 0], sizes = [2, 32], strides = [1, 1]} : vector<2x128xf32> to vector<2x32xf32>
    %12 = arith.negf %11 : vector<2x32xf32>
    %13 = math.exp %12 : vector<2x32xf32>
    %cst_8 = arith.constant 1.000000e+00 : f32
    %14 = vector.broadcast %cst_8 : f32 to vector<2x32xf32>
    %15 = arith.addf %14, %13 : vector<2x32xf32>
    %16 = arith.divf %14, %15 : vector<2x32xf32>
    %17 = vector.extract_strided_slice %10 {offsets = [0, 32], sizes = [2, 32], strides = [1, 1]} : vector<2x128xf32> to vector<2x32xf32>
    %18 = arith.negf %17 : vector<2x32xf32>
    %19 = math.exp %18 : vector<2x32xf32>
    %cst_9 = arith.constant 1.000000e+00 : f32
    %20 = vector.broadcast %cst_9 : f32 to vector<2x32xf32>
    %21 = arith.addf %20, %19 : vector<2x32xf32>
    %22 = arith.divf %20, %21 : vector<2x32xf32>
    %23 = vector.extract_strided_slice %10 {offsets = [0, 64], sizes = [2, 32], strides = [1, 1]} : vector<2x128xf32> to vector<2x32xf32>
    %24 = math.tanh %23 : vector<2x32xf32>
    %25 = vector.extract_strided_slice %10 {offsets = [0, 96], sizes = [2, 32], strides = [1, 1]} : vector<2x128xf32> to vector<2x32xf32>
    %26 = arith.negf %25 : vector<2x32xf32>
    %27 = math.exp %26 : vector<2x32xf32>
    %cst_10 = arith.constant 1.000000e+00 : f32
    %28 = vector.broadcast %cst_10 : f32 to vector<2x32xf32>
    %29 = arith.addf %28, %27 : vector<2x32xf32>
    %30 = arith.divf %28, %29 : vector<2x32xf32>
    %31 = arith.mulf %22, %8 : vector<2x32xf32>
    %32 = arith.mulf %16, %24 : vector<2x32xf32>
    %33 = arith.addf %31, %32 : vector<2x32xf32>
    %34 = math.tanh %33 : vector<2x32xf32>
    %35 = arith.mulf %30, %34 : vector<2x32xf32>
    %36 = vector.extract_strided_slice %35 {offsets = [0, 0], sizes = [1, 32], strides = [1, 1]} : vector<2x32xf32> to vector<1x32xf32>
    %c0_11 = arith.constant 0 : index
    %c0_12 = arith.constant 0 : index
    %37 = vector.load %arg12[%c0_11, %c0_12] : memref<16x32xf32, #tpu.memory_space<vmem>>, vector<1x32xf32>
    tpu.vector_store %arg12[%c0_11, %c0_12], %36 {strides = array<i32>} : memref<16x32xf32, #tpu.memory_space<vmem>>, vector<1x32xf32>,
    %38 = vector.extract_strided_slice %35 {offsets = [1, 0], sizes = [1, 32], strides = [1, 1]} : vector<2x32xf32> to vector<1x32xf32>
    %c8 = arith.constant 8 : index
    %c0_13 = arith.constant 0 : index
    %39 = vector.load %arg12[%c8, %c0_13] : memref<16x32xf32, #tpu.memory_space<vmem>>, vector<1x32xf32>
    tpu.vector_store %arg12[%c8, %c0_13], %38 {strides = array<i32>} : memref<16x32xf32, #tpu.memory_space<vmem>>, vector<1x32xf32>,
    %40 = vector.extract_strided_slice %7 {offsets = [0, 1, 0], sizes = [2, 1, 128], strides = [1, 1, 1]} : vector<2x8x128xf32> to vector<2x1x128xf32>
    %41 = vector.shape_cast %40 : vector<2x1x128xf32> to vector<2x128xf32>
    %cst_14 = arith.constant dense<0.000000e+00> : vector<2x128xf32>
    %42 = tpu.matmul %35, %2, %cst_14 {dimension_numbers = #tpu.dot_dimension_numbers<[1], [0], [0], [1], [0, 0, 1, 1], [], []>, precision = #tpu.contract_precision<fp32>} : vector<2x32xf32>, vector<32x128xf32>, vector<2x128xf32> -> vector<2x128xf32>
    %43 = arith.addf %41, %42 : vector<2x128xf32>
    %44 = vector.extract_strided_slice %43 {offsets = [0, 0], sizes = [2, 32], strides = [1, 1]} : vector<2x128xf32> to vector<2x32xf32>
    %45 = arith.negf %44 : vector<2x32xf32>
    %46 = math.exp %45 : vector<2x32xf32>
    %cst_15 = arith.constant 1.000000e+00 : f32
    %47 = vector.broadcast %cst_15 : f32 to vector<2x32xf32>
    %48 = arith.addf %47, %46 : vector<2x32xf32>
    %49 = arith.divf %47, %48 : vector<2x32xf32>
    %50 = vector.extract_strided_slice %43 {offsets = [0, 32], sizes = [2, 32], strides = [1, 1]} : vector<2x128xf32> to vector<2x32xf32>
    %51 = arith.negf %50 : vector<2x32xf32>
    %52 = math.exp %51 : vector<2x32xf32>
    %cst_16 = arith.constant 1.000000e+00 : f32
    %53 = vector.broadcast %cst_16 : f32 to vector<2x32xf32>
    %54 = arith.addf %53, %52 : vector<2x32xf32>
    %55 = arith.divf %53, %54 : vector<2x32xf32>
    %56 = vector.extract_strided_slice %43 {offsets = [0, 64], sizes = [2, 32], strides = [1, 1]} : vector<2x128xf32> to vector<2x32xf32>
    %57 = math.tanh %56 : vector<2x32xf32>
    %58 = vector.extract_strided_slice %43 {offsets = [0, 96], sizes = [2, 32], strides = [1, 1]} : vector<2x128xf32> to vector<2x32xf32>
    %59 = arith.negf %58 : vector<2x32xf32>
    %60 = math.exp %59 : vector<2x32xf32>
    %cst_17 = arith.constant 1.000000e+00 : f32
    %61 = vector.broadcast %cst_17 : f32 to vector<2x32xf32>
    %62 = arith.addf %61, %60 : vector<2x32xf32>
    %63 = arith.divf %61, %62 : vector<2x32xf32>
    %64 = arith.mulf %55, %33 : vector<2x32xf32>
    %65 = arith.mulf %49, %57 : vector<2x32xf32>
    %66 = arith.addf %64, %65 : vector<2x32xf32>
    %67 = math.tanh %66 : vector<2x32xf32>
    %68 = arith.mulf %63, %67 : vector<2x32xf32>
    %69 = vector.extract_strided_slice %68 {offsets = [0, 0], sizes = [1, 32], strides = [1, 1]} : vector<2x32xf32> to vector<1x32xf32>
    %c1 = arith.constant 1 : index
    %c0_18 = arith.constant 0 : index
    %70 = vector.load %arg12[%c1, %c0_18] : memref<16x32xf32, #tpu.memory_space<vmem>>, vector<1x32xf32>
    tpu.vector_store %arg12[%c1, %c0_18], %69 {strides = array<i32>} : memref<16x32xf32, #tpu.memory_space<vmem>>, vector<1x32xf32>,
    %71 = vector.extract_strided_slice %68 {offsets = [1, 0], sizes = [1, 32], strides = [1, 1]} : vector<2x32xf32> to vector<1x32xf32>
    %c9 = arith.constant 9 : index
    %c0_19 = arith.constant 0 : index
    %72 = vector.load %arg12[%c9, %c0_19] : memref<16x32xf32, #tpu.memory_space<vmem>>, vector<1x32xf32>
    tpu.vector_store %arg12[%c9, %c0_19], %71 {strides = array<i32>} : memref<16x32xf32, #tpu.memory_space<vmem>>, vector<1x32xf32>,
    %73 = vector.extract_strided_slice %7 {offsets = [0, 2, 0], sizes = [2, 1, 128], strides = [1, 1, 1]} : vector<2x8x128xf32> to vector<2x1x128xf32>
    %74 = vector.shape_cast %73 : vector<2x1x128xf32> to vector<2x128xf32>
    %cst_20 = arith.constant dense<0.000000e+00> : vector<2x128xf32>
    %75 = tpu.matmul %68, %2, %cst_20 {dimension_numbers = #tpu.dot_dimension_numbers<[1], [0], [0], [1], [0, 0, 1, 1], [], []>, precision = #tpu.contract_precision<fp32>} : vector<2x32xf32>, vector<32x128xf32>, vector<2x128xf32> -> vector<2x128xf32>
    %76 = arith.addf %74, %75 : vector<2x128xf32>
    %77 = vector.extract_strided_slice %76 {offsets = [0, 0], sizes = [2, 32], strides = [1, 1]} : vector<2x128xf32> to vector<2x32xf32>
    %78 = arith.negf %77 : vector<2x32xf32>
    %79 = math.exp %78 : vector<2x32xf32>
    %cst_21 = arith.constant 1.000000e+00 : f32
    %80 = vector.broadcast %cst_21 : f32 to vector<2x32xf32>
    %81 = arith.addf %80, %79 : vector<2x32xf32>
    %82 = arith.divf %80, %81 : vector<2x32xf32>
    %83 = vector.extract_strided_slice %76 {offsets = [0, 32], sizes = [2, 32], strides = [1, 1]} : vector<2x128xf32> to vector<2x32xf32>
    %84 = arith.negf %83 : vector<2x32xf32>
    %85 = math.exp %84 : vector<2x32xf32>
    %cst_22 = arith.constant 1.000000e+00 : f32
    %86 = vector.broadcast %cst_22 : f32 to vector<2x32xf32>
    %87 = arith.addf %86, %85 : vector<2x32xf32>
    %88 = arith.divf %86, %87 : vector<2x32xf32>
    %89 = vector.extract_strided_slice %76 {offsets = [0, 64], sizes = [2, 32], strides = [1, 1]} : vector<2x128xf32> to vector<2x32xf32>
    %90 = math.tanh %89 : vector<2x32xf32>
    %91 = vector.extract_strided_slice %76 {offsets = [0, 96], sizes = [2, 32], strides = [1, 1]} : vector<2x128xf32> to vector<2x32xf32>
    %92 = arith.negf %91 : vector<2x32xf32>
    %93 = math.exp %92 : vector<2x32xf32>
    %cst_23 = arith.constant 1.000000e+00 : f32
    %94 = vector.broadcast %cst_23 : f32 to vector<2x32xf32>
    %95 = arith.addf %94, %93 : vector<2x32xf32>
    %96 = arith.divf %94, %95 : vector<2x32xf32>
    %97 = arith.mulf %88, %66 : vector<2x32xf32>
    %98 = arith.mulf %82, %90 : vector<2x32xf32>
    %99 = arith.addf %97, %98 : vector<2x32xf32>
    %100 = math.tanh %99 : vector<2x32xf32>
    %101 = arith.mulf %96, %100 : vector<2x32xf32>
    %102 = vector.extract_strided_slice %101 {offsets = [0, 0], sizes = [1, 32], strides = [1, 1]} : vector<2x32xf32> to vector<1x32xf32>
    %c2 = arith.constant 2 : index
    %c0_24 = arith.constant 0 : index
    %103 = vector.load %arg12[%c2, %c0_24] : memref<16x32xf32, #tpu.memory_space<vmem>>, vector<1x32xf32>
    tpu.vector_store %arg12[%c2, %c0_24], %102 {strides = array<i32>} : memref<16x32xf32, #tpu.memory_space<vmem>>, vector<1x32xf32>,
    %104 = vector.extract_strided_slice %101 {offsets = [1, 0], sizes = [1, 32], strides = [1, 1]} : vector<2x32xf32> to vector<1x32xf32>
    %c10 = arith.constant 10 : index
    %c0_25 = arith.constant 0 : index
    %105 = vector.load %arg12[%c10, %c0_25] : memref<16x32xf32, #tpu.memory_space<vmem>>, vector<1x32xf32>
    tpu.vector_store %arg12[%c10, %c0_25], %104 {strides = array<i32>} : memref<16x32xf32, #tpu.memory_space<vmem>>, vector<1x32xf32>,
    %106 = vector.extract_strided_slice %7 {offsets = [0, 3, 0], sizes = [2, 1, 128], strides = [1, 1, 1]} : vector<2x8x128xf32> to vector<2x1x128xf32>
    %107 = vector.shape_cast %106 : vector<2x1x128xf32> to vector<2x128xf32>
    %cst_26 = arith.constant dense<0.000000e+00> : vector<2x128xf32>
    %108 = tpu.matmul %101, %2, %cst_26 {dimension_numbers = #tpu.dot_dimension_numbers<[1], [0], [0], [1], [0, 0, 1, 1], [], []>, precision = #tpu.contract_precision<fp32>} : vector<2x32xf32>, vector<32x128xf32>, vector<2x128xf32> -> vector<2x128xf32>
    %109 = arith.addf %107, %108 : vector<2x128xf32>
    %110 = vector.extract_strided_slice %109 {offsets = [0, 0], sizes = [2, 32], strides = [1, 1]} : vector<2x128xf32> to vector<2x32xf32>
    %111 = arith.negf %110 : vector<2x32xf32>
    %112 = math.exp %111 : vector<2x32xf32>
    %cst_27 = arith.constant 1.000000e+00 : f32
    %113 = vector.broadcast %cst_27 : f32 to vector<2x32xf32>
    %114 = arith.addf %113, %112 : vector<2x32xf32>
    %115 = arith.divf %113, %114 : vector<2x32xf32>
    %116 = vector.extract_strided_slice %109 {offsets = [0, 32], sizes = [2, 32], strides = [1, 1]} : vector<2x128xf32> to vector<2x32xf32>
    %117 = arith.negf %116 : vector<2x32xf32>
    %118 = math.exp %117 : vector<2x32xf32>
    %cst_28 = arith.constant 1.000000e+00 : f32
    %119 = vector.broadcast %cst_28 : f32 to vector<2x32xf32>
    %120 = arith.addf %119, %118 : vector<2x32xf32>
    %121 = arith.divf %119, %120 : vector<2x32xf32>
    %122 = vector.extract_strided_slice %109 {offsets = [0, 64], sizes = [2, 32], strides = [1, 1]} : vector<2x128xf32> to vector<2x32xf32>
    %123 = math.tanh %122 : vector<2x32xf32>
    %124 = vector.extract_strided_slice %109 {offsets = [0, 96], sizes = [2, 32], strides = [1, 1]} : vector<2x128xf32> to vector<2x32xf32>
    %125 = arith.negf %124 : vector<2x32xf32>
    %126 = math.exp %125 : vector<2x32xf32>
    %cst_29 = arith.constant 1.000000e+00 : f32
    %127 = vector.broadcast %cst_29 : f32 to vector<2x32xf32>
    %128 = arith.addf %127, %126 : vector<2x32xf32>
    %129 = arith.divf %127, %128 : vector<2x32xf32>
    %130 = arith.mulf %121, %99 : vector<2x32xf32>
    %131 = arith.mulf %115, %123 : vector<2x32xf32>
    %132 = arith.addf %130, %131 : vector<2x32xf32>
    %133 = math.tanh %132 : vector<2x32xf32>
    %134 = arith.mulf %129, %133 : vector<2x32xf32>
    %135 = vector.extract_strided_slice %134 {offsets = [0, 0], sizes = [1, 32], strides = [1, 1]} : vector<2x32xf32> to vector<1x32xf32>
    %c3 = arith.constant 3 : index
    %c0_30 = arith.constant 0 : index
    %136 = vector.load %arg12[%c3, %c0_30] : memref<16x32xf32, #tpu.memory_space<vmem>>, vector<1x32xf32>
    tpu.vector_store %arg12[%c3, %c0_30], %135 {strides = array<i32>} : memref<16x32xf32, #tpu.memory_space<vmem>>, vector<1x32xf32>,
    %137 = vector.extract_strided_slice %134 {offsets = [1, 0], sizes = [1, 32], strides = [1, 1]} : vector<2x32xf32> to vector<1x32xf32>
    %c11 = arith.constant 11 : index
    %c0_31 = arith.constant 0 : index
    %138 = vector.load %arg12[%c11, %c0_31] : memref<16x32xf32, #tpu.memory_space<vmem>>, vector<1x32xf32>
    tpu.vector_store %arg12[%c11, %c0_31], %137 {strides = array<i32>} : memref<16x32xf32, #tpu.memory_space<vmem>>, vector<1x32xf32>,
    %139 = vector.extract_strided_slice %7 {offsets = [0, 4, 0], sizes = [2, 1, 128], strides = [1, 1, 1]} : vector<2x8x128xf32> to vector<2x1x128xf32>
    %140 = vector.shape_cast %139 : vector<2x1x128xf32> to vector<2x128xf32>
    %cst_32 = arith.constant dense<0.000000e+00> : vector<2x128xf32>
    %141 = tpu.matmul %134, %2, %cst_32 {dimension_numbers = #tpu.dot_dimension_numbers<[1], [0], [0], [1], [0, 0, 1, 1], [], []>, precision = #tpu.contract_precision<fp32>} : vector<2x32xf32>, vector<32x128xf32>, vector<2x128xf32> -> vector<2x128xf32>
    %142 = arith.addf %140, %141 : vector<2x128xf32>
    %143 = vector.extract_strided_slice %142 {offsets = [0, 0], sizes = [2, 32], strides = [1, 1]} : vector<2x128xf32> to vector<2x32xf32>
    %144 = arith.negf %143 : vector<2x32xf32>
    %145 = math.exp %144 : vector<2x32xf32>
    %cst_33 = arith.constant 1.000000e+00 : f32
    %146 = vector.broadcast %cst_33 : f32 to vector<2x32xf32>
    %147 = arith.addf %146, %145 : vector<2x32xf32>
    %148 = arith.divf %146, %147 : vector<2x32xf32>
    %149 = vector.extract_strided_slice %142 {offsets = [0, 32], sizes = [2, 32], strides = [1, 1]} : vector<2x128xf32> to vector<2x32xf32>
    %150 = arith.negf %149 : vector<2x32xf32>
    %151 = math.exp %150 : vector<2x32xf32>
    %cst_34 = arith.constant 1.000000e+00 : f32
    %152 = vector.broadcast %cst_34 : f32 to vector<2x32xf32>
    %153 = arith.addf %152, %151 : vector<2x32xf32>
    %154 = arith.divf %152, %153 : vector<2x32xf32>
    %155 = vector.extract_strided_slice %142 {offsets = [0, 64], sizes = [2, 32], strides = [1, 1]} : vector<2x128xf32> to vector<2x32xf32>
    %156 = math.tanh %155 : vector<2x32xf32>
    %157 = vector.extract_strided_slice %142 {offsets = [0, 96], sizes = [2, 32], strides = [1, 1]} : vector<2x128xf32> to vector<2x32xf32>
    %158 = arith.negf %157 : vector<2x32xf32>
    %159 = math.exp %158 : vector<2x32xf32>
    %cst_35 = arith.constant 1.000000e+00 : f32
    %160 = vector.broadcast %cst_35 : f32 to vector<2x32xf32>
    %161 = arith.addf %160, %159 : vector<2x32xf32>
    %162 = arith.divf %160, %161 : vector<2x32xf32>
    %163 = arith.mulf %154, %132 : vector<2x32xf32>
    %164 = arith.mulf %148, %156 : vector<2x32xf32>
    %165 = arith.addf %163, %164 : vector<2x32xf32>
    %166 = math.tanh %165 : vector<2x32xf32>
    %167 = arith.mulf %162, %166 : vector<2x32xf32>
    %168 = vector.extract_strided_slice %167 {offsets = [0, 0], sizes = [1, 32], strides = [1, 1]} : vector<2x32xf32> to vector<1x32xf32>
    %c4 = arith.constant 4 : index
    %c0_36 = arith.constant 0 : index
    %169 = vector.load %arg12[%c4, %c0_36] : memref<16x32xf32, #tpu.memory_space<vmem>>, vector<1x32xf32>
    tpu.vector_store %arg12[%c4, %c0_36], %168 {strides = array<i32>} : memref<16x32xf32, #tpu.memory_space<vmem>>, vector<1x32xf32>,
    %170 = vector.extract_strided_slice %167 {offsets = [1, 0], sizes = [1, 32], strides = [1, 1]} : vector<2x32xf32> to vector<1x32xf32>
    %c12 = arith.constant 12 : index
    %c0_37 = arith.constant 0 : index
    %171 = vector.load %arg12[%c12, %c0_37] : memref<16x32xf32, #tpu.memory_space<vmem>>, vector<1x32xf32>
    tpu.vector_store %arg12[%c12, %c0_37], %170 {strides = array<i32>} : memref<16x32xf32, #tpu.memory_space<vmem>>, vector<1x32xf32>,
    %172 = vector.extract_strided_slice %7 {offsets = [0, 5, 0], sizes = [2, 1, 128], strides = [1, 1, 1]} : vector<2x8x128xf32> to vector<2x1x128xf32>
    %173 = vector.shape_cast %172 : vector<2x1x128xf32> to vector<2x128xf32>
    %cst_38 = arith.constant dense<0.000000e+00> : vector<2x128xf32>
    %174 = tpu.matmul %167, %2, %cst_38 {dimension_numbers = #tpu.dot_dimension_numbers<[1], [0], [0], [1], [0, 0, 1, 1], [], []>, precision = #tpu.contract_precision<fp32>} : vector<2x32xf32>, vector<32x128xf32>, vector<2x128xf32> -> vector<2x128xf32>
    %175 = arith.addf %173, %174 : vector<2x128xf32>
    %176 = vector.extract_strided_slice %175 {offsets = [0, 0], sizes = [2, 32], strides = [1, 1]} : vector<2x128xf32> to vector<2x32xf32>
    %177 = arith.negf %176 : vector<2x32xf32>
    %178 = math.exp %177 : vector<2x32xf32>
    %cst_39 = arith.constant 1.000000e+00 : f32
    %179 = vector.broadcast %cst_39 : f32 to vector<2x32xf32>
    %180 = arith.addf %179, %178 : vector<2x32xf32>
    %181 = arith.divf %179, %180 : vector<2x32xf32>
    %182 = vector.extract_strided_slice %175 {offsets = [0, 32], sizes = [2, 32], strides = [1, 1]} : vector<2x128xf32> to vector<2x32xf32>
    %183 = arith.negf %182 : vector<2x32xf32>
    %184 = math.exp %183 : vector<2x32xf32>
    %cst_40 = arith.constant 1.000000e+00 : f32
    %185 = vector.broadcast %cst_40 : f32 to vector<2x32xf32>
    %186 = arith.addf %185, %184 : vector<2x32xf32>
    %187 = arith.divf %185, %186 : vector<2x32xf32>
    %188 = vector.extract_strided_slice %175 {offsets = [0, 64], sizes = [2, 32], strides = [1, 1]} : vector<2x128xf32> to vector<2x32xf32>
    %189 = math.tanh %188 : vector<2x32xf32>
    %190 = vector.extract_strided_slice %175 {offsets = [0, 96], sizes = [2, 32], strides = [1, 1]} : vector<2x128xf32> to vector<2x32xf32>
    %191 = arith.negf %190 : vector<2x32xf32>
    %192 = math.exp %191 : vector<2x32xf32>
    %cst_41 = arith.constant 1.000000e+00 : f32
    %193 = vector.broadcast %cst_41 : f32 to vector<2x32xf32>
    %194 = arith.addf %193, %192 : vector<2x32xf32>
    %195 = arith.divf %193, %194 : vector<2x32xf32>
    %196 = arith.mulf %187, %165 : vector<2x32xf32>
    %197 = arith.mulf %181, %189 : vector<2x32xf32>
    %198 = arith.addf %196, %197 : vector<2x32xf32>
    %199 = math.tanh %198 : vector<2x32xf32>
    %200 = arith.mulf %195, %199 : vector<2x32xf32>
    %201 = vector.extract_strided_slice %200 {offsets = [0, 0], sizes = [1, 32], strides = [1, 1]} : vector<2x32xf32> to vector<1x32xf32>
    %c5 = arith.constant 5 : index
    %c0_42 = arith.constant 0 : index
    %202 = vector.load %arg12[%c5, %c0_42] : memref<16x32xf32, #tpu.memory_space<vmem>>, vector<1x32xf32>
    tpu.vector_store %arg12[%c5, %c0_42], %201 {strides = array<i32>} : memref<16x32xf32, #tpu.memory_space<vmem>>, vector<1x32xf32>,
    %203 = vector.extract_strided_slice %200 {offsets = [1, 0], sizes = [1, 32], strides = [1, 1]} : vector<2x32xf32> to vector<1x32xf32>
    %c13 = arith.constant 13 : index
    %c0_43 = arith.constant 0 : index
    %204 = vector.load %arg12[%c13, %c0_43] : memref<16x32xf32, #tpu.memory_space<vmem>>, vector<1x32xf32>
    tpu.vector_store %arg12[%c13, %c0_43], %203 {strides = array<i32>} : memref<16x32xf32, #tpu.memory_space<vmem>>, vector<1x32xf32>,
    %205 = vector.extract_strided_slice %7 {offsets = [0, 6, 0], sizes = [2, 1, 128], strides = [1, 1, 1]} : vector<2x8x128xf32> to vector<2x1x128xf32>
    %206 = vector.shape_cast %205 : vector<2x1x128xf32> to vector<2x128xf32>
    %cst_44 = arith.constant dense<0.000000e+00> : vector<2x128xf32>
    %207 = tpu.matmul %200, %2, %cst_44 {dimension_numbers = #tpu.dot_dimension_numbers<[1], [0], [0], [1], [0, 0, 1, 1], [], []>, precision = #tpu.contract_precision<fp32>} : vector<2x32xf32>, vector<32x128xf32>, vector<2x128xf32> -> vector<2x128xf32>
    %208 = arith.addf %206, %207 : vector<2x128xf32>
    %209 = vector.extract_strided_slice %208 {offsets = [0, 0], sizes = [2, 32], strides = [1, 1]} : vector<2x128xf32> to vector<2x32xf32>
    %210 = arith.negf %209 : vector<2x32xf32>
    %211 = math.exp %210 : vector<2x32xf32>
    %cst_45 = arith.constant 1.000000e+00 : f32
    %212 = vector.broadcast %cst_45 : f32 to vector<2x32xf32>
    %213 = arith.addf %212, %211 : vector<2x32xf32>
    %214 = arith.divf %212, %213 : vector<2x32xf32>
    %215 = vector.extract_strided_slice %208 {offsets = [0, 32], sizes = [2, 32], strides = [1, 1]} : vector<2x128xf32> to vector<2x32xf32>
    %216 = arith.negf %215 : vector<2x32xf32>
    %217 = math.exp %216 : vector<2x32xf32>
    %cst_46 = arith.constant 1.000000e+00 : f32
    %218 = vector.broadcast %cst_46 : f32 to vector<2x32xf32>
    %219 = arith.addf %218, %217 : vector<2x32xf32>
    %220 = arith.divf %218, %219 : vector<2x32xf32>
    %221 = vector.extract_strided_slice %208 {offsets = [0, 64], sizes = [2, 32], strides = [1, 1]} : vector<2x128xf32> to vector<2x32xf32>
    %222 = math.tanh %221 : vector<2x32xf32>
    %223 = vector.extract_strided_slice %208 {offsets = [0, 96], sizes = [2, 32], strides = [1, 1]} : vector<2x128xf32> to vector<2x32xf32>
    %224 = arith.negf %223 : vector<2x32xf32>
    %225 = math.exp %224 : vector<2x32xf32>
    %cst_47 = arith.constant 1.000000e+00 : f32
    %226 = vector.broadcast %cst_47 : f32 to vector<2x32xf32>
    %227 = arith.addf %226, %225 : vector<2x32xf32>
    %228 = arith.divf %226, %227 : vector<2x32xf32>
    %229 = arith.mulf %220, %198 : vector<2x32xf32>
    %230 = arith.mulf %214, %222 : vector<2x32xf32>
    %231 = arith.addf %229, %230 : vector<2x32xf32>
    %232 = math.tanh %231 : vector<2x32xf32>
    %233 = arith.mulf %228, %232 : vector<2x32xf32>
    %234 = vector.extract_strided_slice %233 {offsets = [0, 0], sizes = [1, 32], strides = [1, 1]} : vector<2x32xf32> to vector<1x32xf32>
    %c6 = arith.constant 6 : index
    %c0_48 = arith.constant 0 : index
    %235 = vector.load %arg12[%c6, %c0_48] : memref<16x32xf32, #tpu.memory_space<vmem>>, vector<1x32xf32>
    tpu.vector_store %arg12[%c6, %c0_48], %234 {strides = array<i32>} : memref<16x32xf32, #tpu.memory_space<vmem>>, vector<1x32xf32>,
    %236 = vector.extract_strided_slice %233 {offsets = [1, 0], sizes = [1, 32], strides = [1, 1]} : vector<2x32xf32> to vector<1x32xf32>
    %c14 = arith.constant 14 : index
    %c0_49 = arith.constant 0 : index
    %237 = vector.load %arg12[%c14, %c0_49] : memref<16x32xf32, #tpu.memory_space<vmem>>, vector<1x32xf32>
    tpu.vector_store %arg12[%c14, %c0_49], %236 {strides = array<i32>} : memref<16x32xf32, #tpu.memory_space<vmem>>, vector<1x32xf32>,
    %238 = vector.extract_strided_slice %7 {offsets = [0, 7, 0], sizes = [2, 1, 128], strides = [1, 1, 1]} : vector<2x8x128xf32> to vector<2x1x128xf32>
    %239 = vector.shape_cast %238 : vector<2x1x128xf32> to vector<2x128xf32>
    %cst_50 = arith.constant dense<0.000000e+00> : vector<2x128xf32>
    %240 = tpu.matmul %233, %2, %cst_50 {dimension_numbers = #tpu.dot_dimension_numbers<[1], [0], [0], [1], [0, 0, 1, 1], [], []>, precision = #tpu.contract_precision<fp32>} : vector<2x32xf32>, vector<32x128xf32>, vector<2x128xf32> -> vector<2x128xf32>
    %241 = arith.addf %239, %240 : vector<2x128xf32>
    %242 = vector.extract_strided_slice %241 {offsets = [0, 0], sizes = [2, 32], strides = [1, 1]} : vector<2x128xf32> to vector<2x32xf32>
    %243 = arith.negf %242 : vector<2x32xf32>
    %244 = math.exp %243 : vector<2x32xf32>
    %cst_51 = arith.constant 1.000000e+00 : f32
    %245 = vector.broadcast %cst_51 : f32 to vector<2x32xf32>
    %246 = arith.addf %245, %244 : vector<2x32xf32>
    %247 = arith.divf %245, %246 : vector<2x32xf32>
    %248 = vector.extract_strided_slice %241 {offsets = [0, 32], sizes = [2, 32], strides = [1, 1]} : vector<2x128xf32> to vector<2x32xf32>
    %249 = arith.negf %248 : vector<2x32xf32>
    %250 = math.exp %249 : vector<2x32xf32>
    %cst_52 = arith.constant 1.000000e+00 : f32
    %251 = vector.broadcast %cst_52 : f32 to vector<2x32xf32>
    %252 = arith.addf %251, %250 : vector<2x32xf32>
    %253 = arith.divf %251, %252 : vector<2x32xf32>
    %254 = vector.extract_strided_slice %241 {offsets = [0, 64], sizes = [2, 32], strides = [1, 1]} : vector<2x128xf32> to vector<2x32xf32>
    %255 = math.tanh %254 : vector<2x32xf32>
    %256 = vector.extract_strided_slice %241 {offsets = [0, 96], sizes = [2, 32], strides = [1, 1]} : vector<2x128xf32> to vector<2x32xf32>
    %257 = arith.negf %256 : vector<2x32xf32>
    %258 = math.exp %257 : vector<2x32xf32>
    %cst_53 = arith.constant 1.000000e+00 : f32
    %259 = vector.broadcast %cst_53 : f32 to vector<2x32xf32>
    %260 = arith.addf %259, %258 : vector<2x32xf32>
    %261 = arith.divf %259, %260 : vector<2x32xf32>
    %262 = arith.mulf %253, %231 : vector<2x32xf32>
    %263 = arith.mulf %247, %255 : vector<2x32xf32>
    %264 = arith.addf %262, %263 : vector<2x32xf32>
    %265 = math.tanh %264 : vector<2x32xf32>
    %266 = arith.mulf %261, %265 : vector<2x32xf32>
    %267 = vector.extract_strided_slice %266 {offsets = [0, 0], sizes = [1, 32], strides = [1, 1]} : vector<2x32xf32> to vector<1x32xf32>
    %c7 = arith.constant 7 : index
    %c0_54 = arith.constant 0 : index
    %268 = vector.load %arg12[%c7, %c0_54] : memref<16x32xf32, #tpu.memory_space<vmem>>, vector<1x32xf32>
    tpu.vector_store %arg12[%c7, %c0_54], %267 {strides = array<i32>} : memref<16x32xf32, #tpu.memory_space<vmem>>, vector<1x32xf32>,
    %269 = vector.extract_strided_slice %266 {offsets = [1, 0], sizes = [1, 32], strides = [1, 1]} : vector<2x32xf32> to vector<1x32xf32>
    %c15 = arith.constant 15 : index
    %c0_55 = arith.constant 0 : index
    %270 = vector.load %arg12[%c15, %c0_55] : memref<16x32xf32, #tpu.memory_space<vmem>>, vector<1x32xf32>
    tpu.vector_store %arg12[%c15, %c0_55], %269 {strides = array<i32>} : memref<16x32xf32, #tpu.memory_space<vmem>>, vector<1x32xf32>,
    %c0_56 = arith.constant 0 : index
    %c0_57 = arith.constant 0 : index
    %271 = vector.load %arg12[%c0_56, %c0_57] : memref<16x32xf32, #tpu.memory_space<vmem>>, vector<16x32xf32>
    %c0_58 = arith.constant 0 : index
    %c0_59 = arith.constant 0 : index
    %272 = vector.load %arg4[%c0_58, %c0_59] : memref<32x128xf32, #tpu.memory_space<vmem>>, vector<32x128xf32>
    %c0_60 = arith.constant 0 : index
    %c0_61 = arith.constant 0 : index
    %273 = vector.load %arg5[%c0_60, %c0_61] : memref<32x128xf32, #tpu.memory_space<vmem>>, vector<32x128xf32>
    %c0_62 = arith.constant 0 : index
    %c0_63 = arith.constant 0 : index
    %274 = vector.load %arg6[%c0_62, %c0_63] : memref<1x128xf32, #tpu.memory_space<vmem>>, vector<1x128xf32>
    %cst_64 = arith.constant dense<0.000000e+00> : vector<16x128xf32>
    %275 = tpu.matmul %271, %272, %cst_64 {dimension_numbers = #tpu.dot_dimension_numbers<[1], [0], [0], [1], [0, 0, 1, 1], [], []>, precision = #tpu.contract_precision<fp32>} : vector<16x32xf32>, vector<32x128xf32>, vector<16x128xf32> -> vector<16x128xf32>
    %276 = vector.broadcast %274 : vector<1x128xf32> to vector<16x128xf32>
    %277 = arith.addf %275, %276 : vector<16x128xf32>
    %278 = vector.shape_cast %277 : vector<16x128xf32> to vector<2x8x128xf32>
    %cst_65 = arith.constant 0.000000e+00 : f32
    %279 = vector.broadcast %cst_65 : f32 to vector<2x32xf32>
    %280 = vector.extract_strided_slice %278 {offsets = [0, 0, 0], sizes = [2, 1, 128], strides = [1, 1, 1]} : vector<2x8x128xf32> to vector<2x1x128xf32>
    %281 = vector.shape_cast %280 : vector<2x1x128xf32> to vector<2x128xf32>
    %282 = vector.extract_strided_slice %281 {offsets = [0, 0], sizes = [2, 32], strides = [1, 1]} : vector<2x128xf32> to vector<2x32xf32>
    %283 = arith.negf %282 : vector<2x32xf32>
    %284 = math.exp %283 : vector<2x32xf32>
    %cst_66 = arith.constant 1.000000e+00 : f32
    %285 = vector.broadcast %cst_66 : f32 to vector<2x32xf32>
    %286 = arith.addf %285, %284 : vector<2x32xf32>
    %287 = arith.divf %285, %286 : vector<2x32xf32>
    %288 = vector.extract_strided_slice %281 {offsets = [0, 32], sizes = [2, 32], strides = [1, 1]} : vector<2x128xf32> to vector<2x32xf32>
    %289 = arith.negf %288 : vector<2x32xf32>
    %290 = math.exp %289 : vector<2x32xf32>
    %cst_67 = arith.constant 1.000000e+00 : f32
    %291 = vector.broadcast %cst_67 : f32 to vector<2x32xf32>
    %292 = arith.addf %291, %290 : vector<2x32xf32>
    %293 = arith.divf %291, %292 : vector<2x32xf32>
    %294 = vector.extract_strided_slice %281 {offsets = [0, 64], sizes = [2, 32], strides = [1, 1]} : vector<2x128xf32> to vector<2x32xf32>
    %295 = math.tanh %294 : vector<2x32xf32>
    %296 = vector.extract_strided_slice %281 {offsets = [0, 96], sizes = [2, 32], strides = [1, 1]} : vector<2x128xf32> to vector<2x32xf32>
    %297 = arith.negf %296 : vector<2x32xf32>
    %298 = math.exp %297 : vector<2x32xf32>
    %cst_68 = arith.constant 1.000000e+00 : f32
    %299 = vector.broadcast %cst_68 : f32 to vector<2x32xf32>
    %300 = arith.addf %299, %298 : vector<2x32xf32>
    %301 = arith.divf %299, %300 : vector<2x32xf32>
    %302 = arith.mulf %293, %279 : vector<2x32xf32>
    %303 = arith.mulf %287, %295 : vector<2x32xf32>
    %304 = arith.addf %302, %303 : vector<2x32xf32>
    %305 = math.tanh %304 : vector<2x32xf32>
    %306 = arith.mulf %301, %305 : vector<2x32xf32>
    %307 = vector.extract_strided_slice %278 {offsets = [0, 1, 0], sizes = [2, 1, 128], strides = [1, 1, 1]} : vector<2x8x128xf32> to vector<2x1x128xf32>
    %308 = vector.shape_cast %307 : vector<2x1x128xf32> to vector<2x128xf32>
    %cst_69 = arith.constant dense<0.000000e+00> : vector<2x128xf32>
    %309 = tpu.matmul %306, %273, %cst_69 {dimension_numbers = #tpu.dot_dimension_numbers<[1], [0], [0], [1], [0, 0, 1, 1], [], []>, precision = #tpu.contract_precision<fp32>} : vector<2x32xf32>, vector<32x128xf32>, vector<2x128xf32> -> vector<2x128xf32>
    %310 = arith.addf %308, %309 : vector<2x128xf32>
    %311 = vector.extract_strided_slice %310 {offsets = [0, 0], sizes = [2, 32], strides = [1, 1]} : vector<2x128xf32> to vector<2x32xf32>
    %312 = arith.negf %311 : vector<2x32xf32>
    %313 = math.exp %312 : vector<2x32xf32>
    %cst_70 = arith.constant 1.000000e+00 : f32
    %314 = vector.broadcast %cst_70 : f32 to vector<2x32xf32>
    %315 = arith.addf %314, %313 : vector<2x32xf32>
    %316 = arith.divf %314, %315 : vector<2x32xf32>
    %317 = vector.extract_strided_slice %310 {offsets = [0, 32], sizes = [2, 32], strides = [1, 1]} : vector<2x128xf32> to vector<2x32xf32>
    %318 = arith.negf %317 : vector<2x32xf32>
    %319 = math.exp %318 : vector<2x32xf32>
    %cst_71 = arith.constant 1.000000e+00 : f32
    %320 = vector.broadcast %cst_71 : f32 to vector<2x32xf32>
    %321 = arith.addf %320, %319 : vector<2x32xf32>
    %322 = arith.divf %320, %321 : vector<2x32xf32>
    %323 = vector.extract_strided_slice %310 {offsets = [0, 64], sizes = [2, 32], strides = [1, 1]} : vector<2x128xf32> to vector<2x32xf32>
    %324 = math.tanh %323 : vector<2x32xf32>
    %325 = vector.extract_strided_slice %310 {offsets = [0, 96], sizes = [2, 32], strides = [1, 1]} : vector<2x128xf32> to vector<2x32xf32>
    %326 = arith.negf %325 : vector<2x32xf32>
    %327 = math.exp %326 : vector<2x32xf32>
    %cst_72 = arith.constant 1.000000e+00 : f32
    %328 = vector.broadcast %cst_72 : f32 to vector<2x32xf32>
    %329 = arith.addf %328, %327 : vector<2x32xf32>
    %330 = arith.divf %328, %329 : vector<2x32xf32>
    %331 = arith.mulf %322, %304 : vector<2x32xf32>
    %332 = arith.mulf %316, %324 : vector<2x32xf32>
    %333 = arith.addf %331, %332 : vector<2x32xf32>
    %334 = math.tanh %333 : vector<2x32xf32>
    %335 = arith.mulf %330, %334 : vector<2x32xf32>
    %336 = vector.extract_strided_slice %278 {offsets = [0, 2, 0], sizes = [2, 1, 128], strides = [1, 1, 1]} : vector<2x8x128xf32> to vector<2x1x128xf32>
    %337 = vector.shape_cast %336 : vector<2x1x128xf32> to vector<2x128xf32>
    %cst_73 = arith.constant dense<0.000000e+00> : vector<2x128xf32>
    %338 = tpu.matmul %335, %273, %cst_73 {dimension_numbers = #tpu.dot_dimension_numbers<[1], [0], [0], [1], [0, 0, 1, 1], [], []>, precision = #tpu.contract_precision<fp32>} : vector<2x32xf32>, vector<32x128xf32>, vector<2x128xf32> -> vector<2x128xf32>
    %339 = arith.addf %337, %338 : vector<2x128xf32>
    %340 = vector.extract_strided_slice %339 {offsets = [0, 0], sizes = [2, 32], strides = [1, 1]} : vector<2x128xf32> to vector<2x32xf32>
    %341 = arith.negf %340 : vector<2x32xf32>
    %342 = math.exp %341 : vector<2x32xf32>
    %cst_74 = arith.constant 1.000000e+00 : f32
    %343 = vector.broadcast %cst_74 : f32 to vector<2x32xf32>
    %344 = arith.addf %343, %342 : vector<2x32xf32>
    %345 = arith.divf %343, %344 : vector<2x32xf32>
    %346 = vector.extract_strided_slice %339 {offsets = [0, 32], sizes = [2, 32], strides = [1, 1]} : vector<2x128xf32> to vector<2x32xf32>
    %347 = arith.negf %346 : vector<2x32xf32>
    %348 = math.exp %347 : vector<2x32xf32>
    %cst_75 = arith.constant 1.000000e+00 : f32
    %349 = vector.broadcast %cst_75 : f32 to vector<2x32xf32>
    %350 = arith.addf %349, %348 : vector<2x32xf32>
    %351 = arith.divf %349, %350 : vector<2x32xf32>
    %352 = vector.extract_strided_slice %339 {offsets = [0, 64], sizes = [2, 32], strides = [1, 1]} : vector<2x128xf32> to vector<2x32xf32>
    %353 = math.tanh %352 : vector<2x32xf32>
    %354 = vector.extract_strided_slice %339 {offsets = [0, 96], sizes = [2, 32], strides = [1, 1]} : vector<2x128xf32> to vector<2x32xf32>
    %355 = arith.negf %354 : vector<2x32xf32>
    %356 = math.exp %355 : vector<2x32xf32>
    %cst_76 = arith.constant 1.000000e+00 : f32
    %357 = vector.broadcast %cst_76 : f32 to vector<2x32xf32>
    %358 = arith.addf %357, %356 : vector<2x32xf32>
    %359 = arith.divf %357, %358 : vector<2x32xf32>
    %360 = arith.mulf %351, %333 : vector<2x32xf32>
    %361 = arith.mulf %345, %353 : vector<2x32xf32>
    %362 = arith.addf %360, %361 : vector<2x32xf32>
    %363 = math.tanh %362 : vector<2x32xf32>
    %364 = arith.mulf %359, %363 : vector<2x32xf32>
    %365 = vector.extract_strided_slice %278 {offsets = [0, 3, 0], sizes = [2, 1, 128], strides = [1, 1, 1]} : vector<2x8x128xf32> to vector<2x1x128xf32>
    %366 = vector.shape_cast %365 : vector<2x1x128xf32> to vector<2x128xf32>
    %cst_77 = arith.constant dense<0.000000e+00> : vector<2x128xf32>
    %367 = tpu.matmul %364, %273, %cst_77 {dimension_numbers = #tpu.dot_dimension_numbers<[1], [0], [0], [1], [0, 0, 1, 1], [], []>, precision = #tpu.contract_precision<fp32>} : vector<2x32xf32>, vector<32x128xf32>, vector<2x128xf32> -> vector<2x128xf32>
    %368 = arith.addf %366, %367 : vector<2x128xf32>
    %369 = vector.extract_strided_slice %368 {offsets = [0, 0], sizes = [2, 32], strides = [1, 1]} : vector<2x128xf32> to vector<2x32xf32>
    %370 = arith.negf %369 : vector<2x32xf32>
    %371 = math.exp %370 : vector<2x32xf32>
    %cst_78 = arith.constant 1.000000e+00 : f32
    %372 = vector.broadcast %cst_78 : f32 to vector<2x32xf32>
    %373 = arith.addf %372, %371 : vector<2x32xf32>
    %374 = arith.divf %372, %373 : vector<2x32xf32>
    %375 = vector.extract_strided_slice %368 {offsets = [0, 32], sizes = [2, 32], strides = [1, 1]} : vector<2x128xf32> to vector<2x32xf32>
    %376 = arith.negf %375 : vector<2x32xf32>
    %377 = math.exp %376 : vector<2x32xf32>
    %cst_79 = arith.constant 1.000000e+00 : f32
    %378 = vector.broadcast %cst_79 : f32 to vector<2x32xf32>
    %379 = arith.addf %378, %377 : vector<2x32xf32>
    %380 = arith.divf %378, %379 : vector<2x32xf32>
    %381 = vector.extract_strided_slice %368 {offsets = [0, 64], sizes = [2, 32], strides = [1, 1]} : vector<2x128xf32> to vector<2x32xf32>
    %382 = math.tanh %381 : vector<2x32xf32>
    %383 = vector.extract_strided_slice %368 {offsets = [0, 96], sizes = [2, 32], strides = [1, 1]} : vector<2x128xf32> to vector<2x32xf32>
    %384 = arith.negf %383 : vector<2x32xf32>
    %385 = math.exp %384 : vector<2x32xf32>
    %cst_80 = arith.constant 1.000000e+00 : f32
    %386 = vector.broadcast %cst_80 : f32 to vector<2x32xf32>
    %387 = arith.addf %386, %385 : vector<2x32xf32>
    %388 = arith.divf %386, %387 : vector<2x32xf32>
    %389 = arith.mulf %380, %362 : vector<2x32xf32>
    %390 = arith.mulf %374, %382 : vector<2x32xf32>
    %391 = arith.addf %389, %390 : vector<2x32xf32>
    %392 = math.tanh %391 : vector<2x32xf32>
    %393 = arith.mulf %388, %392 : vector<2x32xf32>
    %394 = vector.extract_strided_slice %278 {offsets = [0, 4, 0], sizes = [2, 1, 128], strides = [1, 1, 1]} : vector<2x8x128xf32> to vector<2x1x128xf32>
    %395 = vector.shape_cast %394 : vector<2x1x128xf32> to vector<2x128xf32>
    %cst_81 = arith.constant dense<0.000000e+00> : vector<2x128xf32>
    %396 = tpu.matmul %393, %273, %cst_81 {dimension_numbers = #tpu.dot_dimension_numbers<[1], [0], [0], [1], [0, 0, 1, 1], [], []>, precision = #tpu.contract_precision<fp32>} : vector<2x32xf32>, vector<32x128xf32>, vector<2x128xf32> -> vector<2x128xf32>
    %397 = arith.addf %395, %396 : vector<2x128xf32>
    %398 = vector.extract_strided_slice %397 {offsets = [0, 0], sizes = [2, 32], strides = [1, 1]} : vector<2x128xf32> to vector<2x32xf32>
    %399 = arith.negf %398 : vector<2x32xf32>
    %400 = math.exp %399 : vector<2x32xf32>
    %cst_82 = arith.constant 1.000000e+00 : f32
    %401 = vector.broadcast %cst_82 : f32 to vector<2x32xf32>
    %402 = arith.addf %401, %400 : vector<2x32xf32>
    %403 = arith.divf %401, %402 : vector<2x32xf32>
    %404 = vector.extract_strided_slice %397 {offsets = [0, 32], sizes = [2, 32], strides = [1, 1]} : vector<2x128xf32> to vector<2x32xf32>
    %405 = arith.negf %404 : vector<2x32xf32>
    %406 = math.exp %405 : vector<2x32xf32>
    %cst_83 = arith.constant 1.000000e+00 : f32
    %407 = vector.broadcast %cst_83 : f32 to vector<2x32xf32>
    %408 = arith.addf %407, %406 : vector<2x32xf32>
    %409 = arith.divf %407, %408 : vector<2x32xf32>
    %410 = vector.extract_strided_slice %397 {offsets = [0, 64], sizes = [2, 32], strides = [1, 1]} : vector<2x128xf32> to vector<2x32xf32>
    %411 = math.tanh %410 : vector<2x32xf32>
    %412 = vector.extract_strided_slice %397 {offsets = [0, 96], sizes = [2, 32], strides = [1, 1]} : vector<2x128xf32> to vector<2x32xf32>
    %413 = arith.negf %412 : vector<2x32xf32>
    %414 = math.exp %413 : vector<2x32xf32>
    %cst_84 = arith.constant 1.000000e+00 : f32
    %415 = vector.broadcast %cst_84 : f32 to vector<2x32xf32>
    %416 = arith.addf %415, %414 : vector<2x32xf32>
    %417 = arith.divf %415, %416 : vector<2x32xf32>
    %418 = arith.mulf %409, %391 : vector<2x32xf32>
    %419 = arith.mulf %403, %411 : vector<2x32xf32>
    %420 = arith.addf %418, %419 : vector<2x32xf32>
    %421 = math.tanh %420 : vector<2x32xf32>
    %422 = arith.mulf %417, %421 : vector<2x32xf32>
    %423 = vector.extract_strided_slice %278 {offsets = [0, 5, 0], sizes = [2, 1, 128], strides = [1, 1, 1]} : vector<2x8x128xf32> to vector<2x1x128xf32>
    %424 = vector.shape_cast %423 : vector<2x1x128xf32> to vector<2x128xf32>
    %cst_85 = arith.constant dense<0.000000e+00> : vector<2x128xf32>
    %425 = tpu.matmul %422, %273, %cst_85 {dimension_numbers = #tpu.dot_dimension_numbers<[1], [0], [0], [1], [0, 0, 1, 1], [], []>, precision = #tpu.contract_precision<fp32>} : vector<2x32xf32>, vector<32x128xf32>, vector<2x128xf32> -> vector<2x128xf32>
    %426 = arith.addf %424, %425 : vector<2x128xf32>
    %427 = vector.extract_strided_slice %426 {offsets = [0, 0], sizes = [2, 32], strides = [1, 1]} : vector<2x128xf32> to vector<2x32xf32>
    %428 = arith.negf %427 : vector<2x32xf32>
    %429 = math.exp %428 : vector<2x32xf32>
    %cst_86 = arith.constant 1.000000e+00 : f32
    %430 = vector.broadcast %cst_86 : f32 to vector<2x32xf32>
    %431 = arith.addf %430, %429 : vector<2x32xf32>
    %432 = arith.divf %430, %431 : vector<2x32xf32>
    %433 = vector.extract_strided_slice %426 {offsets = [0, 32], sizes = [2, 32], strides = [1, 1]} : vector<2x128xf32> to vector<2x32xf32>
    %434 = arith.negf %433 : vector<2x32xf32>
    %435 = math.exp %434 : vector<2x32xf32>
    %cst_87 = arith.constant 1.000000e+00 : f32
    %436 = vector.broadcast %cst_87 : f32 to vector<2x32xf32>
    %437 = arith.addf %436, %435 : vector<2x32xf32>
    %438 = arith.divf %436, %437 : vector<2x32xf32>
    %439 = vector.extract_strided_slice %426 {offsets = [0, 64], sizes = [2, 32], strides = [1, 1]} : vector<2x128xf32> to vector<2x32xf32>
    %440 = math.tanh %439 : vector<2x32xf32>
    %441 = vector.extract_strided_slice %426 {offsets = [0, 96], sizes = [2, 32], strides = [1, 1]} : vector<2x128xf32> to vector<2x32xf32>
    %442 = arith.negf %441 : vector<2x32xf32>
    %443 = math.exp %442 : vector<2x32xf32>
    %cst_88 = arith.constant 1.000000e+00 : f32
    %444 = vector.broadcast %cst_88 : f32 to vector<2x32xf32>
    %445 = arith.addf %444, %443 : vector<2x32xf32>
    %446 = arith.divf %444, %445 : vector<2x32xf32>
    %447 = arith.mulf %438, %420 : vector<2x32xf32>
    %448 = arith.mulf %432, %440 : vector<2x32xf32>
    %449 = arith.addf %447, %448 : vector<2x32xf32>
    %450 = math.tanh %449 : vector<2x32xf32>
    %451 = arith.mulf %446, %450 : vector<2x32xf32>
    %452 = vector.extract_strided_slice %278 {offsets = [0, 6, 0], sizes = [2, 1, 128], strides = [1, 1, 1]} : vector<2x8x128xf32> to vector<2x1x128xf32>
    %453 = vector.shape_cast %452 : vector<2x1x128xf32> to vector<2x128xf32>
    %cst_89 = arith.constant dense<0.000000e+00> : vector<2x128xf32>
    %454 = tpu.matmul %451, %273, %cst_89 {dimension_numbers = #tpu.dot_dimension_numbers<[1], [0], [0], [1], [0, 0, 1, 1], [], []>, precision = #tpu.contract_precision<fp32>} : vector<2x32xf32>, vector<32x128xf32>, vector<2x128xf32> -> vector<2x128xf32>
    %455 = arith.addf %453, %454 : vector<2x128xf32>
    %456 = vector.extract_strided_slice %455 {offsets = [0, 0], sizes = [2, 32], strides = [1, 1]} : vector<2x128xf32> to vector<2x32xf32>
    %457 = arith.negf %456 : vector<2x32xf32>
    %458 = math.exp %457 : vector<2x32xf32>
    %cst_90 = arith.constant 1.000000e+00 : f32
    %459 = vector.broadcast %cst_90 : f32 to vector<2x32xf32>
    %460 = arith.addf %459, %458 : vector<2x32xf32>
    %461 = arith.divf %459, %460 : vector<2x32xf32>
    %462 = vector.extract_strided_slice %455 {offsets = [0, 32], sizes = [2, 32], strides = [1, 1]} : vector<2x128xf32> to vector<2x32xf32>
    %463 = arith.negf %462 : vector<2x32xf32>
    %464 = math.exp %463 : vector<2x32xf32>
    %cst_91 = arith.constant 1.000000e+00 : f32
    %465 = vector.broadcast %cst_91 : f32 to vector<2x32xf32>
    %466 = arith.addf %465, %464 : vector<2x32xf32>
    %467 = arith.divf %465, %466 : vector<2x32xf32>
    %468 = vector.extract_strided_slice %455 {offsets = [0, 64], sizes = [2, 32], strides = [1, 1]} : vector<2x128xf32> to vector<2x32xf32>
    %469 = math.tanh %468 : vector<2x32xf32>
    %470 = vector.extract_strided_slice %455 {offsets = [0, 96], sizes = [2, 32], strides = [1, 1]} : vector<2x128xf32> to vector<2x32xf32>
    %471 = arith.negf %470 : vector<2x32xf32>
    %472 = math.exp %471 : vector<2x32xf32>
    %cst_92 = arith.constant 1.000000e+00 : f32
    %473 = vector.broadcast %cst_92 : f32 to vector<2x32xf32>
    %474 = arith.addf %473, %472 : vector<2x32xf32>
    %475 = arith.divf %473, %474 : vector<2x32xf32>
    %476 = arith.mulf %467, %449 : vector<2x32xf32>
    %477 = arith.mulf %461, %469 : vector<2x32xf32>
    %478 = arith.addf %476, %477 : vector<2x32xf32>
    %479 = math.tanh %478 : vector<2x32xf32>
    %480 = arith.mulf %475, %479 : vector<2x32xf32>
    %481 = vector.extract_strided_slice %278 {offsets = [0, 7, 0], sizes = [2, 1, 128], strides = [1, 1, 1]} : vector<2x8x128xf32> to vector<2x1x128xf32>
    %482 = vector.shape_cast %481 : vector<2x1x128xf32> to vector<2x128xf32>
    %cst_93 = arith.constant dense<0.000000e+00> : vector<2x128xf32>
    %483 = tpu.matmul %480, %273, %cst_93 {dimension_numbers = #tpu.dot_dimension_numbers<[1], [0], [0], [1], [0, 0, 1, 1], [], []>, precision = #tpu.contract_precision<fp32>} : vector<2x32xf32>, vector<32x128xf32>, vector<2x128xf32> -> vector<2x128xf32>
    %484 = arith.addf %482, %483 : vector<2x128xf32>
    %485 = vector.extract_strided_slice %484 {offsets = [0, 0], sizes = [2, 32], strides = [1, 1]} : vector<2x128xf32> to vector<2x32xf32>
    %486 = arith.negf %485 : vector<2x32xf32>
    %487 = math.exp %486 : vector<2x32xf32>
    %cst_94 = arith.constant 1.000000e+00 : f32
    %488 = vector.broadcast %cst_94 : f32 to vector<2x32xf32>
    %489 = arith.addf %488, %487 : vector<2x32xf32>
    %490 = arith.divf %488, %489 : vector<2x32xf32>
    %491 = vector.extract_strided_slice %484 {offsets = [0, 32], sizes = [2, 32], strides = [1, 1]} : vector<2x128xf32> to vector<2x32xf32>
    %492 = arith.negf %491 : vector<2x32xf32>
    %493 = math.exp %492 : vector<2x32xf32>
    %cst_95 = arith.constant 1.000000e+00 : f32
    %494 = vector.broadcast %cst_95 : f32 to vector<2x32xf32>
    %495 = arith.addf %494, %493 : vector<2x32xf32>
    %496 = arith.divf %494, %495 : vector<2x32xf32>
    %497 = vector.extract_strided_slice %484 {offsets = [0, 64], sizes = [2, 32], strides = [1, 1]} : vector<2x128xf32> to vector<2x32xf32>
    %498 = math.tanh %497 : vector<2x32xf32>
    %499 = vector.extract_strided_slice %484 {offsets = [0, 96], sizes = [2, 32], strides = [1, 1]} : vector<2x128xf32> to vector<2x32xf32>
    %500 = arith.negf %499 : vector<2x32xf32>
    %501 = math.exp %500 : vector<2x32xf32>
    %cst_96 = arith.constant 1.000000e+00 : f32
    %502 = vector.broadcast %cst_96 : f32 to vector<2x32xf32>
    %503 = arith.addf %502, %501 : vector<2x32xf32>
    %504 = arith.divf %502, %503 : vector<2x32xf32>
    %505 = arith.mulf %496, %478 : vector<2x32xf32>
    %506 = arith.mulf %490, %498 : vector<2x32xf32>
    %507 = arith.addf %505, %506 : vector<2x32xf32>
    %508 = math.tanh %507 : vector<2x32xf32>
    %509 = arith.mulf %504, %508 : vector<2x32xf32>
    %c0_97 = arith.constant 0 : index
    %c0_98 = arith.constant 0 : index
    %510 = vector.load %arg7[%c0_97, %c0_98] : memref<32x32xf32, #tpu.memory_space<vmem>>, vector<32x32xf32>
    %cst_99 = arith.constant dense<0.000000e+00> : vector<2x32xf32>
    %511 = tpu.matmul %509, %510, %cst_99 {dimension_numbers = #tpu.dot_dimension_numbers<[1], [0], [0], [1], [0, 0, 1, 1], [], []>, precision = #tpu.contract_precision<fp32>} : vector<2x32xf32>, vector<32x32xf32>, vector<2x32xf32> -> vector<2x32xf32>
    %c0_100 = arith.constant 0 : index
    %c0_101 = arith.constant 0 : index
    %512 = vector.load %arg8[%c0_100, %c0_101] : memref<1x32xf32, #tpu.memory_space<vmem>>, vector<1x32xf32>
    %513 = vector.broadcast %512 : vector<1x32xf32> to vector<2x32xf32>
    %514 = arith.addf %511, %513 : vector<2x32xf32>
    %cst_102 = arith.constant 0.000000e+00 : f32
    %515 = vector.broadcast %cst_102 : f32 to vector<2x32xf32>
    %516 = arith.cmpf ogt, %514, %515 : vector<2x32xf32>
    %cst_103 = arith.constant 5.000000e-02 : f32
    %517 = vector.broadcast %cst_103 : f32 to vector<2x32xf32>
    %518 = arith.mulf %517, %514 : vector<2x32xf32>
    %519 = arith.select %516, %514, %518 : vector<2x32xi1>, vector<2x32xf32>
    %c0_104 = arith.constant 0 : index
    %c0_105 = arith.constant 0 : index
    %520 = vector.load %arg9[%c0_104, %c0_105] : memref<32x4xf32, #tpu.memory_space<vmem>>, vector<32x4xf32>
    %cst_106 = arith.constant dense<0.000000e+00> : vector<2x4xf32>
    %521 = tpu.matmul %519, %520, %cst_106 {dimension_numbers = #tpu.dot_dimension_numbers<[1], [0], [0], [1], [0, 0, 1, 1], [], []>, precision = #tpu.contract_precision<fp32>} : vector<2x32xf32>, vector<32x4xf32>, vector<2x4xf32> -> vector<2x4xf32>
    %c0_107 = arith.constant 0 : index
    %c0_108 = arith.constant 0 : index
    %522 = vector.load %arg10[%c0_107, %c0_108] : memref<1x4xf32, #tpu.memory_space<vmem>>, vector<1x4xf32>
    %523 = vector.broadcast %522 : vector<1x4xf32> to vector<2x4xf32>
    %524 = arith.addf %521, %523 : vector<2x4xf32>
    %cst_109 = arith.constant 0.000000e+00 : f32
    %525 = vector.broadcast %cst_109 : f32 to vector<2x4xf32>
    %526 = arith.cmpf ogt, %524, %525 : vector<2x4xf32>
    %cst_110 = arith.constant 5.000000e-02 : f32
    %527 = vector.broadcast %cst_110 : f32 to vector<2x4xf32>
    %528 = arith.mulf %527, %524 : vector<2x4xf32>
    %529 = arith.select %526, %524, %528 : vector<2x4xi1>, vector<2x4xf32>
    %c0_111 = arith.constant 0 : index
    %c0_112 = arith.constant 0 : index
    %530 = vector.load %arg11[%c0_111, %c0_112] : memref<2x4xf32, #tpu.memory_space<vmem>>, vector<2x4xf32>
    tpu.vector_store %arg11[%c0_111, %c0_112], %529 {strides = array<i32>} : memref<2x4xf32, #tpu.memory_space<vmem>>, vector<2x4xf32>,
    return
  }
}

</mosaic_0001>

<bundles_post_ra>
// kernel: lstm_model_forward.1
= control target key start
LH: loop header
LB: loop body
LE: loop exit
PB: predicated region body
PF: predicated region fallthrough
CT: control target
= control target key end

     0   :  { %16 = vsyncpa [#allocation4], 0  ;;  %s14410_s0 = inlined_call_operand.hbm [shape: f32[16,16], index: 0, kind: input, shape index: {}]   ;;  %s14411_s1 = inlined_call_operand.hbm [shape: f32[16,128], index: 1, kind: input, shape index: {}]   ;;  %s14412_s2 = inlined_call_operand.vmem [shape: f32[32,128], index: 2, kind: input, shape index: {}]   ;;  %s14413_s3 = inlined_call_operand.vmem [shape: f32[1,128], index: 3, kind: input, shape index: {}]   ;;  %s14414_s4 = inlined_call_operand.vmem [shape: f32[32,128], index: 4, kind: input, shape index: {}]   ;;  %s14415_s5 = inlined_call_operand.hbm [shape: f32[32,128], index: 5, kind: input, shape index: {}]   ;;  %s14416_s6 = inlined_call_operand.vmem [shape: f32[1,128], index: 6, kind: input, shape index: {}]   ;;  %s14417_s7 = inlined_call_operand.hbm [shape: f32[32,32], index: 7, kind: input, shape index: {}]   ;;  %s14418_s8 = inlined_call_operand.hbm [shape: f32[1,32], index: 8, kind: input, shape index: {}]   ;;  %s14419_s9 = inlined_call_operand.vmem [shape: f32[32,4], index: 9, kind: input, shape index: {}]   ;;  %s14420_s10 = inlined_call_operand.hbm [shape: f32[1,4], index: 10, kind: input, shape index: {}]   ;;  %s14421_s11 = inlined_call_operand.hbm [shape: f32[2,4], index: 11, kind: output, shape index: {}]  }
   0x1   :  { %17 = vsyncpa [#allocation7], 0 }
   0x2   :  { %18 = vsyncpa [#allocation10], 0 }
   0x3   :  { %19 = vsyncpa [#allocation13], 0 }
   0x4   :  { %20 = vsyncpa [#allocation5], 0  ;;  %s13165_s17 = smov [#allocation6]   ;;  %s13166_s19 = smov [#allocation9]  }
   0x5   :  { %s38_s18 = sshll.u32 %s13165_s17, 4  ;;  %s70_s20 = sshll.u32 %s13166_s19, 4  ;;  %s39_s18 = int_to_ptr.vmem [resolvable:$true] %s38_s18  ;;  %s13239_s20 = int_to_ptr.vmem [resolvable:$true] %s70_s20 }
   0x6   :  { %s13001_s23 = scalar_lea.hbm %s14411_s1, 256 }
   0x7   :  { %p13002_p0 = scmp.ne.s32.totalorder %s14411_s1, %s13001_s23  ;;  %p13005_p1 = scmp.lt.u32.totalorder %s13001_s23, %s14411_s1 }
   0x9   :  { %p13007_p2 = pnand %p13005_p1, %p13002_p0 }
   0xb   :  { %13010 = shalt.err (!%p13007_p2)
}
   0xc   :  { %s13011_s28 = scalar_lea.vmem %s39_s18, 256  ;;  %p13016_p4 = scmp.lt.s32.totalorder %s39_s18, %s39_s18 }
   0xd   :  { %p13012_p3 = scmp.ne.s32.totalorder %s39_s18, %s13011_s28  ;;  %p13017_p5 = scmp.lt.s32.totalorder %s13011_s28, %s13011_s28 }
   0xf   :  { %p13018_p6 = por %p13017_p5, %p13016_p4 }
  0x11   :  { %p13019_p7 = pnand %p13018_p6, %p13012_p3 }
  0x13   :  { %13022 = shalt.err (!%p13019_p7)
}
  0x14   :  { %s13167_s29 = smov 128   ;;  %s13168_s30 = smov 8  }
  0x15   :  { %44 = dma.hbm_to_vmem [thread:$0]  %s14411_s1, 256, %s39_s18, [#allocation7], %s13167_s29, %s13167_s29, %s13168_s30  }
  0x16   :  { %s13023_s16 = scalar_lea.hbm %s14417_s7, 512 }
  0x17   :  { %p13024_p8 = scmp.ne.s32.totalorder %s14417_s7, %s13023_s16  ;;  %p13027_p9 = scmp.lt.u32.totalorder %s13023_s16, %s14417_s7 }
  0x19   :  { %p13029_p10 = pnand %p13027_p9, %p13024_p8 }
  0x1b   :  { %13032 = shalt.err (!%p13029_p10)
}
  0x1c   :  { %s13033_s23 = scalar_lea.vmem %s13239_s20, 512  ;;  %p13038_p12 = scmp.lt.s32.totalorder %s13239_s20, %s13239_s20 }
  0x1d   :  { %p13034_p11 = scmp.ne.s32.totalorder %s13239_s20, %s13033_s23  ;;  %p13039_p13 = scmp.lt.s32.totalorder %s13033_s23, %s13033_s23 }
  0x1f   :  { %p13040_p0 = por %p13039_p13, %p13038_p12 }
  0x21   :  { %p13041_p1 = pnand %p13040_p0, %p13034_p11 }
  0x23   :  { %13044 = shalt.err (!%p13041_p1)
}
  0x24   :  { %76 = dma.hbm_to_vmem [thread:$0]  %s14417_s7, 512, %s13239_s20, [#allocation10], %s13167_s29, %s13167_s29, %s13168_s30  }
  0x25   :  { %s13169_s24 = smov [#allocation3]   ;;  %s13170_s26 = smov [#allocation8]  }
  0x26   :  { %s26_s25 = sshll.u32 %s13169_s24, 4  ;;  %s56_s27 = sshll.u32 %s13170_s26, 4  ;;  %s27_s25 = int_to_ptr.vmem [resolvable:$true] %s26_s25  ;;  %s13276_s27 = int_to_ptr.vmem [resolvable:$true] %s56_s27 }
  0x27   :  { %s13045_s13 = scalar_lea.hbm %s14410_s0, 256 }
  0x28   :  { %p13046_p2 = scmp.ne.s32.totalorder %s14410_s0, %s13045_s13  ;;  %p13049_p3 = scmp.lt.u32.totalorder %s13045_s13, %s14410_s0 }
  0x2a   :  { %p13051_p4 = pnand %p13049_p3, %p13046_p2 }
  0x2c   :  { %13054 = shalt.err (!%p13051_p4)
}
  0x2d   :  { %s13055_s7 = scalar_lea.vmem %s27_s25, 256  ;;  %p13060_p6 = scmp.lt.s32.totalorder %s27_s25, %s27_s25 }
  0x2e   :  { %p13056_p5 = scmp.ne.s32.totalorder %s27_s25, %s13055_s7  ;;  %p13061_p7 = scmp.lt.s32.totalorder %s13055_s7, %s13055_s7 }
  0x30   :  { %p13062_p8 = por %p13061_p7, %p13060_p6 }
  0x32   :  { %p13063_p9 = pnand %p13062_p8, %p13056_p5 }
  0x34   :  { %13066 = shalt.err (!%p13063_p9)
}
  0x35   :  { %32 = dma.hbm_to_vmem [thread:$0]  %s14410_s0, 256, %s27_s25, [#allocation4], %s13167_s29, %s13167_s29, %s13168_s30  }
  0x36   :  { %s13067_s23 = scalar_lea.hbm %s14415_s5, 512 }
  0x37   :  { %p13068_p10 = scmp.ne.s32.totalorder %s14415_s5, %s13067_s23  ;;  %p13071_p11 = scmp.lt.u32.totalorder %s13067_s23, %s14415_s5 }
  0x39   :  { %p13073_p12 = pnand %p13071_p11, %p13068_p10 }
  0x3b   :  { %13076 = shalt.err (!%p13073_p12)
}
  0x3c   :  { %s13077_s28 = scalar_lea.vmem %s13276_s27, 512  ;;  %p13082_p0 = scmp.lt.s32.totalorder %s13276_s27, %s13276_s27 }
  0x3d   :  { %p13078_p13 = scmp.ne.s32.totalorder %s13276_s27, %s13077_s28  ;;  %p13083_p1 = scmp.lt.s32.totalorder %s13077_s28, %s13077_s28 }
  0x3f   :  { %p13084_p2 = por %p13083_p1, %p13082_p0 }
  0x41   :  { %p13085_p3 = pnand %p13084_p2, %p13078_p13 }
  0x43   :  { %13088 = shalt.err (!%p13085_p3)
}
  0x44   :  { %62 = dma.hbm_to_vmem [thread:$0]  %s14415_s5, 512, %s13276_s27, [#allocation7], %s13167_s29, %s13167_s29, %s13168_s30  }
  0x45   :  { %s13171_s12 = smov [#allocation11]   ;;  %s13172_s14 = smov [#allocation12]  }
  0x46   :  { %s83_s13 = sshll.u32 %s13171_s12, 4  ;;  %s95_s15 = sshll.u32 %s13172_s14, 4  ;;  %s84_s13 = int_to_ptr.vmem [resolvable:$true] %s83_s13  ;;  %s96_s15 = int_to_ptr.vmem [resolvable:$true] %s95_s15 }
  0x47   :  { %s13089_s7 = scalar_lea.hbm %s14418_s8, 16 }
  0x48   :  { %p13090_p4 = scmp.ne.s32.totalorder %s14418_s8, %s13089_s7  ;;  %p13093_p5 = scmp.lt.u32.totalorder %s13089_s7, %s14418_s8 }
  0x4a   :  { %p13095_p6 = pnand %p13093_p5, %p13090_p4 }
  0x4c   :  { %13098 = shalt.err (!%p13095_p6)
}
  0x4d   :  { %s13099_s5 = scalar_lea.vmem %s84_s13, 16  ;;  %s13103_s29 = scalar_lea.vmem %s84_s13, 32 }
  0x4e   :  { %p13100_p7 = scmp.ne.s32.totalorder %s84_s13, %s13099_s5  ;;  %p13104_p8 = scmp.lt.s32.totalorder %s84_s13, %s84_s13 }
  0x4f   :  { %p13105_p9 = scmp.lt.s32.totalorder %s13103_s29, %s13099_s5 }
  0x51   :  { %p13106_p10 = por %p13105_p9, %p13104_p8 }
  0x53   :  { %p13107_p11 = pnand %p13106_p10, %p13100_p7 }
  0x55   :  { %13110 = shalt.err (!%p13107_p11)
}
  0x56   :  { %86 = dma.hbm_to_vmem [thread:$0]  %s14418_s8, 16, %s84_s13, [#allocation10]  }
  0x57   :  { %s13111_s18 = scalar_lea.hbm %s14420_s10, 16 }
  0x58   :  { %p13112_p12 = scmp.ne.s32.totalorder %s14420_s10, %s13111_s18  ;;  %p13115_p13 = scmp.lt.u32.totalorder %s13111_s18, %s14420_s10 }
  0x5a   :  { %p13117_p0 = pnand %p13115_p13, %p13112_p12 }
  0x5c   :  { %13120 = shalt.err (!%p13117_p0)
}
  0x5d   :  { %s13121_s25 = scalar_lea.vmem %s96_s15, 16  ;;  %s13125_s12 = scalar_lea.vmem %s96_s15, 32 }
  0x5e   :  { %p13122_p1 = scmp.ne.s32.totalorder %s96_s15, %s13121_s25  ;;  %p13126_p2 = scmp.lt.s32.totalorder %s96_s15, %s96_s15 }
  0x5f   :  { %p13127_p3 = scmp.lt.s32.totalorder %s13125_s12, %s13121_s25 }
  0x61   :  { %p13128_p4 = por %p13127_p3, %p13126_p2 }
  0x63   :  { %p13129_p5 = pnand %p13128_p4, %p13122_p1 }
  0x65   :  { %13132 = shalt.err (!%p13129_p5)
}
  0x66   :  { %98 = dma.hbm_to_vmem [thread:$0]  %s14420_s10, 16, %s96_s15, [#allocation13]  }
  0x67   :  { %13155 = dma.done.wait [#allocation4], 256  }
  0x68   :  { %13156 = vsyncadd [#allocation4], 4294967040 }
  0x69   :  { %13157 = dma.done.wait [#allocation7], 768  }
  0x6a   :  { %13158 = vsyncadd [#allocation7], 4294966528 }
  0x6b   :  { %13159 = dma.done.wait [#allocation10], 528  }
  0x6c   :  { %13160 = vsyncadd [#allocation10], 4294966768 }
  0x6d   :  { %13161 = dma.done.wait [#allocation13], 16  }
  0x6e   :  { %13162 = vsyncadd [#allocation13], 4294967280  ;;  %vm132_vm0 = vcmask 130048   ;;  %v119_v0 = vld [vmem:[#allocation6] sm:$0xff]  ;;  %v120_v1 = vld [vmem:[#allocation6 + $0x8] sm:$0xff]  ;;  %s13173_s15 = smov 64  }
  0x6f   :  { %v117_v2 = vld [vmem:[#allocation3] sm:$0xff]  ;;  %v140_v3 = vand.u32 4294901760, %v119_v0  ;;  %v143_v4 = vand.u32 4294901760, %v120_v1  ;;  %v118_v5 = vld [vmem:[#allocation3 + $0x8] sm:$0xff]  ;;  %v10158_v30 = vld [vmem:[%s14413_s3] ss:$0 sm:$0xff] }
  0x70   :  { %v134_v6 = vsel %vm132_vm0, %v117_v2, 0  ;;  %v137_v7 = vsel %vm132_vm0, %v118_v5, 0  ;;  %s13174_s3 = smov 32   ;;  %v121_v55 = vld [vmem:[%s14412_s2] sm:$0xff]  ;;  %v122_v56 = vld [vmem:[%s14412_s2 + $0x8] sm:$0xff]  ;;  %v13175_v57 = vmov 0.0|0.0  }
  0x71   :  { %v206_v8 = vand.u32 4294901760, %v134_v6  ;;  %v11898_v9 = vpack.c.bf16 %v143_v4, %v140_v3  ;;  %v216_v10 = vand.u32 4294901760, %v137_v7  ;;  %v228_v11 = vsub.f32 %v119_v0, %v140_v3  ;;  %11928 = vmatprep.subr.bf16.mxu1 %v13175_v57 }
  0x72   :  { %v235_v12 = vsub.f32 %v120_v1, %v143_v4  ;;  %v709_v58 = vand.u32 4294901760, %v121_v55  ;;  %v712_v59 = vand.u32 4294901760, %v122_v56  ;;  %vm13176_vm1 = vmmov 0  }
  0x73   :  { %v207_v13 = vsub.f32 %v134_v6, %v206_v8  ;;  %11899 = vmatprep.subr.bf16.mxu0 %v11898_v9  ;;  %v217_v14 = vsub.f32 %v137_v7, %v216_v10  ;;  %v229_v15 = vand.u32 4294901760, %v228_v11  ;;  %vm701_vm2 = vcmask 1041409  }
  0x74   :  { %v236_v16 = vand.u32 4294901760, %v235_v12  ;;  %11901 = vmatpush3.bf16.msra.mxu0 %v11898_v9  ;;  %v11906_v28 = vpack.c.bf16 %v235_v12, %v228_v11  ;;  %v13370_v60 = vpack.c.bf16 %v712_v59, %v709_v58  ;;  %v13372_v61 = vsub.f32 %v121_v55, %v709_v58 }
  0x75   :  { %v208_v17 = vand.u32 4294901760, %v207_v13  ;;  %v218_v18 = vand.u32 4294901760, %v217_v14  ;;  %v230_v19 = vsub.f32 %v228_v11, %v229_v15  ;;  %v13374_v62 = vsub.f32 %v122_v56, %v712_v59 }
  0x76   :  { %v237_v20 = vsub.f32 %v235_v12, %v236_v16  ;;  %v11914_v29 = vpack.c.bf16 %v236_v16, %v229_v15  ;;  %v790_v0 = vand.u32 4294901760, %v13372_v61  ;;  %vm705_vm3 = vcmask 261120  }
  0x77   :  { %v209_v21 = vsub.f32 %v207_v13, %v208_v17  ;;  %v219_v22 = vsub.f32 %v217_v14, %v218_v18  ;;  %v231_v23 = vand.u32 4294901760, %v230_v19  ;;  %v797_v1 = vand.u32 4294901760, %v13374_v62 }
  0x78   :  { %v238_v24 = vand.u32 4294901760, %v237_v20  ;;  %v791_v2 = vsub.f32 %v13372_v61, %v790_v0  ;;  %vm693_vm4 = vcmask 253952   ;;  %vm1257_vm5 = vcmask 254977  }
  0x79   :  { %v210_v25 = vand.u32 4294901760, %v209_v21  ;;  %v220_v26 = vand.u32 4294901760, %v219_v22  ;;  %v798_v3 = vsub.f32 %v13374_v62, %v797_v1  ;;  %v13177_v21 = vmov 0.0  }
  0x7a   :  { %v11902_v27 = vpack.c.bf16 %v238_v24, %v231_v23  ;;  %v792_v5 = vand.u32 4294901760, %v791_v2  ;;  %10795 = vmatprep.mubr.msk.f32.mxu1 %vm13176_vm1, %v13177_v21  ;;  %vm1820_vm6 = vcmask 256002   ;;  %vm2384_vm7 = vcmask 257027  }
  0x7b   :  { %10738 = vmatprep.mubr.f32.mxu0 %v210_v25  ;;  %v799_v6 = vand.u32 4294901760, %v798_v3  ;;  %vm2948_vm8 = vcmask 258052   ;;  %vm3512_vm9 = vcmask 259077   ;;  %vm4076_vm10 = vcmask 260102  }
  0x7c   :  { %10739 = vmatmul.mubr.f32.vlgmr.msra.gmra.mrb[0].mxu0 %v220_v26  ;;  %11903 = vmatprep.subr.bf16.mxu0 %v11902_v27  ;;  %vm4640_vm11 = vcmask 261127   ;;  %vm10138_vm14 = vcmask 25600  }
  0x7d   :  { %11905 = vmatpush3.bf16.msra.mxu0 %v11902_v27  ;;  %10745 = vmatprep.mubr.f32.mxu0 %v206_v8  ;;  %v13388_v7 = vpack.c.bf16 %v799_v6, %v792_v5 }
  0x7e   :  { %11907 = vmatprep.subr.bf16.mxu0 %v11906_v28 }
  0x7f   :  { %11930 = vmatpush3.bf16.msra.mxu1 %v13388_v7 }
  0x80   :  { %11931 = vmatprep.subr.bf16.mxu1 %v13175_v57 }
  0x84   :  { %10746 = vmatmul.mubr.f32.vlgmr.msra.gmra.mrb[0].mxu0 %v216_v10 }
  0x85   :  { %11909 = vmatpush3.bf16.msra.mxu0 %v11906_v28  ;;  %10752 = vmatprep.mubr.f32.mxu0 %v207_v13 }
  0x86   :  { %11911 = vmatprep.subr.bf16.mxu0 %v11898_v9 }
  0x8c   :  { %10753 = vmatmul.mubr.f32.vlgmr.msra.gmra.mrb[0].mxu0 %v217_v14 }
  0x8d   :  { %11913 = vmatpush3.bf16.msra.mxu0 %v11898_v9  ;;  %10759 = vmatprep.mubr.f32.mxu0 %v208_v17 }
  0x8e   :  { %11915 = vmatprep.subr.bf16.mxu0 %v11914_v29 }
  0x94   :  { %10760 = vmatmul.mubr.f32.vlgmr.msra.gmra.mrb[0].mxu0 %v218_v18 }
  0x95   :  { %11917 = vmatpush3.bf16.msra.mxu0 %v11914_v29  ;;  %10766 = vmatprep.mubr.f32.mxu0 %v206_v8 }
  0x96   :  { %11919 = vmatprep.subr.bf16.mxu0 %v11898_v9 }
  0x9c   :  { %10767 = vmatmul.mubr.f32.vlgmr.msra.gmra.mrb[0].mxu0 %v216_v10 }
  0x9d   :  { %11921 = vmatpush3.bf16.msra.mxu0 %v11898_v9  ;;  %10773 = vmatprep.mubr.f32.mxu0 %v206_v8  ;;  %v123_v8 = vld [vmem:[%s14412_s2 + $0x10] sm:$0xff]  ;;  %v124_v9 = vld [vmem:[%s14412_s2 + $0x18] sm:$0xff] }
  0x9e   :  { %11922 = vmatprep.subr.bf16.mxu0 %v13175_v57  ;;  %v718_v11 = vand.u32 4294901760, %v124_v9 }
  0xa0   :  { %v810_v13 = vsub.f32 %v124_v9, %v718_v11 }
  0xa2   :  { %v811_v15 = vand.u32 4294901760, %v810_v13 }
  0xa4   :  { %10774 = vmatmul.mubr.f32.vlgmr.msra.gmra.mrb[0].mxu0 %v216_v10  ;;  %v715_v10 = vand.u32 4294901760, %v123_v8  ;;  %v812_v17 = vsub.f32 %v810_v13, %v811_v15 }
  0xa5   :  { %11924 = vmatpush3.bf16.msra.mxu0 %v13370_v60  ;;  %10784 = vmatprep.mubr.msk.f32.mxu0 %vm13176_vm1, %v13177_v21 }
  0xa6   :  { %11925 = vmatprep.subr.bf16.mxu0 %v13175_v57  ;;  %v803_v12 = vsub.f32 %v123_v8, %v715_v10  ;;  %v813_v19 = vand.u32 4294901760, %v812_v17  ;;  %v13408_v24 = vpack.c.bf16 %v718_v11, %v715_v10 }
  0xa8   :  { %v804_v14 = vand.u32 4294901760, %v803_v12  ;;  %v13410_v25 = vpack.c.bf16 %v810_v13, %v803_v12 }
  0xa9   :  { %11927 = vmatpush3.bf16.msra.mxu0 %v13408_v24 }
  0xaa   :  { %v805_v16 = vsub.f32 %v803_v12, %v804_v14  ;;  %11958 = vmatprep.subr.bf16.mxu0 %v13175_v57 }
  0xac   :  { %v806_v18 = vand.u32 4294901760, %v805_v16 }
  0xae   :  { %v13398_v20 = vpack.c.bf16 %v813_v19, %v806_v18 }
  0xb0   :  { %11933 = vmatpush3.bf16.msra.mxu1 %v13398_v20 }
  0xb1   :  { %11934 = vmatprep.subr.bf16.mxu1 %v13175_v57 }
 0x177   :  { %v10775_v31 = vpop.f32.mrb[0].mxu0 }
 0x178   :  { %v13340_v32 = vadd.f32 %v10775_v31, %v10158_v30  ;;  %v631_v33 = vpop.f32.mrb[1].mxu0 }
 0x179   :  { %v13342_v34 = vadd.f32 %v10158_v30, %v631_v33  ;;  %v13421_v30 = vpack.c.bf16 %v811_v15, %v804_v14 }
 0x17a   :  { %12745 = vtanh.f32 %v13340_v32  ;;  %v10160_v37 = vmul.f32 -1.442695, %v13340_v32 }
 0x17b   :  { %12747 = vtanh.f32 %v13342_v34  ;;  %v10159_v38 = vmul.f32 -1.442695, %v13342_v34 }
 0x17c   :  { %12749 = vpow2.f32 %v10160_v37 }
 0x17d   :  { %12751 = vpow2.f32 %v10159_v38 }
 0x184   :  { %v12746_v35 = vpop.eup %12745 }
 0x185   :  { %661 = vrot.lane.b32.xlu0 %v12746_v35, %s13173_s15  ;;  %v12748_v36 = vpop.eup %12747  ;;  %v13426_v35 = vpack.c.bf16 %v13374_v62, %v13372_v61 }
 0x186   :  { %v12750_v39 = vpop.eup %12749 }
 0x187   :  { %v648_v40 = vadd.f32 1.0, %v12750_v39  ;;  %v12752_v41 = vpop.eup %12751 }
 0x188   :  { %v647_v42 = vadd.f32 1.0, %v12752_v41  ;;  %v13447_v41 = vpack.c.bf16 %v797_v1, %v790_v0 }
 0x189   :  { %659 = vrot.lane.b32.xlu0 %v12748_v36, %s13173_s15  ;;  %12753 = vrcp.f32 %v648_v40 }
 0x18a   :  { %12755 = vrcp.f32 %v647_v42 }
 0x193   :  { %v12754_v43 = vpop.eup %12753 }
 0x194   :  { %v13351_v46 = vpop.eup %12755  ;;  %v656_v49 = vmul.f32 0.0, %v12754_v43 }
 0x195   :  { %v655_v52 = vmul.f32 0.0, %v13351_v46 }
 0x1f7   :  { %v662_v44 = vpop.permute.xlu0 %661 }
 0x1f8   :  { %v666_v45 = vmul.f32 %v12754_v43, %v662_v44 }
 0x1fa   :  { %671 = vrot.lane.b32.xlu1 %v666_v45, %s13174_s3 }
 0x1fb   :  { %v660_v47 = vpop.permute.xlu0 %659 }
 0x1fc   :  { %v665_v48 = vmul.f32 %v13351_v46, %v660_v47 }
 0x1fe   :  { %669 = vrot.lane.b32.xlu1 %v665_v48, %s13174_s3 }
 0x26c   :  { %v672_v50 = vpop.permute.xlu1 %671 }
 0x26d   :  { %v13355_v51 = vadd.f32 %v672_v50, %v656_v49 }
 0x26f   :  { %12757 = vtanh.f32 %v13355_v51 }
 0x270   :  { %v670_v53 = vpop.permute.xlu1 %669 }
 0x271   :  { %v13359_v54 = vadd.f32 %v670_v53, %v655_v52 }
 0x273   :  { %12759 = vtanh.f32 %v13359_v54  ;;  %v1215_v6 = vrot.slane %v13359_v54, 7 }
 0x279   :  { %v12758_v63 = vpop.eup %12757 }
 0x27a   :  { %683 = vrot.lane.b32.xlu0 %v12758_v63, %s13173_s15 }
 0x27d   :  { %v12760_v4 = vpop.eup %12759 }
 0x27e   :  { %681 = vrot.lane.b32.xlu1 %v12760_v4, %s13173_s15  ;;  %v1216_v4 = vrot.slane %v13355_v51, 7 }
 0x2ec   :  { %v684_v22 = vpop.permute.xlu0 %683 }
 0x2ed   :  { %v13406_v23 = vmul.f32 %v12754_v43, %v684_v22 }
 0x2ef   :  { %v700_v27 = vrot.slane %v13406_v23, 7 }
 0x2f0   :  { %v682_v26 = vpop.permute.xlu1 %681 }
 0x2f1   :  { %v13416_v28 = vmul.f32 %v13351_v46, %v682_v26 }
 0x2f3   :  { %v702_v29 = vsel %vm701_vm2, %v700_v27, %v13416_v28 }
 0x2f4   :  { %703 = vrot.lane.b32.xlu0 %v702_v29, %s13174_s3 }
 0x366   :  { %v704_v31 = vpop.permute.xlu0 %703 }
 0x367   :  { %v706_v33 = vsel %vm705_vm3, %v704_v31, 0 }
 0x368   :  { %v777_v36 = vand.u32 4294901760, %v706_v33 }
 0x36a   :  { %v778_v37 = vsub.f32 %v706_v33, %v777_v36  ;;  %10796 = vmatmul.mubr.f32.vlgmr.msra.gmra.mrb[0].mxu1 %v777_v36 }
 0x36b   :  { %11936 = vmatpush3.bf16.msra.mxu1 %v13426_v35  ;;  %10806 = vmatprep.mubr.msk.f32.mxu1 %vm13176_vm1, %v13177_v21 }
 0x36c   :  { %v779_v38 = vand.u32 4294901760, %v778_v37  ;;  %11937 = vmatprep.subr.bf16.mxu1 %v13175_v57 }
 0x36e   :  { %v780_v39 = vsub.f32 %v778_v37, %v779_v38 }
 0x36f   :  { %11939 = vmatpush3.bf16.msra.mxu1 %v13410_v25 }
 0x370   :  { %v781_v40 = vand.u32 4294901760, %v780_v39  ;;  %11940 = vmatprep.subr.bf16.mxu1 %v13175_v57 }
 0x372   :  { %10785 = vmatmul.mubr.f32.vlgmr.msra.gmra.mrb[2].mxu0 %v781_v40  ;;  %10807 = vmatmul.mubr.f32.vlgmr.msra.gmra.mrb[0].mxu1 %v778_v37 }
 0x373   :  { %11942 = vmatpush3.bf16.msra.mxu1 %v13370_v60  ;;  %10817 = vmatprep.mubr.msk.f32.mxu1 %vm13176_vm1, %v13177_v21 }
 0x374   :  { %11943 = vmatprep.subr.bf16.mxu1 %v13175_v57  ;;  %11960 = vmatpush3.bf16.msra.mxu0 %v13370_v60 }
 0x375   :  { %11961 = vmatprep.subr.bf16.mxu0 %v13175_v57  ;;  %10850 = vmatprep.mubr.msk.f32.mxu0 %vm13176_vm1, %v13177_v21 }
 0x377   :  { %11945 = vmatpush3.bf16.msra.mxu1 %v13408_v24 }
 0x378   :  { %11946 = vmatprep.subr.bf16.mxu1 %v13175_v57  ;;  %11963 = vmatpush3.bf16.msra.mxu0 %v13408_v24 }
 0x379   :  { %11964 = vmatprep.subr.bf16.mxu0 %v13175_v57 }
 0x37a   :  { %10818 = vmatmul.mubr.f32.vlgmr.msra.gmra.mrb[0].mxu1 %v779_v38 }
 0x37b   :  { %11948 = vmatpush3.bf16.msra.mxu1 %v13447_v41  ;;  %10828 = vmatprep.mubr.msk.f32.mxu1 %vm13176_vm1, %v13177_v21 }
 0x37c   :  { %11949 = vmatprep.subr.bf16.mxu1 %v13175_v57 }
 0x37f   :  { %11951 = vmatpush3.bf16.msra.mxu1 %v13421_v30 }
 0x380   :  { %11952 = vmatprep.subr.bf16.mxu1 %v13175_v57 }
 0x382   :  { %10829 = vmatmul.mubr.f32.vlgmr.msra.gmra.mrb[0].mxu1 %v777_v36 }
 0x383   :  { %11954 = vmatpush3.bf16.msra.mxu1 %v13370_v60  ;;  %10839 = vmatprep.mubr.msk.f32.mxu1 %vm13176_vm1, %v13177_v21 }
 0x384   :  { %11955 = vmatprep.subr.bf16.mxu1 %v13175_v57 }
 0x387   :  { %11957 = vmatpush3.bf16.msra.mxu1 %v13408_v24 }
 0x388   :  { %11994 = vmatprep.subr.bf16.mxu1 %v13175_v57 }
 0x38a   :  { %10840 = vmatmul.mubr.f32.vlgmr.msra.gmra.mrb[0].mxu1 %v777_v36 }
 0x38b   :  { %11996 = vmatpush3.bf16.msra.mxu1 %v13370_v60  ;;  %10916 = vmatprep.mubr.msk.f32.mxu1 %vm13176_vm1, %v13177_v21 }
 0x38c   :  { %11997 = vmatprep.subr.bf16.mxu1 %v13175_v57 }
 0x38f   :  { %11999 = vmatpush3.bf16.msra.mxu1 %v13408_v24 }
 0x390   :  { %12000 = vmatprep.subr.bf16.mxu1 %v13175_v57 }
 0x445   :  { %v783_v42 = vpop.f32.mrb[2].mxu0 }
 0x446   :  { %v10786_v43 = vpop.f32.mrb[3].mxu0 }
 0x45d   :  { %v1189_v44 = vpop.f32.mrb[0].mxu1 }
 0x45e   :  { %v12548_v45 = vadd.f32 %v1189_v44, %v783_v42  ;;  %v10841_v46 = vpop.f32.mrb[1].mxu1 }
 0x460   :  { %v1194_v47 = vrot.slane %v12548_v45, 7  ;;  %v1198_v48 = vadd.f32 %v12548_v45, %v13340_v32 }
 0x462   :  { %v1197_v49 = vadd.f32 %v13342_v34, %v1194_v47  ;;  %12761 = vtanh.f32 %v1198_v48  ;;  %v10162_v53 = vmul.f32 -1.442695, %v1198_v48 }
 0x464   :  { %12763 = vtanh.f32 %v1197_v49  ;;  %v10161_v55 = vmul.f32 -1.442695, %v1197_v49 }
 0x465   :  { %12765 = vpow2.f32 %v10162_v53 }
 0x466   :  { %12767 = vpow2.f32 %v10161_v55 }
 0x46c   :  { %v12762_v50 = vpop.eup %12761 }
 0x46d   :  { %1225 = vrot.lane.b32.xlu0 %v12762_v50, %s13173_s15 }
 0x46e   :  { %v12764_v52 = vpop.eup %12763 }
 0x46f   :  { %1223 = vrot.lane.b32.xlu1 %v12764_v52, %s13173_s15  ;;  %v12766_v56 = vpop.eup %12765 }
 0x470   :  { %v12768_v58 = vpop.eup %12767  ;;  %v1206_v59 = vadd.f32 1.0, %v12766_v56 }
 0x471   :  { %v1205_v61 = vadd.f32 1.0, %v12768_v58 }
 0x472   :  { %12769 = vrcp.f32 %v1206_v59 }
 0x473   :  { %12771 = vrcp.f32 %v1205_v61 }
 0x47c   :  { %v12770_v62 = vpop.eup %12769 }
 0x47d   :  { %v12772_v1 = vpop.eup %12771  ;;  %v1220_v5 = vmul.f32 %v12770_v62, %v1216_v4 }
 0x47e   :  { %v1219_v10 = vmul.f32 %v12772_v1, %v1215_v6 }
 0x4df   :  { %v1226_v63 = vpop.permute.xlu0 %1225 }
 0x4e0   :  { %v1230_v0 = vmul.f32 %v12770_v62, %v1226_v63 }
 0x4e1   :  { %v1224_v2 = vpop.permute.xlu1 %1223 }
 0x4e2   :  { %1235 = vrot.lane.b32.xlu0 %v1230_v0, %s13174_s3  ;;  %v1229_v3 = vmul.f32 %v12772_v1, %v1224_v2 }
 0x4e4   :  { %1233 = vrot.lane.b32.xlu1 %v1229_v3, %s13174_s3 }
 0x554   :  { %v1236_v8 = vpop.permute.xlu0 %1235 }
 0x555   :  { %v13478_v9 = vadd.f32 %v1236_v8, %v1220_v5 }
 0x556   :  { %v1234_v11 = vpop.permute.xlu1 %1233 }
 0x557   :  { %12773 = vtanh.f32 %v13478_v9  ;;  %v13481_v12 = vadd.f32 %v1234_v11, %v1219_v10 }
 0x559   :  { %12775 = vtanh.f32 %v13481_v12  ;;  %v1778_v61 = vrot.slane %v13481_v12, 7 }
 0x561   :  { %v12774_v13 = vpop.eup %12773 }
 0x562   :  { %1247 = vrot.lane.b32.xlu0 %v12774_v13, %s13173_s15 }
 0x563   :  { %v12776_v14 = vpop.eup %12775 }
 0x564   :  { %1245 = vrot.lane.b32.xlu1 %v12776_v14, %s13173_s15 }
 0x5d4   :  { %v1248_v51 = vpop.permute.xlu0 %1247 }
 0x5d5   :  { %v13488_v16 = vmul.f32 %v12770_v62, %v1248_v51  ;;  %v1779_v62 = vrot.slane %v13478_v9, 7 }
 0x5d6   :  { %v1246_v15 = vpop.permute.xlu1 %1245 }
 0x5d7   :  { %v13486_v54 = vmul.f32 %v12772_v1, %v1246_v15 }
 0x5d9   :  { %v1264_v17 = vrot.slane %v13486_v54, 1 }
 0x5db   :  { %v1265_v18 = vsel %vm701_vm2, %v13488_v16, %v1264_v17 }
 0x5dc   :  { %1266 = vrot.lane.b32.xlu1 %v1265_v18, %s13174_s3 }
 0x64e   :  { %v1267_v19 = vpop.permute.xlu1 %1266 }
 0x64f   :  { %v1268_v22 = vsel %vm705_vm3, %v1267_v19, 0 }
 0x650   :  { %v1339_v26 = vand.u32 4294901760, %v1268_v22 }
 0x652   :  { %v1340_v27 = vsub.f32 %v1268_v22, %v1339_v26 }
 0x654   :  { %v1341_v29 = vand.u32 4294901760, %v1340_v27 }
 0x656   :  { %v1342_v31 = vsub.f32 %v1340_v27, %v1341_v29 }
 0x658   :  { %v1343_v33 = vand.u32 4294901760, %v1342_v31 }
 0x65a   :  { %10851 = vmatmul.mubr.f32.vlgmr.msra.gmra.mrb[4].mxu0 %v1343_v33 }
 0x65b   :  { %11966 = vmatpush3.bf16.msra.mxu0 %v13388_v7  ;;  %10861 = vmatprep.mubr.msk.f32.mxu0 %vm13176_vm1, %v13177_v21 }
 0x65c   :  { %11967 = vmatprep.subr.bf16.mxu0 %v13175_v57 }
 0x65f   :  { %11969 = vmatpush3.bf16.msra.mxu0 %v13398_v20 }
 0x660   :  { %11970 = vmatprep.subr.bf16.mxu0 %v13175_v57 }
 0x662   :  { %10862 = vmatmul.mubr.f32.vlgmr.msra.gmra.mrb[4].mxu0 %v1339_v26 }
 0x663   :  { %11972 = vmatpush3.bf16.msra.mxu0 %v13426_v35  ;;  %10872 = vmatprep.mubr.msk.f32.mxu0 %vm13176_vm1, %v13177_v21 }
 0x664   :  { %11973 = vmatprep.subr.bf16.mxu0 %v13175_v57 }
 0x667   :  { %11975 = vmatpush3.bf16.msra.mxu0 %v13410_v25 }
 0x668   :  { %11976 = vmatprep.subr.bf16.mxu0 %v13175_v57 }
 0x66a   :  { %10873 = vmatmul.mubr.f32.vlgmr.msra.gmra.mrb[4].mxu0 %v1340_v27 }
 0x66b   :  { %11978 = vmatpush3.bf16.msra.mxu0 %v13370_v60  ;;  %10883 = vmatprep.mubr.msk.f32.mxu0 %vm13176_vm1, %v13177_v21 }
 0x66c   :  { %11979 = vmatprep.subr.bf16.mxu0 %v13175_v57 }
 0x66f   :  { %11981 = vmatpush3.bf16.msra.mxu0 %v13408_v24 }
 0x670   :  { %11982 = vmatprep.subr.bf16.mxu0 %v13175_v57 }
 0x672   :  { %10884 = vmatmul.mubr.f32.vlgmr.msra.gmra.mrb[4].mxu0 %v1341_v29 }
 0x673   :  { %11984 = vmatpush3.bf16.msra.mxu0 %v13447_v41  ;;  %10894 = vmatprep.mubr.msk.f32.mxu0 %vm13176_vm1, %v13177_v21 }
 0x674   :  { %11985 = vmatprep.subr.bf16.mxu0 %v13175_v57 }
 0x677   :  { %11987 = vmatpush3.bf16.msra.mxu0 %v13421_v30 }
 0x678   :  { %11988 = vmatprep.subr.bf16.mxu0 %v13175_v57 }
 0x67a   :  { %10895 = vmatmul.mubr.f32.vlgmr.msra.gmra.mrb[4].mxu0 %v1339_v26 }
 0x67b   :  { %11990 = vmatpush3.bf16.msra.mxu0 %v13370_v60  ;;  %10905 = vmatprep.mubr.msk.f32.mxu0 %vm13176_vm1, %v13177_v21 }
 0x67c   :  { %11991 = vmatprep.subr.bf16.mxu0 %v13175_v57 }
 0x67f   :  { %11993 = vmatpush3.bf16.msra.mxu0 %v13408_v24 }
 0x680   :  { %12030 = vmatprep.subr.bf16.mxu0 %v13175_v57 }
 0x682   :  { %10906 = vmatmul.mubr.f32.vlgmr.msra.gmra.mrb[4].mxu0 %v1339_v26 }
 0x683   :  { %12032 = vmatpush3.bf16.msra.mxu0 %v13370_v60  ;;  %10982 = vmatprep.mubr.msk.f32.mxu0 %vm13176_vm1, %v13177_v21 }
 0x684   :  { %12033 = vmatprep.subr.bf16.mxu0 %v13175_v57 }
 0x687   :  { %12035 = vmatpush3.bf16.msra.mxu0 %v13408_v24 }
 0x688   :  { %12036 = vmatprep.subr.bf16.mxu0 %v13175_v57 }
 0x755   :  { %v1751_v36 = vpop.f32.mrb[4].mxu0 }
 0x756   :  { %v1756_v37 = vrot.slane %v1751_v36, 6  ;;  %v1757_v38 = vrot.slane %v1751_v36, 7  ;;  %v10907_v39 = vpop.f32.mrb[5].mxu0 }
 0x758   :  { %v1760_v40 = vadd.f32 %v13342_v34, %v1756_v37  ;;  %v1761_v42 = vadd.f32 %v13340_v32, %v1757_v38 }
 0x75a   :  { %12777 = vtanh.f32 %v1760_v40  ;;  %v10163_v45 = vmul.f32 -1.442695, %v1760_v40  ;;  %v10164_v46 = vmul.f32 -1.442695, %v1761_v42 }
 0x75b   :  { %12779 = vtanh.f32 %v1761_v42 }
 0x75c   :  { %12781 = vpow2.f32 %v10163_v45 }
 0x75d   :  { %12783 = vpow2.f32 %v10164_v46 }
 0x764   :  { %v12778_v43 = vpop.eup %12777 }
 0x765   :  { %v12780_v44 = vpop.eup %12779  ;;  %1786 = vrot.lane.b32.xlu0 %v12778_v43, %s13173_s15 }
 0x766   :  { %1788 = vrot.lane.b32.xlu1 %v12780_v44, %s13173_s15  ;;  %v12782_v47 = vpop.eup %12781 }
 0x767   :  { %v12784_v48 = vpop.eup %12783  ;;  %v1768_v49 = vadd.f32 1.0, %v12782_v47 }
 0x768   :  { %v1769_v50 = vadd.f32 1.0, %v12784_v48 }
 0x769   :  { %12785 = vrcp.f32 %v1768_v49 }
 0x76a   :  { %12787 = vrcp.f32 %v1769_v50 }
 0x773   :  { %v12786_v52 = vpop.eup %12785 }
 0x774   :  { %v12788_v55 = vpop.eup %12787  ;;  %v1782_v63 = vmul.f32 %v12786_v52, %v1778_v61 }
 0x775   :  { %v1783_v0 = vmul.f32 %v12788_v55, %v1779_v62 }
 0x7d7   :  { %v1787_v53 = vpop.permute.xlu0 %1786 }
 0x7d8   :  { %v1789_v56 = vpop.permute.xlu1 %1788  ;;  %v1792_v58 = vmul.f32 %v12786_v52, %v1787_v53 }
 0x7d9   :  { %v1793_v59 = vmul.f32 %v12788_v55, %v1789_v56 }
 0x7da   :  { %1796 = vrot.lane.b32.xlu0 %v1792_v58, %s13174_s3 }
 0x7db   :  { %1798 = vrot.lane.b32.xlu1 %v1793_v59, %s13174_s3 }
 0x84c   :  { %v1797_v1 = vpop.permute.xlu0 %1796 }
 0x84d   :  { %v1799_v2 = vpop.permute.xlu1 %1798  ;;  %v13539_v3 = vadd.f32 %v1797_v1, %v1782_v63 }
 0x84e   :  { %v13541_v4 = vadd.f32 %v1799_v2, %v1783_v0 }
 0x84f   :  { %12789 = vtanh.f32 %v13539_v3 }
 0x850   :  { %12791 = vtanh.f32 %v13541_v4  ;;  %v2343_v56 = vrot.slane %v13541_v4, 7 }
 0x859   :  { %v12790_v5 = vpop.eup %12789 }
 0x85a   :  { %v12792_v6 = vpop.eup %12791  ;;  %1808 = vrot.lane.b32.xlu0 %v12790_v5, %s13173_s15 }
 0x85b   :  { %1810 = vrot.lane.b32.xlu1 %v12792_v6, %s13173_s15 }
 0x8cc   :  { %v1809_v8 = vpop.permute.xlu0 %1808 }
 0x8cd   :  { %v1811_v9 = vpop.permute.xlu1 %1810  ;;  %v13547_v10 = vmul.f32 %v12786_v52, %v1809_v8 }
 0x8ce   :  { %v13549_v11 = vmul.f32 %v12788_v55, %v1811_v9  ;;  %v2342_v55 = vrot.slane %v13539_v3, 7 }
 0x8cf   :  { %v1827_v12 = vrot.slane %v13547_v10, 2 }
 0x8d0   :  { %v1828_v13 = vrot.slane %v13549_v11, 1 }
 0x8d2   :  { %v1829_v14 = vsel %vm701_vm2, %v1828_v13, %v1827_v12 }
 0x8d3   :  { %1830 = vrot.lane.b32.xlu0 %v1829_v14, %s13174_s3 }
 0x945   :  { %v1831_v51 = vpop.permute.xlu0 %1830 }
 0x946   :  { %v1832_v15 = vsel %vm705_vm3, %v1831_v51, 0 }
 0x947   :  { %v1903_v17 = vand.u32 4294901760, %v1832_v15 }
 0x949   :  { %v1904_v18 = vsub.f32 %v1832_v15, %v1903_v17 }
 0x94b   :  { %v1905_v19 = vand.u32 4294901760, %v1904_v18 }
 0x94d   :  { %v1906_v22 = vsub.f32 %v1904_v18, %v1905_v19 }
 0x94f   :  { %v1907_v26 = vand.u32 4294901760, %v1906_v22 }
 0x951   :  { %10917 = vmatmul.mubr.f32.vlgmr.msra.gmra.mrb[2].mxu1 %v1907_v26 }
 0x952   :  { %12002 = vmatpush3.bf16.msra.mxu1 %v13388_v7  ;;  %10927 = vmatprep.mubr.msk.f32.mxu1 %vm13176_vm1, %v13177_v21 }
 0x953   :  { %12003 = vmatprep.subr.bf16.mxu1 %v13175_v57 }
 0x956   :  { %12005 = vmatpush3.bf16.msra.mxu1 %v13398_v20 }
 0x957   :  { %12006 = vmatprep.subr.bf16.mxu1 %v13175_v57 }
 0x959   :  { %10928 = vmatmul.mubr.f32.vlgmr.msra.gmra.mrb[2].mxu1 %v1903_v17 }
 0x95a   :  { %12008 = vmatpush3.bf16.msra.mxu1 %v13426_v35  ;;  %10938 = vmatprep.mubr.msk.f32.mxu1 %vm13176_vm1, %v13177_v21 }
 0x95b   :  { %12009 = vmatprep.subr.bf16.mxu1 %v13175_v57 }
 0x95e   :  { %12011 = vmatpush3.bf16.msra.mxu1 %v13410_v25 }
 0x95f   :  { %12012 = vmatprep.subr.bf16.mxu1 %v13175_v57 }
 0x961   :  { %10939 = vmatmul.mubr.f32.vlgmr.msra.gmra.mrb[2].mxu1 %v1904_v18 }
 0x962   :  { %12014 = vmatpush3.bf16.msra.mxu1 %v13370_v60  ;;  %10949 = vmatprep.mubr.msk.f32.mxu1 %vm13176_vm1, %v13177_v21 }
 0x963   :  { %12015 = vmatprep.subr.bf16.mxu1 %v13175_v57 }
 0x966   :  { %12017 = vmatpush3.bf16.msra.mxu1 %v13408_v24 }
 0x967   :  { %12018 = vmatprep.subr.bf16.mxu1 %v13175_v57 }
 0x969   :  { %10950 = vmatmul.mubr.f32.vlgmr.msra.gmra.mrb[2].mxu1 %v1905_v19 }
 0x96a   :  { %12020 = vmatpush3.bf16.msra.mxu1 %v13447_v41  ;;  %10960 = vmatprep.mubr.msk.f32.mxu1 %vm13176_vm1, %v13177_v21 }
 0x96b   :  { %12021 = vmatprep.subr.bf16.mxu1 %v13175_v57 }
 0x96e   :  { %12023 = vmatpush3.bf16.msra.mxu1 %v13421_v30 }
 0x96f   :  { %12024 = vmatprep.subr.bf16.mxu1 %v13175_v57 }
 0x971   :  { %10961 = vmatmul.mubr.f32.vlgmr.msra.gmra.mrb[2].mxu1 %v1903_v17 }
 0x972   :  { %12026 = vmatpush3.bf16.msra.mxu1 %v13370_v60  ;;  %10971 = vmatprep.mubr.msk.f32.mxu1 %vm13176_vm1, %v13177_v21 }
 0x973   :  { %12027 = vmatprep.subr.bf16.mxu1 %v13175_v57 }
 0x976   :  { %12029 = vmatpush3.bf16.msra.mxu1 %v13408_v24 }
 0x977   :  { %12066 = vmatprep.subr.bf16.mxu1 %v13175_v57 }
 0x979   :  { %10972 = vmatmul.mubr.f32.vlgmr.msra.gmra.mrb[2].mxu1 %v1903_v17 }
 0x97a   :  { %12068 = vmatpush3.bf16.msra.mxu1 %v13370_v60  ;;  %11048 = vmatprep.mubr.msk.f32.mxu1 %vm13176_vm1, %v13177_v21 }
 0x97b   :  { %12069 = vmatprep.subr.bf16.mxu1 %v13175_v57 }
 0x97e   :  { %12071 = vmatpush3.bf16.msra.mxu1 %v13408_v24 }
 0x97f   :  { %12072 = vmatprep.subr.bf16.mxu1 %v13175_v57 }
 0xa4c   :  { %v2315_v27 = vpop.f32.mrb[2].mxu1 }
 0xa4d   :  { %v2320_v29 = vrot.slane %v2315_v27, 5  ;;  %v2321_v31 = vrot.slane %v2315_v27, 6  ;;  %v10973_v33 = vpop.f32.mrb[3].mxu1 }
 0xa4f   :  { %v2324_v36 = vadd.f32 %v13342_v34, %v2320_v29  ;;  %v2325_v37 = vadd.f32 %v13340_v32, %v2321_v31 }
 0xa51   :  { %12793 = vtanh.f32 %v2324_v36  ;;  %v10165_v40 = vmul.f32 -1.442695, %v2324_v36  ;;  %v10166_v42 = vmul.f32 -1.442695, %v2325_v37 }
 0xa52   :  { %12795 = vtanh.f32 %v2325_v37 }
 0xa53   :  { %12797 = vpow2.f32 %v10165_v40 }
 0xa54   :  { %12799 = vpow2.f32 %v10166_v42 }
 0xa5b   :  { %v12794_v38 = vpop.eup %12793 }
 0xa5c   :  { %v12796_v39 = vpop.eup %12795  ;;  %2350 = vrot.lane.b32.xlu1 %v12794_v38, %s13173_s15 }
 0xa5d   :  { %2352 = vrot.lane.b32.xlu0 %v12796_v39, %s13173_s15  ;;  %v12798_v43 = vpop.eup %12797 }
 0xa5e   :  { %v12800_v44 = vpop.eup %12799  ;;  %v2332_v45 = vadd.f32 1.0, %v12798_v43 }
 0xa5f   :  { %v2333_v46 = vadd.f32 1.0, %v12800_v44 }
 0xa60   :  { %12801 = vrcp.f32 %v2332_v45 }
 0xa61   :  { %12803 = vrcp.f32 %v2333_v46 }
 0xa6a   :  { %v12802_v47 = vpop.eup %12801 }
 0xa6b   :  { %v12804_v49 = vpop.eup %12803  ;;  %v2346_v58 = vmul.f32 %v12802_v47, %v2342_v55 }
 0xa6c   :  { %v2347_v59 = vmul.f32 %v12804_v49, %v2343_v56 }
 0xace   :  { %v2351_v48 = vpop.permute.xlu1 %2350 }
 0xacf   :  { %v2353_v50 = vpop.permute.xlu0 %2352  ;;  %v2356_v52 = vmul.f32 %v12802_v47, %v2351_v48 }
 0xad0   :  { %v2357_v53 = vmul.f32 %v12804_v49, %v2353_v50 }
 0xad1   :  { %2360 = vrot.lane.b32.xlu1 %v2356_v52, %s13174_s3 }
 0xad2   :  { %2362 = vrot.lane.b32.xlu0 %v2357_v53, %s13174_s3 }
 0xb43   :  { %v2361_v61 = vpop.permute.xlu1 %2360 }
 0xb44   :  { %v2363_v62 = vpop.permute.xlu0 %2362  ;;  %v13600_v63 = vadd.f32 %v2361_v61, %v2346_v58 }
 0xb45   :  { %v13602_v0 = vadd.f32 %v2363_v62, %v2347_v59 }
 0xb46   :  { %12805 = vtanh.f32 %v13600_v63  ;;  %v2906_v52 = vrot.slane %v13600_v63, 7 }
 0xb47   :  { %12807 = vtanh.f32 %v13602_v0  ;;  %v2907_v53 = vrot.slane %v13602_v0, 7 }
 0xb50   :  { %v12806_v1 = vpop.eup %12805 }
 0xb51   :  { %v12808_v2 = vpop.eup %12807  ;;  %2372 = vrot.lane.b32.xlu1 %v12806_v1, %s13173_s15 }
 0xb52   :  { %2374 = vrot.lane.b32.xlu0 %v12808_v2, %s13173_s15 }
 0xbc3   :  { %v2373_v3 = vpop.permute.xlu1 %2372 }
 0xbc4   :  { %v2375_v4 = vpop.permute.xlu0 %2374  ;;  %v13608_v5 = vmul.f32 %v12802_v47, %v2373_v3 }
 0xbc5   :  { %v13610_v6 = vmul.f32 %v12804_v49, %v2375_v4 }
 0xbc6   :  { %v2391_v8 = vrot.slane %v13608_v5, 3 }
 0xbc7   :  { %v2392_v9 = vrot.slane %v13610_v6, 2 }
 0xbc9   :  { %v2393_v12 = vsel %vm701_vm2, %v2392_v9, %v2391_v8 }
 0xbca   :  { %2394 = vrot.lane.b32.xlu1 %v2393_v12, %s13174_s3 }
 0xc3c   :  { %v2395_v13 = vpop.permute.xlu1 %2394 }
 0xc3d   :  { %v2396_v14 = vsel %vm705_vm3, %v2395_v13, 0 }
 0xc3e   :  { %v2467_v51 = vand.u32 4294901760, %v2396_v14 }
 0xc40   :  { %v2468_v15 = vsub.f32 %v2396_v14, %v2467_v51 }
 0xc42   :  { %v2469_v17 = vand.u32 4294901760, %v2468_v15 }
 0xc44   :  { %v2470_v18 = vsub.f32 %v2468_v15, %v2469_v17 }
 0xc46   :  { %v2471_v19 = vand.u32 4294901760, %v2470_v18 }
 0xc48   :  { %10983 = vmatmul.mubr.f32.vlgmr.msra.gmra.mrb[6].mxu0 %v2471_v19 }
 0xc49   :  { %12038 = vmatpush3.bf16.msra.mxu0 %v13388_v7  ;;  %10993 = vmatprep.mubr.msk.f32.mxu0 %vm13176_vm1, %v13177_v21 }
 0xc4a   :  { %12039 = vmatprep.subr.bf16.mxu0 %v13175_v57 }
 0xc4d   :  { %12041 = vmatpush3.bf16.msra.mxu0 %v13398_v20 }
 0xc4e   :  { %12042 = vmatprep.subr.bf16.mxu0 %v13175_v57 }
 0xc50   :  { %10994 = vmatmul.mubr.f32.vlgmr.msra.gmra.mrb[6].mxu0 %v2467_v51 }
 0xc51   :  { %12044 = vmatpush3.bf16.msra.mxu0 %v13426_v35  ;;  %11004 = vmatprep.mubr.msk.f32.mxu0 %vm13176_vm1, %v13177_v21 }
 0xc52   :  { %12045 = vmatprep.subr.bf16.mxu0 %v13175_v57 }
 0xc55   :  { %12047 = vmatpush3.bf16.msra.mxu0 %v13410_v25 }
 0xc56   :  { %12048 = vmatprep.subr.bf16.mxu0 %v13175_v57 }
 0xc58   :  { %11005 = vmatmul.mubr.f32.vlgmr.msra.gmra.mrb[6].mxu0 %v2468_v15 }
 0xc59   :  { %12050 = vmatpush3.bf16.msra.mxu0 %v13370_v60  ;;  %11015 = vmatprep.mubr.msk.f32.mxu0 %vm13176_vm1, %v13177_v21 }
 0xc5a   :  { %12051 = vmatprep.subr.bf16.mxu0 %v13175_v57 }
 0xc5d   :  { %12053 = vmatpush3.bf16.msra.mxu0 %v13408_v24 }
 0xc5e   :  { %12054 = vmatprep.subr.bf16.mxu0 %v13175_v57 }
 0xc60   :  { %11016 = vmatmul.mubr.f32.vlgmr.msra.gmra.mrb[6].mxu0 %v2469_v17 }
 0xc61   :  { %12056 = vmatpush3.bf16.msra.mxu0 %v13447_v41  ;;  %11026 = vmatprep.mubr.msk.f32.mxu0 %vm13176_vm1, %v13177_v21 }
 0xc62   :  { %12057 = vmatprep.subr.bf16.mxu0 %v13175_v57 }
 0xc65   :  { %12059 = vmatpush3.bf16.msra.mxu0 %v13421_v30 }
 0xc66   :  { %12060 = vmatprep.subr.bf16.mxu0 %v13175_v57 }
 0xc68   :  { %11027 = vmatmul.mubr.f32.vlgmr.msra.gmra.mrb[6].mxu0 %v2467_v51 }
 0xc69   :  { %12062 = vmatpush3.bf16.msra.mxu0 %v13370_v60  ;;  %11037 = vmatprep.mubr.msk.f32.mxu0 %vm13176_vm1, %v13177_v21 }
 0xc6a   :  { %12063 = vmatprep.subr.bf16.mxu0 %v13175_v57 }
 0xc6d   :  { %12065 = vmatpush3.bf16.msra.mxu0 %v13408_v24 }
 0xc6e   :  { %12102 = vmatprep.subr.bf16.mxu0 %v13175_v57 }
 0xc70   :  { %11038 = vmatmul.mubr.f32.vlgmr.msra.gmra.mrb[6].mxu0 %v2467_v51 }
 0xc71   :  { %12104 = vmatpush3.bf16.msra.mxu0 %v13370_v60  ;;  %11114 = vmatprep.mubr.msk.f32.mxu0 %vm13176_vm1, %v13177_v21 }
 0xc72   :  { %12105 = vmatprep.subr.bf16.mxu0 %v13175_v57 }
 0xc75   :  { %12107 = vmatpush3.bf16.msra.mxu0 %v13408_v24 }
 0xc76   :  { %12108 = vmatprep.subr.bf16.mxu0 %v13175_v57 }
 0xd43   :  { %v2879_v22 = vpop.f32.mrb[6].mxu0 }
 0xd44   :  { %v2884_v26 = vrot.slane %v2879_v22, 4  ;;  %v2885_v27 = vrot.slane %v2879_v22, 5  ;;  %v11039_v29 = vpop.f32.mrb[7].mxu0 }
 0xd46   :  { %v2888_v31 = vadd.f32 %v13342_v34, %v2884_v26  ;;  %v2889_v33 = vadd.f32 %v13340_v32, %v2885_v27 }
 0xd48   :  { %12809 = vtanh.f32 %v2888_v31  ;;  %v10167_v38 = vmul.f32 -1.442695, %v2888_v31  ;;  %v10168_v39 = vmul.f32 -1.442695, %v2889_v33 }
 0xd49   :  { %12811 = vtanh.f32 %v2889_v33 }
 0xd4a   :  { %12813 = vpow2.f32 %v10167_v38 }
 0xd4b   :  { %12815 = vpow2.f32 %v10168_v39 }
 0xd52   :  { %v12810_v36 = vpop.eup %12809 }
 0xd53   :  { %v12812_v37 = vpop.eup %12811  ;;  %2914 = vrot.lane.b32.xlu0 %v12810_v36, %s13173_s15 }
 0xd54   :  { %2916 = vrot.lane.b32.xlu1 %v12812_v37, %s13173_s15  ;;  %v12814_v40 = vpop.eup %12813 }
 0xd55   :  { %v12816_v42 = vpop.eup %12815  ;;  %v2896_v43 = vadd.f32 1.0, %v12814_v40 }
 0xd56   :  { %v2897_v44 = vadd.f32 1.0, %v12816_v42 }
 0xd57   :  { %12817 = vrcp.f32 %v2896_v43 }
 0xd58   :  { %12819 = vrcp.f32 %v2897_v44 }
 0xd61   :  { %v12818_v45 = vpop.eup %12817 }
 0xd62   :  { %v12820_v47 = vpop.eup %12819  ;;  %v2910_v55 = vmul.f32 %v12818_v45, %v2906_v52 }
 0xd63   :  { %v2911_v56 = vmul.f32 %v12820_v47, %v2907_v53 }
 0xdc5   :  { %v2915_v46 = vpop.permute.xlu0 %2914 }
 0xdc6   :  { %v2917_v48 = vpop.permute.xlu1 %2916  ;;  %v2920_v49 = vmul.f32 %v12818_v45, %v2915_v46 }
 0xdc7   :  { %v2921_v50 = vmul.f32 %v12820_v47, %v2917_v48 }
 0xdc8   :  { %2924 = vrot.lane.b32.xlu0 %v2920_v49, %s13174_s3 }
 0xdc9   :  { %2926 = vrot.lane.b32.xlu1 %v2921_v50, %s13174_s3 }
 0xe3a   :  { %v2925_v58 = vpop.permute.xlu0 %2924 }
 0xe3b   :  { %v2927_v59 = vpop.permute.xlu1 %2926  ;;  %v13661_v61 = vadd.f32 %v2925_v58, %v2910_v55 }
 0xe3c   :  { %v13663_v62 = vadd.f32 %v2927_v59, %v2911_v56 }
 0xe3d   :  { %12821 = vtanh.f32 %v13661_v61  ;;  %v3470_v52 = vrot.slane %v13661_v61, 7 }
 0xe3e   :  { %12823 = vtanh.f32 %v13663_v62  ;;  %v3471_v53 = vrot.slane %v13663_v62, 7 }
 0xe47   :  { %v12822_v1 = vpop.eup %12821 }
 0xe48   :  { %v12824_v2 = vpop.eup %12823  ;;  %2936 = vrot.lane.b32.xlu0 %v12822_v1, %s13173_s15 }
 0xe49   :  { %2938 = vrot.lane.b32.xlu1 %v12824_v2, %s13173_s15 }
 0xeba   :  { %v2937_v63 = vpop.permute.xlu0 %2936 }
 0xebb   :  { %v2939_v0 = vpop.permute.xlu1 %2938  ;;  %v13669_v3 = vmul.f32 %v12818_v45, %v2937_v63 }
 0xebc   :  { %v13671_v4 = vmul.f32 %v12820_v47, %v2939_v0 }
 0xebd   :  { %v2955_v8 = vrot.slane %v13669_v3, 4 }
 0xebe   :  { %v2956_v9 = vrot.slane %v13671_v4, 3 }
 0xec0   :  { %v2957_v12 = vsel %vm701_vm2, %v2956_v9, %v2955_v8 }
 0xec1   :  { %2958 = vrot.lane.b32.xlu0 %v2957_v12, %s13174_s3 }
 0xf33   :  { %v2959_v13 = vpop.permute.xlu0 %2958 }
 0xf34   :  { %v2960_v14 = vsel %vm705_vm3, %v2959_v13, 0 }
 0xf35   :  { %v3031_v51 = vand.u32 4294901760, %v2960_v14 }
 0xf37   :  { %v3032_v15 = vsub.f32 %v2960_v14, %v3031_v51 }
 0xf39   :  { %v3033_v17 = vand.u32 4294901760, %v3032_v15 }
 0xf3b   :  { %v3034_v18 = vsub.f32 %v3032_v15, %v3033_v17 }
 0xf3d   :  { %v3035_v19 = vand.u32 4294901760, %v3034_v18 }
 0xf3f   :  { %11049 = vmatmul.mubr.f32.vlgmr.msra.gmra.mrb[4].mxu1 %v3035_v19 }
 0xf40   :  { %12074 = vmatpush3.bf16.msra.mxu1 %v13388_v7  ;;  %11059 = vmatprep.mubr.msk.f32.mxu1 %vm13176_vm1, %v13177_v21 }
 0xf41   :  { %12075 = vmatprep.subr.bf16.mxu1 %v13175_v57 }
 0xf44   :  { %12077 = vmatpush3.bf16.msra.mxu1 %v13398_v20 }
 0xf45   :  { %12078 = vmatprep.subr.bf16.mxu1 %v13175_v57 }
 0xf47   :  { %11060 = vmatmul.mubr.f32.vlgmr.msra.gmra.mrb[4].mxu1 %v3031_v51 }
 0xf48   :  { %12080 = vmatpush3.bf16.msra.mxu1 %v13426_v35  ;;  %11070 = vmatprep.mubr.msk.f32.mxu1 %vm13176_vm1, %v13177_v21 }
 0xf49   :  { %12081 = vmatprep.subr.bf16.mxu1 %v13175_v57 }
 0xf4c   :  { %12083 = vmatpush3.bf16.msra.mxu1 %v13410_v25 }
 0xf4d   :  { %12084 = vmatprep.subr.bf16.mxu1 %v13175_v57 }
 0xf4f   :  { %11071 = vmatmul.mubr.f32.vlgmr.msra.gmra.mrb[4].mxu1 %v3032_v15 }
 0xf50   :  { %12086 = vmatpush3.bf16.msra.mxu1 %v13370_v60  ;;  %11081 = vmatprep.mubr.msk.f32.mxu1 %vm13176_vm1, %v13177_v21 }
 0xf51   :  { %12087 = vmatprep.subr.bf16.mxu1 %v13175_v57 }
 0xf54   :  { %12089 = vmatpush3.bf16.msra.mxu1 %v13408_v24 }
 0xf55   :  { %12090 = vmatprep.subr.bf16.mxu1 %v13175_v57 }
 0xf57   :  { %11082 = vmatmul.mubr.f32.vlgmr.msra.gmra.mrb[4].mxu1 %v3033_v17 }
 0xf58   :  { %12092 = vmatpush3.bf16.msra.mxu1 %v13447_v41  ;;  %11092 = vmatprep.mubr.msk.f32.mxu1 %vm13176_vm1, %v13177_v21 }
 0xf59   :  { %12093 = vmatprep.subr.bf16.mxu1 %v13175_v57 }
 0xf5c   :  { %12095 = vmatpush3.bf16.msra.mxu1 %v13421_v30 }
 0xf5d   :  { %12096 = vmatprep.subr.bf16.mxu1 %v13175_v57 }
 0xf5f   :  { %11093 = vmatmul.mubr.f32.vlgmr.msra.gmra.mrb[4].mxu1 %v3031_v51 }
 0xf60   :  { %12098 = vmatpush3.bf16.msra.mxu1 %v13370_v60  ;;  %11103 = vmatprep.mubr.msk.f32.mxu1 %vm13176_vm1, %v13177_v21 }
 0xf61   :  { %12099 = vmatprep.subr.bf16.mxu1 %v13175_v57 }
 0xf64   :  { %12101 = vmatpush3.bf16.msra.mxu1 %v13408_v24 }
 0xf65   :  { %12138 = vmatprep.subr.bf16.mxu1 %v13175_v57 }
 0xf67   :  { %11104 = vmatmul.mubr.f32.vlgmr.msra.gmra.mrb[4].mxu1 %v3031_v51 }
 0xf68   :  { %12140 = vmatpush3.bf16.msra.mxu1 %v13370_v60  ;;  %11180 = vmatprep.mubr.msk.f32.mxu1 %vm13176_vm1, %v13177_v21 }
 0xf69   :  { %12141 = vmatprep.subr.bf16.mxu1 %v13175_v57 }
 0xf6c   :  { %12143 = vmatpush3.bf16.msra.mxu1 %v13408_v24 }
 0xf6d   :  { %12144 = vmatprep.subr.bf16.mxu1 %v13175_v57 }
0x103a   :  { %v3443_v22 = vpop.f32.mrb[4].mxu1 }
0x103b   :  { %v3448_v26 = vrot.slane %v3443_v22, 3  ;;  %v3449_v27 = vrot.slane %v3443_v22, 4  ;;  %v11105_v29 = vpop.f32.mrb[5].mxu1 }
0x103d   :  { %v3452_v31 = vadd.f32 %v13342_v34, %v3448_v26  ;;  %v3453_v33 = vadd.f32 %v13340_v32, %v3449_v27 }
0x103f   :  { %12825 = vtanh.f32 %v3452_v31  ;;  %v10169_v38 = vmul.f32 -1.442695, %v3452_v31  ;;  %v10170_v39 = vmul.f32 -1.442695, %v3453_v33 }
0x1040   :  { %12827 = vtanh.f32 %v3453_v33 }
0x1041   :  { %12829 = vpow2.f32 %v10169_v38 }
0x1042   :  { %12831 = vpow2.f32 %v10170_v39 }
0x1049   :  { %v12826_v36 = vpop.eup %12825 }
0x104a   :  { %v12828_v37 = vpop.eup %12827  ;;  %3478 = vrot.lane.b32.xlu1 %v12826_v36, %s13173_s15 }
0x104b   :  { %3480 = vrot.lane.b32.xlu0 %v12828_v37, %s13173_s15  ;;  %v12830_v40 = vpop.eup %12829 }
0x104c   :  { %v12832_v42 = vpop.eup %12831  ;;  %v3460_v43 = vadd.f32 1.0, %v12830_v40 }
0x104d   :  { %v3461_v44 = vadd.f32 1.0, %v12832_v42 }
0x104e   :  { %12833 = vrcp.f32 %v3460_v43 }
0x104f   :  { %12835 = vrcp.f32 %v3461_v44 }
0x1058   :  { %v12834_v45 = vpop.eup %12833 }
0x1059   :  { %v12836_v47 = vpop.eup %12835  ;;  %v3474_v55 = vmul.f32 %v12834_v45, %v3470_v52 }
0x105a   :  { %v3475_v56 = vmul.f32 %v12836_v47, %v3471_v53 }
0x10bc   :  { %v3479_v46 = vpop.permute.xlu1 %3478 }
0x10bd   :  { %v3481_v48 = vpop.permute.xlu0 %3480  ;;  %v3484_v49 = vmul.f32 %v12834_v45, %v3479_v46 }
0x10be   :  { %v3485_v50 = vmul.f32 %v12836_v47, %v3481_v48 }
0x10bf   :  { %3488 = vrot.lane.b32.xlu1 %v3484_v49, %s13174_s3 }
0x10c0   :  { %3490 = vrot.lane.b32.xlu0 %v3485_v50, %s13174_s3 }
0x1131   :  { %v3489_v58 = vpop.permute.xlu1 %3488 }
0x1132   :  { %v3491_v59 = vpop.permute.xlu0 %3490  ;;  %v13722_v1 = vadd.f32 %v3489_v58, %v3474_v55 }
0x1133   :  { %v13724_v2 = vadd.f32 %v3491_v59, %v3475_v56 }
0x1134   :  { %12837 = vtanh.f32 %v13722_v1  ;;  %v4034_v55 = vrot.slane %v13722_v1, 7 }
0x1135   :  { %12839 = vtanh.f32 %v13724_v2  ;;  %v4035_v56 = vrot.slane %v13724_v2, 7 }
0x113e   :  { %v12838_v63 = vpop.eup %12837 }
0x113f   :  { %v12840_v0 = vpop.eup %12839  ;;  %3500 = vrot.lane.b32.xlu1 %v12838_v63, %s13173_s15 }
0x1140   :  { %3502 = vrot.lane.b32.xlu0 %v12840_v0, %s13173_s15 }
0x11b1   :  { %v3501_v61 = vpop.permute.xlu1 %3500 }
0x11b2   :  { %v3503_v62 = vpop.permute.xlu0 %3502  ;;  %v13730_v8 = vmul.f32 %v12834_v45, %v3501_v61 }
0x11b3   :  { %v13732_v9 = vmul.f32 %v12836_v47, %v3503_v62 }
0x11b4   :  { %v3519_v12 = vrot.slane %v13730_v8, 5 }
0x11b5   :  { %v3520_v13 = vrot.slane %v13732_v9, 4 }
0x11b7   :  { %v3521_v14 = vsel %vm701_vm2, %v3520_v13, %v3519_v12 }
0x11b8   :  { %3522 = vrot.lane.b32.xlu1 %v3521_v14, %s13174_s3 }
0x122a   :  { %v3523_v51 = vpop.permute.xlu1 %3522 }
0x122b   :  { %v3524_v15 = vsel %vm705_vm3, %v3523_v51, 0 }
0x122c   :  { %v3595_v17 = vand.u32 4294901760, %v3524_v15 }
0x122e   :  { %v3596_v18 = vsub.f32 %v3524_v15, %v3595_v17 }
0x1230   :  { %v3597_v19 = vand.u32 4294901760, %v3596_v18 }
0x1232   :  { %v3598_v22 = vsub.f32 %v3596_v18, %v3597_v19 }
0x1234   :  { %v3599_v26 = vand.u32 4294901760, %v3598_v22 }
0x1236   :  { %11115 = vmatmul.mubr.f32.vlgmr.msra.gmra.mrb[8].mxu0 %v3599_v26 }
0x1237   :  { %12110 = vmatpush3.bf16.msra.mxu0 %v13388_v7  ;;  %11125 = vmatprep.mubr.msk.f32.mxu0 %vm13176_vm1, %v13177_v21 }
0x1238   :  { %12111 = vmatprep.subr.bf16.mxu0 %v13175_v57 }
0x123b   :  { %12113 = vmatpush3.bf16.msra.mxu0 %v13398_v20 }
0x123c   :  { %12114 = vmatprep.subr.bf16.mxu0 %v13175_v57 }
0x123e   :  { %11126 = vmatmul.mubr.f32.vlgmr.msra.gmra.mrb[8].mxu0 %v3595_v17 }
0x123f   :  { %12116 = vmatpush3.bf16.msra.mxu0 %v13426_v35  ;;  %11136 = vmatprep.mubr.msk.f32.mxu0 %vm13176_vm1, %v13177_v21 }
0x1240   :  { %12117 = vmatprep.subr.bf16.mxu0 %v13175_v57 }
0x1243   :  { %12119 = vmatpush3.bf16.msra.mxu0 %v13410_v25 }
0x1244   :  { %12120 = vmatprep.subr.bf16.mxu0 %v13175_v57 }
0x1246   :  { %11137 = vmatmul.mubr.f32.vlgmr.msra.gmra.mrb[8].mxu0 %v3596_v18 }
0x1247   :  { %12122 = vmatpush3.bf16.msra.mxu0 %v13370_v60  ;;  %11147 = vmatprep.mubr.msk.f32.mxu0 %vm13176_vm1, %v13177_v21 }
0x1248   :  { %12123 = vmatprep.subr.bf16.mxu0 %v13175_v57 }
0x124b   :  { %12125 = vmatpush3.bf16.msra.mxu0 %v13408_v24 }
0x124c   :  { %12126 = vmatprep.subr.bf16.mxu0 %v13175_v57 }
0x124e   :  { %11148 = vmatmul.mubr.f32.vlgmr.msra.gmra.mrb[8].mxu0 %v3597_v19 }
0x124f   :  { %12128 = vmatpush3.bf16.msra.mxu0 %v13447_v41  ;;  %11158 = vmatprep.mubr.msk.f32.mxu0 %vm13176_vm1, %v13177_v21 }
0x1250   :  { %12129 = vmatprep.subr.bf16.mxu0 %v13175_v57 }
0x1253   :  { %12131 = vmatpush3.bf16.msra.mxu0 %v13421_v30 }
0x1254   :  { %12132 = vmatprep.subr.bf16.mxu0 %v13175_v57 }
0x1256   :  { %11159 = vmatmul.mubr.f32.vlgmr.msra.gmra.mrb[8].mxu0 %v3595_v17 }
0x1257   :  { %12134 = vmatpush3.bf16.msra.mxu0 %v13370_v60  ;;  %11169 = vmatprep.mubr.msk.f32.mxu0 %vm13176_vm1, %v13177_v21 }
0x1258   :  { %12135 = vmatprep.subr.bf16.mxu0 %v13175_v57 }
0x125b   :  { %12137 = vmatpush3.bf16.msra.mxu0 %v13408_v24 }
0x125e   :  { %11170 = vmatmul.mubr.f32.vlgmr.msra.gmra.mrb[8].mxu0 %v3595_v17 }
0x1331   :  { %v4007_v27 = vpop.f32.mrb[8].mxu0 }
0x1332   :  { %v4012_v29 = vrot.slane %v4007_v27, 2  ;;  %v4013_v31 = vrot.slane %v4007_v27, 3  ;;  %v11171_v33 = vpop.f32.mrb[9].mxu0 }
0x1334   :  { %v4016_v36 = vadd.f32 %v13342_v34, %v4012_v29  ;;  %v4017_v37 = vadd.f32 %v13340_v32, %v4013_v31 }
0x1336   :  { %12841 = vtanh.f32 %v4016_v36  ;;  %v10171_v40 = vmul.f32 -1.442695, %v4016_v36  ;;  %v10172_v42 = vmul.f32 -1.442695, %v4017_v37 }
0x1337   :  { %12843 = vtanh.f32 %v4017_v37 }
0x1338   :  { %12845 = vpow2.f32 %v10171_v40 }
0x1339   :  { %12847 = vpow2.f32 %v10172_v42 }
0x1340   :  { %v12842_v38 = vpop.eup %12841 }
0x1341   :  { %v12844_v39 = vpop.eup %12843  ;;  %4042 = vrot.lane.b32.xlu0 %v12842_v38, %s13173_s15 }
0x1342   :  { %4044 = vrot.lane.b32.xlu1 %v12844_v39, %s13173_s15  ;;  %v12846_v43 = vpop.eup %12845 }
0x1343   :  { %v12848_v44 = vpop.eup %12847  ;;  %v4024_v45 = vadd.f32 1.0, %v12846_v43 }
0x1344   :  { %v4025_v46 = vadd.f32 1.0, %v12848_v44 }
0x1345   :  { %12849 = vrcp.f32 %v4024_v45 }
0x1346   :  { %12851 = vrcp.f32 %v4025_v46 }
0x134f   :  { %v12850_v47 = vpop.eup %12849 }
0x1350   :  { %v12852_v49 = vpop.eup %12851  ;;  %v4038_v58 = vmul.f32 %v12850_v47, %v4034_v55 }
0x1351   :  { %v4039_v59 = vmul.f32 %v12852_v49, %v4035_v56 }
0x13b3   :  { %v4043_v48 = vpop.permute.xlu0 %4042 }
0x13b4   :  { %v4045_v50 = vpop.permute.xlu1 %4044  ;;  %v4048_v52 = vmul.f32 %v12850_v47, %v4043_v48 }
0x13b5   :  { %v4049_v53 = vmul.f32 %v12852_v49, %v4045_v50 }
0x13b6   :  { %4052 = vrot.lane.b32.xlu0 %v4048_v52, %s13174_s3 }
0x13b7   :  { %4054 = vrot.lane.b32.xlu1 %v4049_v53, %s13174_s3 }
0x1428   :  { %v4053_v63 = vpop.permute.xlu0 %4052 }
0x1429   :  { %v4055_v0 = vpop.permute.xlu1 %4054  ;;  %v13776_v61 = vadd.f32 %v4053_v63, %v4038_v58 }
0x142a   :  { %v13778_v62 = vadd.f32 %v4055_v0, %v4039_v59 }
0x142b   :  { %12853 = vtanh.f32 %v13776_v61 }
0x142c   :  { %12855 = vtanh.f32 %v13778_v62  ;;  %v4599_v48 = vrot.slane %v13778_v62, 7 }
0x1435   :  { %v12854_v12 = vpop.eup %12853 }
0x1436   :  { %v12856_v13 = vpop.eup %12855  ;;  %4064 = vrot.lane.b32.xlu0 %v12854_v12, %s13173_s15 }
0x1437   :  { %4066 = vrot.lane.b32.xlu1 %v12856_v13, %s13173_s15 }
0x14a8   :  { %v4065_v1 = vpop.permute.xlu0 %4064 }
0x14a9   :  { %v4067_v2 = vpop.permute.xlu1 %4066  ;;  %v13784_v14 = vmul.f32 %v12850_v47, %v4065_v1  ;;  %v4598_v47 = vrot.slane %v13776_v61, 7 }
0x14aa   :  { %v13786_v51 = vmul.f32 %v12852_v49, %v4067_v2 }
0x14ab   :  { %v4083_v15 = vrot.slane %v13784_v14, 6 }
0x14ac   :  { %v4084_v17 = vrot.slane %v13786_v51, 5 }
0x14ae   :  { %v4085_v18 = vsel %vm701_vm2, %v4084_v17, %v4083_v15 }
0x14af   :  { %4086 = vrot.lane.b32.xlu0 %v4085_v18, %s13174_s3 }
0x1521   :  { %v4087_v19 = vpop.permute.xlu0 %4086 }
0x1522   :  { %v4088_v22 = vsel %vm705_vm3, %v4087_v19, 0 }
0x1523   :  { %v4159_v26 = vand.u32 4294901760, %v4088_v22 }
0x1525   :  { %v4160_v27 = vsub.f32 %v4088_v22, %v4159_v26 }
0x1527   :  { %v4161_v29 = vand.u32 4294901760, %v4160_v27 }
0x1529   :  { %v4162_v31 = vsub.f32 %v4160_v27, %v4161_v29 }
0x152b   :  { %v4163_v33 = vand.u32 4294901760, %v4162_v31 }
0x152d   :  { %11181 = vmatmul.mubr.f32.vlgmr.msra.gmra.mrb[6].mxu1 %v4163_v33 }
0x152e   :  { %12146 = vmatpush3.bf16.msra.mxu1 %v13388_v7  ;;  %11191 = vmatprep.mubr.msk.f32.mxu1 %vm13176_vm1, %v13177_v21 }
0x152f   :  { %12147 = vmatprep.subr.bf16.mxu1 %v13175_v57 }
0x1532   :  { %12149 = vmatpush3.bf16.msra.mxu1 %v13398_v20 }
0x1533   :  { %12150 = vmatprep.subr.bf16.mxu1 %v13175_v57 }
0x1535   :  { %11192 = vmatmul.mubr.f32.vlgmr.msra.gmra.mrb[6].mxu1 %v4159_v26 }
0x1536   :  { %12152 = vmatpush3.bf16.msra.mxu1 %v13426_v35  ;;  %11202 = vmatprep.mubr.msk.f32.mxu1 %vm13176_vm1, %v13177_v21 }
0x1537   :  { %12153 = vmatprep.subr.bf16.mxu1 %v13175_v57 }
0x153a   :  { %12155 = vmatpush3.bf16.msra.mxu1 %v13410_v25 }
0x153b   :  { %12156 = vmatprep.subr.bf16.mxu1 %v13175_v57 }
0x153d   :  { %11203 = vmatmul.mubr.f32.vlgmr.msra.gmra.mrb[6].mxu1 %v4160_v27 }
0x153e   :  { %12158 = vmatpush3.bf16.msra.mxu1 %v13370_v60  ;;  %11213 = vmatprep.mubr.msk.f32.mxu1 %vm13176_vm1, %v13177_v21 }
0x153f   :  { %12159 = vmatprep.subr.bf16.mxu1 %v13175_v57 }
0x1542   :  { %12161 = vmatpush3.bf16.msra.mxu1 %v13408_v24 }
0x1543   :  { %12162 = vmatprep.subr.bf16.mxu1 %v13175_v57 }
0x1545   :  { %11214 = vmatmul.mubr.f32.vlgmr.msra.gmra.mrb[6].mxu1 %v4161_v29 }
0x1546   :  { %12164 = vmatpush3.bf16.msra.mxu1 %v13447_v41  ;;  %11224 = vmatprep.mubr.msk.f32.mxu1 %vm13176_vm1, %v13177_v21 }
0x1547   :  { %12165 = vmatprep.subr.bf16.mxu1 %v13175_v57 }
0x154a   :  { %12167 = vmatpush3.bf16.msra.mxu1 %v13421_v30 }
0x154b   :  { %12168 = vmatprep.subr.bf16.mxu1 %v13175_v57 }
0x154d   :  { %11225 = vmatmul.mubr.f32.vlgmr.msra.gmra.mrb[6].mxu1 %v4159_v26 }
0x154e   :  { %12170 = vmatpush3.bf16.msra.mxu1 %v13370_v60  ;;  %11235 = vmatprep.mubr.msk.f32.mxu1 %vm13176_vm1, %v13177_v21 }
0x154f   :  { %12171 = vmatprep.subr.bf16.mxu1 %v13175_v57 }
0x1552   :  { %12173 = vmatpush3.bf16.msra.mxu1 %v13408_v24 }
0x1553   :  { %12222 = vmatprep.subr.bf16.mxu1 %v13175_v57 }
0x1555   :  { %11236 = vmatmul.mubr.f32.vlgmr.msra.gmra.mrb[6].mxu1 %v4159_v26 }
0x1556   :  { %11312 = vmatprep.mubr.msk.f32.mxu1 %vm13176_vm1, %v13177_v21 }
0x1628   :  { %v4571_v7 = vpop.f32.mrb[6].mxu1 }
0x1629   :  { %v4576_v20 = vrot.slane %v4571_v7, 1  ;;  %v4577_v25 = vrot.slane %v4571_v7, 2  ;;  %v11237_v30 = vpop.f32.mrb[7].mxu1 }
0x162b   :  { %v4580_v35 = vadd.f32 %v13342_v34, %v4576_v20  ;;  %v4581_v60 = vadd.f32 %v13340_v32, %v4577_v25 }
0x162d   :  { %12857 = vtanh.f32 %v4580_v35  ;;  %v10173_v24 = vmul.f32 -1.442695, %v4580_v35  ;;  %v10174_v37 = vmul.f32 -1.442695, %v4581_v60 }
0x162e   :  { %12859 = vtanh.f32 %v4581_v60 }
0x162f   :  { %12861 = vpow2.f32 %v10173_v24 }
0x1630   :  { %12863 = vpow2.f32 %v10174_v37 }
0x1637   :  { %v12858_v41 = vpop.eup %12857 }
0x1638   :  { %v12860_v36 = vpop.eup %12859  ;;  %4606 = vrot.lane.b32.xlu1 %v12858_v41, %s13173_s15 }
0x1639   :  { %4608 = vrot.lane.b32.xlu0 %v12860_v36, %s13173_s15  ;;  %v12862_v38 = vpop.eup %12861 }
0x163a   :  { %v12864_v39 = vpop.eup %12863  ;;  %v4588_v40 = vadd.f32 1.0, %v12862_v38 }
0x163b   :  { %v4589_v42 = vadd.f32 1.0, %v12864_v39 }
0x163c   :  { %12865 = vrcp.f32 %v4588_v40 }
0x163d   :  { %12867 = vrcp.f32 %v4589_v42 }
0x1646   :  { %v12866_v34 = vpop.eup %12865 }
0x1647   :  { %v12868_v43 = vpop.eup %12867  ;;  %v4602_v49 = vmul.f32 %v12866_v34, %v4598_v47 }
0x1648   :  { %v4603_v50 = vmul.f32 %v12868_v43, %v4599_v48 }
0x16aa   :  { %v4607_v32 = vpop.permute.xlu1 %4606 }
0x16ab   :  { %v4609_v44 = vpop.permute.xlu0 %4608  ;;  %v4612_v45 = vmul.f32 %v12866_v34, %v4607_v32 }
0x16ac   :  { %v4613_v46 = vmul.f32 %v12868_v43, %v4609_v44 }
0x16ad   :  { %4616 = vrot.lane.b32.xlu1 %v4612_v45, %s13174_s3 }
0x16ae   :  { %4618 = vrot.lane.b32.xlu0 %v4613_v46, %s13174_s3 }
0x171f   :  { %v4617_v52 = vpop.permute.xlu1 %4616 }
0x1720   :  { %v4619_v53 = vpop.permute.xlu0 %4618  ;;  %v4622_v55 = vadd.f32 %v4617_v52, %v4602_v49 }
0x1721   :  { %v4623_v56 = vadd.f32 %v4619_v53, %v4603_v50 }
0x1722   :  { %12869 = vtanh.f32 %v4622_v55 }
0x1723   :  { %12871 = vtanh.f32 %v4623_v56 }
0x172c   :  { %v12870_v58 = vpop.eup %12869 }
0x172d   :  { %v12872_v59 = vpop.eup %12871  ;;  %4628 = vrot.lane.b32.xlu1 %v12870_v58, %s13173_s15 }
0x172e   :  { %4630 = vrot.lane.b32.xlu0 %v12872_v59, %s13173_s15 }
0x1731   :  { %690 = vrot.lane.b32.xlu1 %v13416_v28, %s13174_s3  ;;  %v4649_v28 = vld [vmem:[%s14414_s4] sm:$0xff] }
0x1732   :  { %1254 = vrot.lane.b32.xlu0 %v13486_v54, %s13174_s3  ;;  %v4651_v54 = vld [vmem:[%s14414_s4 + $0x10] sm:$0xff] }
0x1735   :  { %1817 = vrot.lane.b32.xlu1 %v13547_v10, %s13174_s3 }
0x1736   :  { %2381 = vrot.lane.b32.xlu0 %v13608_v5, %s13174_s3  ;;  %v4677_v5 = vand.u32 4294901760, %v4651_v54 }
0x1738   :  { %v4775_v17 = vsub.f32 %v4651_v54, %v4677_v5 }
0x1739   :  { %2945 = vrot.lane.b32.xlu1 %v13669_v3, %s13174_s3 }
0x173a   :  { %3509 = vrot.lane.b32.xlu0 %v13730_v8, %s13174_s3  ;;  %v4776_v27 = vand.u32 4294901760, %v4775_v17 }
0x173c   :  { %v4777_v7 = vsub.f32 %v4775_v17, %v4776_v27 }
0x173d   :  { %4073 = vrot.lane.b32.xlu1 %v13784_v14, %s13174_s3 }
0x173e   :  { %1260 = vrot.lane.b32.xlu0 %v13488_v16, %s13174_s3  ;;  %v4671_v16 = vand.u32 4294901760, %v4649_v28  ;;  %v4778_v30 = vand.u32 4294901760, %v4777_v7  ;;  %v4654_v7 = vld [vmem:[#allocation8 + $0x8] sm:$0xff] }
0x1740   :  { %v4761_v61 = vsub.f32 %v4649_v28, %v4671_v16 }
0x1741   :  { %696 = vrot.lane.b32.xlu1 %v13406_v23, %s13174_s3  ;;  %v4650_v23 = vld [vmem:[%s14414_s4 + $0x8] sm:$0xff] }
0x1742   :  { %2387 = vrot.lane.b32.xlu0 %v13610_v6, %s13174_s3  ;;  %v4674_v10 = vand.u32 4294901760, %v4650_v23  ;;  %v4762_v1 = vand.u32 4294901760, %v4761_v61 }
0x1744   :  { %v13875_v3 = vpack.c.bf16 %v4674_v10, %v4671_v16  ;;  %v4768_v62 = vsub.f32 %v4650_v23, %v4674_v10  ;;  %v10175_v10 = vld [vmem:[%s14416_s6] ss:$0 sm:$0xff] }
0x1745   :  { %1823 = vrot.lane.b32.xlu1 %v13549_v11, %s13174_s3  ;;  %v4652_v11 = vld [vmem:[%s14414_s4 + $0x18] sm:$0xff] }
0x1746   :  { %3515 = vrot.lane.b32.xlu0 %v13732_v9, %s13174_s3  ;;  %v4680_v6 = vand.u32 4294901760, %v4652_v11  ;;  %12175 = vmatprep.subr.bf16.mxu0 %v13875_v3  ;;  %v4769_v2 = vand.u32 4294901760, %v4768_v62  ;;  %v12190_v37 = vpack.c.bf16 %v4768_v62, %v4761_v61 }
0x1747   :  { %12177 = vmatpush3.bf16.msra.mxu0 %v13875_v3 }
0x1748   :  { %v4770_v15 = vsub.f32 %v4768_v62, %v4769_v2  ;;  %v4782_v18 = vsub.f32 %v4652_v11, %v4680_v6 }
0x1749   :  { %2951 = vrot.lane.b32.xlu1 %v13671_v4, %s13174_s3  ;;  %v13877_v4 = vpack.c.bf16 %v4680_v6, %v4677_v5 }
0x174a   :  { %v4771_v26 = vand.u32 4294901760, %v4770_v15  ;;  %v4783_v29 = vand.u32 4294901760, %v4782_v18  ;;  %v12194_v39 = vpack.c.bf16 %v4782_v18, %v4775_v17 }
0x174b   :  { %12179 = vmatprep.subr.bf16.mxu0 %v13877_v4 }
0x174c   :  { %12181 = vmatpush3.bf16.msra.mxu0 %v13877_v4  ;;  %v4784_v20 = vsub.f32 %v4782_v18, %v4783_v29  ;;  %v12210_v44 = vpack.c.bf16 %v4783_v29, %v4776_v27 }
0x174d   :  { %4079 = vrot.lane.b32.xlu1 %v13786_v51, %s13174_s3  ;;  %v4763_v51 = vsub.f32 %v4761_v61, %v4762_v1 }
0x174e   :  { %v4785_v35 = vand.u32 4294901760, %v4784_v20 }
0x174f   :  { %v4764_v22 = vand.u32 4294901760, %v4763_v51 }
0x1750   :  { %v12186_v41 = vpack.c.bf16 %v4785_v35, %v4778_v30 }
0x1751   :  { %v12182_v33 = vpack.c.bf16 %v4771_v26, %v4764_v22 }
0x1753   :  { %12183 = vmatprep.subr.bf16.mxu0 %v12182_v33 }
0x179f   :  { %v4629_v8 = vpop.permute.xlu1 %4628 }
0x17a0   :  { %v4631_v9 = vpop.permute.xlu0 %4630  ;;  %v4634_v63 = vmul.f32 %v12866_v34, %v4629_v8 }
0x17a1   :  { %v4635_v12 = vmul.f32 %v12868_v43, %v4631_v9  ;;  %v12206_v43 = vpack.c.bf16 %v4769_v2, %v4762_v1 }
0x17a2   :  { %4637 = vrot.lane.b32.xlu0 %v4634_v63, %s13174_s3 }
0x17a3   :  { %v691_v0 = vpop.permute.xlu1 %690 }
0x17a4   :  { %v1255_v13 = vpop.permute.xlu0 %1254  ;;  %694 = vst.msk [vmem:[#allocation2] sm:$0x1] %vm693_vm4, %v691_v0 }
0x17a5   :  { %1258 = vst.msk [vmem:[#allocation2] sm:$0x2] %vm1257_vm5, %v1255_v13 }
0x17a6   :  { %4643 = vrot.lane.b32.xlu0 %v4635_v12, %s13174_s3 }
0x17a7   :  { %v1818_v14 = vpop.permute.xlu1 %1817 }
0x17a8   :  { %v2382_v19 = vpop.permute.xlu0 %2381  ;;  %1821 = vst.msk [vmem:[#allocation2] sm:$0x4] %vm1820_vm6, %v1818_v14 }
0x17a9   :  { %2385 = vst.msk [vmem:[#allocation2] sm:$0x8] %vm2384_vm7, %v2382_v19 }
0x17ab   :  { %v2946_v31 = vpop.permute.xlu1 %2945 }
0x17ac   :  { %v3510_v25 = vpop.permute.xlu0 %3509  ;;  %2949 = vst.msk [vmem:[#allocation2] sm:$0x10] %vm2948_vm8, %v2946_v31 }
0x17ad   :  { %3513 = vst.msk [vmem:[#allocation2] sm:$0x20] %vm3512_vm9, %v3510_v25  ;;  %v5258_v25 = vand.u32 4294901760, %v4654_v7 }
0x17af   :  { %v4074_v60 = vpop.permute.xlu1 %4073 }
0x17b0   :  { %v1261_v36 = vpop.permute.xlu0 %1260  ;;  %4077 = vst.msk [vmem:[#allocation2] sm:$0x40] %vm4076_vm10, %v4074_v60  ;;  %v5342_v60 = vsub.f32 %v4654_v7, %v5258_v25 }
0x17b1   :  { %1263 = vst.msk [vmem:[#allocation2 + $0x8] sm:$0x2] %vm1257_vm5, %v1261_v36  ;;  %v4656_v36 = vld [vmem:[#allocation8 + $0x18] sm:$0xff] }
0x17b3   :  { %v697_v24 = vpop.permute.xlu1 %696 }
0x17b4   :  { %v2388_v38 = vpop.permute.xlu0 %2387  ;;  %699 = vst.msk [vmem:[#allocation2 + $0x8] sm:$0x1] %vm693_vm4, %v697_v24 }
0x17b5   :  { %2390 = vst.msk [vmem:[#allocation2 + $0x8] sm:$0x8] %vm2384_vm7, %v2388_v38 }
0x17b7   :  { %v1824_v40 = vpop.permute.xlu1 %1823 }
0x17b8   :  { %v3516_v42 = vpop.permute.xlu0 %3515  ;;  %1826 = vst.msk [vmem:[#allocation2 + $0x8] sm:$0x4] %vm1820_vm6, %v1824_v40 }
0x17b9   :  { %3518 = vst.msk [vmem:[#allocation2 + $0x8] sm:$0x20] %vm3512_vm9, %v3516_v42 }
0x17bb   :  { %v2952_v34 = vpop.permute.xlu1 %2951 }
0x17bc   :  { %2954 = vst.msk [vmem:[#allocation2 + $0x8] sm:$0x10] %vm2948_vm8, %v2952_v34 }
0x17bf   :  { %v4080_v32 = vpop.permute.xlu1 %4079 }
0x17c0   :  { %4082 = vst.msk [vmem:[#allocation2 + $0x8] sm:$0x40] %vm4076_vm10, %v4080_v32 }
0x1814   :  { %v4638_v45 = vpop.permute.xlu0 %4637 }
0x1815   :  { %4641 = vst.msk [vmem:[#allocation2] sm:$0x80] %vm4640_vm11, %v4638_v45 }
0x1818   :  { %v4644_v46 = vpop.permute.xlu0 %4643 }
0x1819   :  { %4646 = vst.msk [vmem:[#allocation2 + $0x8] sm:$0x80] %vm4640_vm11, %v4644_v46 }
0x181c   :  { %v4647_v47 = vld [vmem:[#allocation2] sm:$0xff] }
0x181d   :  { %v4665_v48 = vsel %vm705_vm3, %v4647_v47, 0 }
0x181e   :  { %v4739_v49 = vand.u32 4294901760, %v4665_v48 }
0x1820   :  { %v4740_v50 = vsub.f32 %v4665_v48, %v4739_v49  ;;  %v4648_v52 = vld [vmem:[#allocation2 + $0x8] sm:$0xff] }
0x1821   :  { %v4668_v53 = vsel %vm705_vm3, %v4648_v52, 0 }
0x1822   :  { %v4741_v55 = vand.u32 4294901760, %v4740_v50  ;;  %v4749_v56 = vand.u32 4294901760, %v4668_v53 }
0x1824   :  { %v4742_v58 = vsub.f32 %v4740_v50, %v4741_v55  ;;  %v4750_v59 = vsub.f32 %v4668_v53, %v4749_v56 }
0x1826   :  { %v4743_v28 = vand.u32 4294901760, %v4742_v58  ;;  %v4751_v23 = vand.u32 4294901760, %v4750_v59 }
0x1828   :  { %11246 = vmatprep.mubr.f32.mxu0 %v4743_v28  ;;  %v4752_v54 = vsub.f32 %v4750_v59, %v4751_v23 }
0x182a   :  { %v4753_v16 = vand.u32 4294901760, %v4752_v54 }
0x182c   :  { %11247 = vmatmul.mubr.f32.vlgmr.msra.gmra.mrb[10].mxu0 %v4753_v16 }
0x182d   :  { %12185 = vmatpush3.bf16.msra.mxu0 %v12182_v33  ;;  %11257 = vmatprep.mubr.f32.mxu0 %v4739_v49  ;;  %v4653_v33 = vld [vmem:[#allocation8] sm:$0xff] }
0x182e   :  { %12187 = vmatprep.subr.bf16.mxu0 %v12186_v41  ;;  %v5255_v20 = vand.u32 4294901760, %v4653_v33 }
0x1830   :  { %v13935_v30 = vpack.c.bf16 %v5258_v25, %v5255_v20  ;;  %v5335_v35 = vsub.f32 %v4653_v33, %v5255_v20 }
0x1831   :  { %12189 = vmatpush3.bf16.msra.mxu0 %v12186_v41  ;;  %v4655_v41 = vld [vmem:[#allocation8 + $0x10] sm:$0xff] }
0x1832   :  { %12191 = vmatprep.subr.bf16.mxu0 %v12190_v37  ;;  %12224 = vmatpush3.bf16.msra.mxu1 %v13935_v30  ;;  %v5261_v24 = vand.u32 4294901760, %v4655_v41  ;;  %v5336_v38 = vand.u32 4294901760, %v5335_v35  ;;  %v13953_v16 = vpack.c.bf16 %v5342_v60, %v5335_v35 }
0x1833   :  { %12225 = vmatprep.subr.bf16.mxu1 %v13175_v57 }
0x1834   :  { %11258 = vmatmul.mubr.f32.vlgmr.msra.gmra.mrb[10].mxu0 %v4749_v56  ;;  %v5337_v34 = vsub.f32 %v5335_v35, %v5336_v38 }
0x1835   :  { %12193 = vmatpush3.bf16.msra.mxu0 %v12190_v37  ;;  %11268 = vmatprep.mubr.f32.mxu0 %v4740_v50  ;;  %v5264_v37 = vand.u32 4294901760, %v4656_v36 }
0x1836   :  { %12195 = vmatprep.subr.bf16.mxu0 %v12194_v39  ;;  %v5338_v48 = vand.u32 4294901760, %v5337_v34 }
0x1837   :  { %v13941_v42 = vpack.c.bf16 %v5264_v37, %v5261_v24  ;;  %v5356_v46 = vsub.f32 %v4656_v36, %v5264_v37 }
0x1839   :  { %12197 = vmatpush3.bf16.msra.mxu0 %v12194_v39  ;;  %v5343_v39 = vand.u32 4294901760, %v5342_v60  ;;  %12227 = vmatpush3.bf16.msra.mxu1 %v13941_v42  ;;  %v5357_v53 = vand.u32 4294901760, %v5356_v46 }
0x183a   :  { %12199 = vmatprep.subr.bf16.mxu0 %v13875_v3  ;;  %12228 = vmatprep.subr.bf16.mxu1 %v13175_v57 }
0x183b   :  { %v5344_v32 = vsub.f32 %v5342_v60, %v5343_v39 }
0x183c   :  { %11269 = vmatmul.mubr.f32.vlgmr.msra.gmra.mrb[10].mxu0 %v4750_v59  ;;  %v5358_v59 = vsub.f32 %v5356_v46, %v5357_v53 }
0x183d   :  { %12201 = vmatpush3.bf16.msra.mxu0 %v13875_v3  ;;  %11279 = vmatprep.mubr.f32.mxu0 %v4741_v55 }
0x183e   :  { %12203 = vmatprep.subr.bf16.mxu0 %v13877_v4 }
0x1841   :  { %12205 = vmatpush3.bf16.msra.mxu0 %v13877_v4 }
0x1842   :  { %12207 = vmatprep.subr.bf16.mxu0 %v12206_v43 }
0x1844   :  { %11280 = vmatmul.mubr.f32.vlgmr.msra.gmra.mrb[10].mxu0 %v4751_v23  ;;  %v5359_v23 = vand.u32 4294901760, %v5358_v59 }
0x1845   :  { %12209 = vmatpush3.bf16.msra.mxu0 %v12206_v43  ;;  %11290 = vmatprep.mubr.f32.mxu0 %v4739_v49  ;;  %v5349_v43 = vsub.f32 %v4655_v41, %v5261_v24 }
0x1846   :  { %12211 = vmatprep.subr.bf16.mxu0 %v12210_v44 }
0x1847   :  { %v5350_v50 = vand.u32 4294901760, %v5349_v43 }
0x1849   :  { %12213 = vmatpush3.bf16.msra.mxu0 %v12210_v44 }
0x184a   :  { %12215 = vmatprep.subr.bf16.mxu0 %v13875_v3 }
0x184c   :  { %11291 = vmatmul.mubr.f32.vlgmr.msra.gmra.mrb[10].mxu0 %v4749_v56 }
0x184d   :  { %12217 = vmatpush3.bf16.msra.mxu0 %v13875_v3  ;;  %11301 = vmatprep.mubr.f32.mxu0 %v4739_v49  ;;  %v5345_v49 = vand.u32 4294901760, %v5344_v32 }
0x184e   :  { %12219 = vmatprep.subr.bf16.mxu0 %v13877_v4 }
0x184f   :  { %v13947_v55 = vpack.c.bf16 %v5345_v49, %v5338_v48 }
0x1851   :  { %12221 = vmatpush3.bf16.msra.mxu0 %v13877_v4 }
0x1852   :  { %12258 = vmatprep.subr.bf16.mxu0 %v13175_v57 }
0x1854   :  { %11302 = vmatmul.mubr.f32.vlgmr.msra.gmra.mrb[10].mxu0 %v4749_v56  ;;  %v5351_v56 = vsub.f32 %v5349_v43, %v5350_v50 }
0x1855   :  { %11378 = vmatprep.mubr.msk.f32.mxu0 %vm13176_vm1, %v13177_v21  ;;  %12260 = vmatpush3.bf16.msra.mxu0 %v13935_v30 }
0x1856   :  { %12261 = vmatprep.subr.bf16.mxu0 %v13175_v57  ;;  %v5352_v28 = vand.u32 4294901760, %v5351_v56 }
0x1858   :  { %v13951_v54 = vpack.c.bf16 %v5359_v23, %v5352_v28 }
0x1859   :  { %12263 = vmatpush3.bf16.msra.mxu0 %v13941_v42 }
0x185a   :  { %12264 = vmatprep.subr.bf16.mxu0 %v13175_v57 }
0x1927   :  { %v11303_v11 = vpop.f32.mrb[10].mxu0 }
0x1928   :  { %v13915_v5 = vadd.f32 %v11303_v11, %v10175_v10  ;;  %v5188_v6 = vpop.f32.mrb[11].mxu0  ;;  %v13957_v11 = vpack.c.bf16 %v5343_v39, %v5336_v38 }
0x1929   :  { %v13917_v3 = vadd.f32 %v10175_v10, %v5188_v6  ;;  %v13955_v10 = vpack.c.bf16 %v5356_v46, %v5349_v43  ;;  %v13959_v6 = vpack.c.bf16 %v5357_v53, %v5350_v50 }
0x192a   :  { %12873 = vtanh.f32 %v13915_v5  ;;  %v10177_v9 = vmul.f32 -1.442695, %v13915_v5 }
0x192b   :  { %12875 = vtanh.f32 %v13917_v3  ;;  %v10176_v63 = vmul.f32 -1.442695, %v13917_v3 }
0x192c   :  { %12877 = vpow2.f32 %v10177_v9 }
0x192d   :  { %12879 = vpow2.f32 %v10176_v63 }
0x1934   :  { %v12874_v4 = vpop.eup %12873 }
0x1935   :  { %v12876_v8 = vpop.eup %12875  ;;  %5218 = vrot.lane.b32.xlu1 %v12874_v4, %s13173_s15 }
0x1936   :  { %5216 = vrot.lane.b32.xlu0 %v12876_v8, %s13173_s15  ;;  %v12878_v0 = vpop.eup %12877 }
0x1937   :  { %v12880_v61 = vpop.eup %12879  ;;  %v5205_v62 = vadd.f32 1.0, %v12878_v0 }
0x1938   :  { %v5204_v12 = vadd.f32 1.0, %v12880_v61 }
0x1939   :  { %12881 = vrcp.f32 %v5205_v62 }
0x193a   :  { %12883 = vrcp.f32 %v5204_v12 }
0x1943   :  { %v12882_v13 = vpop.eup %12881 }
0x1944   :  { %v12884_v2 = vpop.eup %12883  ;;  %v5213_v17 = vmul.f32 0.0, %v12882_v13 }
0x1945   :  { %v5212_v19 = vmul.f32 0.0, %v12884_v2 }
0x19a7   :  { %v5219_v1 = vpop.permute.xlu1 %5218 }
0x19a8   :  { %v5223_v14 = vmul.f32 %v12882_v13, %v5219_v1  ;;  %v5217_v51 = vpop.permute.xlu0 %5216 }
0x19a9   :  { %v5222_v15 = vmul.f32 %v12884_v2, %v5217_v51 }
0x19aa   :  { %5228 = vrot.lane.b32.xlu1 %v5223_v14, %s13174_s3 }
0x19ab   :  { %5226 = vrot.lane.b32.xlu0 %v5222_v15, %s13174_s3 }
0x1a1c   :  { %v5229_v18 = vpop.permute.xlu1 %5228 }
0x1a1d   :  { %v13927_v22 = vadd.f32 %v5229_v18, %v5213_v17  ;;  %v5227_v26 = vpop.permute.xlu0 %5226 }
0x1a1e   :  { %v13929_v27 = vadd.f32 %v5227_v26, %v5212_v19 }
0x1a1f   :  { %12885 = vtanh.f32 %v13927_v22  ;;  %v5762_v41 = vrot.slane %v13927_v22, 7 }
0x1a20   :  { %12887 = vtanh.f32 %v13929_v27  ;;  %v5761_v24 = vrot.slane %v13929_v27, 7 }
0x1a29   :  { %v12886_v29 = vpop.eup %12885 }
0x1a2a   :  { %v12888_v31 = vpop.eup %12887  ;;  %5240 = vrot.lane.b32.xlu1 %v12886_v29, %s13173_s15 }
0x1a2b   :  { %5238 = vrot.lane.b32.xlu0 %v12888_v31, %s13173_s15 }
0x1a9c   :  { %v5241_v40 = vpop.permute.xlu1 %5240 }
0x1a9d   :  { %v5245_v44 = vmul.f32 %v12882_v13, %v5241_v40  ;;  %v5239_v45 = vpop.permute.xlu0 %5238 }
0x1a9e   :  { %v5244_v47 = vmul.f32 %v12884_v2, %v5239_v45 }
0x1a9f   :  { %v5248_v52 = vrot.slane %v5245_v44, 7 }
0x1aa1   :  { %v5249_v58 = vsel %vm701_vm2, %v5248_v52, %v5244_v47 }
0x1aa2   :  { %5250 = vrot.lane.b32.xlu1 %v5249_v58, %s13174_s3 }
0x1b14   :  { %v5251_v4 = vpop.permute.xlu1 %5250 }
0x1b15   :  { %v5252_v8 = vsel %vm705_vm3, %v5251_v4, 0 }
0x1b16   :  { %v5323_v9 = vand.u32 4294901760, %v5252_v8 }
0x1b18   :  { %v5324_v63 = vsub.f32 %v5252_v8, %v5323_v9 }
0x1b1a   :  { %v5325_v0 = vand.u32 4294901760, %v5324_v63 }
0x1b1c   :  { %v5326_v61 = vsub.f32 %v5324_v63, %v5325_v0 }
0x1b1e   :  { %v5327_v62 = vand.u32 4294901760, %v5326_v61 }
0x1b20   :  { %11313 = vmatmul.mubr.f32.vlgmr.msra.gmra.mrb[8].mxu1 %v5327_v62 }
0x1b21   :  { %12230 = vmatpush3.bf16.msra.mxu1 %v13947_v55  ;;  %11323 = vmatprep.mubr.msk.f32.mxu1 %vm13176_vm1, %v13177_v21 }
0x1b22   :  { %12231 = vmatprep.subr.bf16.mxu1 %v13175_v57 }
0x1b25   :  { %12233 = vmatpush3.bf16.msra.mxu1 %v13951_v54 }
0x1b26   :  { %12234 = vmatprep.subr.bf16.mxu1 %v13175_v57 }
0x1b28   :  { %11324 = vmatmul.mubr.f32.vlgmr.msra.gmra.mrb[8].mxu1 %v5323_v9 }
0x1b29   :  { %12236 = vmatpush3.bf16.msra.mxu1 %v13953_v16  ;;  %11334 = vmatprep.mubr.msk.f32.mxu1 %vm13176_vm1, %v13177_v21 }
0x1b2a   :  { %12237 = vmatprep.subr.bf16.mxu1 %v13175_v57 }
0x1b2d   :  { %12239 = vmatpush3.bf16.msra.mxu1 %v13955_v10 }
0x1b2e   :  { %12240 = vmatprep.subr.bf16.mxu1 %v13175_v57 }
0x1b30   :  { %11335 = vmatmul.mubr.f32.vlgmr.msra.gmra.mrb[8].mxu1 %v5324_v63 }
0x1b31   :  { %12242 = vmatpush3.bf16.msra.mxu1 %v13935_v30  ;;  %11345 = vmatprep.mubr.msk.f32.mxu1 %vm13176_vm1, %v13177_v21 }
0x1b32   :  { %12243 = vmatprep.subr.bf16.mxu1 %v13175_v57 }
0x1b35   :  { %12245 = vmatpush3.bf16.msra.mxu1 %v13941_v42 }
0x1b36   :  { %12246 = vmatprep.subr.bf16.mxu1 %v13175_v57 }
0x1b38   :  { %11346 = vmatmul.mubr.f32.vlgmr.msra.gmra.mrb[8].mxu1 %v5325_v0 }
0x1b39   :  { %12248 = vmatpush3.bf16.msra.mxu1 %v13957_v11  ;;  %11356 = vmatprep.mubr.msk.f32.mxu1 %vm13176_vm1, %v13177_v21 }
0x1b3a   :  { %12249 = vmatprep.subr.bf16.mxu1 %v13175_v57 }
0x1b3d   :  { %12251 = vmatpush3.bf16.msra.mxu1 %v13959_v6 }
0x1b3e   :  { %12252 = vmatprep.subr.bf16.mxu1 %v13175_v57 }
0x1b40   :  { %11357 = vmatmul.mubr.f32.vlgmr.msra.gmra.mrb[8].mxu1 %v5323_v9 }
0x1b41   :  { %12254 = vmatpush3.bf16.msra.mxu1 %v13935_v30  ;;  %11367 = vmatprep.mubr.msk.f32.mxu1 %vm13176_vm1, %v13177_v21 }
0x1b42   :  { %12255 = vmatprep.subr.bf16.mxu1 %v13175_v57 }
0x1b45   :  { %12257 = vmatpush3.bf16.msra.mxu1 %v13941_v42 }
0x1b46   :  { %12294 = vmatprep.subr.bf16.mxu1 %v13175_v57 }
0x1b48   :  { %11368 = vmatmul.mubr.f32.vlgmr.msra.gmra.mrb[8].mxu1 %v5323_v9 }
0x1b49   :  { %12296 = vmatpush3.bf16.msra.mxu1 %v13935_v30  ;;  %11444 = vmatprep.mubr.msk.f32.mxu1 %vm13176_vm1, %v13177_v21 }
0x1b4a   :  { %12297 = vmatprep.subr.bf16.mxu1 %v13175_v57 }
0x1b4d   :  { %12299 = vmatpush3.bf16.msra.mxu1 %v13941_v42 }
0x1b4e   :  { %12300 = vmatprep.subr.bf16.mxu1 %v13175_v57 }
0x1c1b   :  { %v5735_v12 = vpop.f32.mrb[8].mxu1 }
0x1c1c   :  { %v5740_v13 = vrot.slane %v5735_v12, 7  ;;  %v5744_v1 = vadd.f32 %v13915_v5, %v5735_v12  ;;  %v11369_v2 = vpop.f32.mrb[9].mxu1 }
0x1c1e   :  { %v5743_v14 = vadd.f32 %v13917_v3, %v5740_v13  ;;  %12889 = vtanh.f32 %v5744_v1  ;;  %v10179_v17 = vmul.f32 -1.442695, %v5744_v1 }
0x1c20   :  { %12891 = vtanh.f32 %v5743_v14  ;;  %v10178_v18 = vmul.f32 -1.442695, %v5743_v14 }
0x1c21   :  { %12893 = vpow2.f32 %v10179_v17 }
0x1c22   :  { %12895 = vpow2.f32 %v10178_v18 }
0x1c28   :  { %v12890_v51 = vpop.eup %12889 }
0x1c29   :  { %5771 = vrot.lane.b32.xlu1 %v12890_v51, %s13173_s15 }
0x1c2a   :  { %v12892_v15 = vpop.eup %12891 }
0x1c2b   :  { %5769 = vrot.lane.b32.xlu0 %v12892_v15, %s13173_s15  ;;  %v12894_v19 = vpop.eup %12893 }
0x1c2c   :  { %v12896_v26 = vpop.eup %12895  ;;  %v5752_v29 = vadd.f32 1.0, %v12894_v19 }
0x1c2d   :  { %v5751_v31 = vadd.f32 1.0, %v12896_v26 }
0x1c2e   :  { %12897 = vrcp.f32 %v5752_v29 }
0x1c2f   :  { %12899 = vrcp.f32 %v5751_v31 }
0x1c38   :  { %v12898_v33 = vpop.eup %12897 }
0x1c39   :  { %v12900_v25 = vpop.eup %12899  ;;  %v5766_v36 = vmul.f32 %v12898_v33, %v5762_v41 }
0x1c3a   :  { %v5765_v39 = vmul.f32 %v12900_v25, %v5761_v24 }
0x1c9b   :  { %v5772_v7 = vpop.permute.xlu1 %5771 }
0x1c9c   :  { %v5776_v20 = vmul.f32 %v12898_v33, %v5772_v7 }
0x1c9d   :  { %v5770_v35 = vpop.permute.xlu0 %5769 }
0x1c9e   :  { %5781 = vrot.lane.b32.xlu1 %v5776_v20, %s13174_s3  ;;  %v5775_v60 = vmul.f32 %v12900_v25, %v5770_v35 }
0x1ca0   :  { %5779 = vrot.lane.b32.xlu0 %v5775_v60, %s13174_s3 }
0x1d10   :  { %v5782_v37 = vpop.permute.xlu1 %5781 }
0x1d11   :  { %v14006_v38 = vadd.f32 %v5782_v37, %v5766_v36 }
0x1d12   :  { %v5780_v40 = vpop.permute.xlu0 %5779 }
0x1d13   :  { %12901 = vtanh.f32 %v14006_v38  ;;  %v14009_v34 = vadd.f32 %v5780_v40, %v5765_v39  ;;  %v6316_v29 = vrot.slane %v14006_v38, 7 }
0x1d15   :  { %12903 = vtanh.f32 %v14009_v34  ;;  %v6315_v26 = vrot.slane %v14009_v34, 7 }
0x1d1d   :  { %v12902_v32 = vpop.eup %12901 }
0x1d1e   :  { %5793 = vrot.lane.b32.xlu1 %v12902_v32, %s13173_s15 }
0x1d1f   :  { %v12904_v43 = vpop.eup %12903 }
0x1d20   :  { %5791 = vrot.lane.b32.xlu0 %v12904_v43, %s13173_s15 }
0x1d90   :  { %v5794_v22 = vpop.permute.xlu1 %5793 }
0x1d91   :  { %v5798_v45 = vmul.f32 %v12898_v33, %v5794_v22 }
0x1d92   :  { %v5792_v44 = vpop.permute.xlu0 %5791 }
0x1d93   :  { %v5797_v27 = vmul.f32 %v12900_v25, %v5792_v44 }
0x1d95   :  { %v5801_v46 = vrot.slane %v5797_v27, 1 }
0x1d97   :  { %v5802_v47 = vsel %vm701_vm2, %v5798_v45, %v5801_v46 }
0x1d98   :  { %5803 = vrot.lane.b32.xlu0 %v5802_v47, %s13174_s3 }
0x1e0a   :  { %v5804_v48 = vpop.permute.xlu0 %5803 }
0x1e0b   :  { %v5805_v49 = vsel %vm705_vm3, %v5804_v48, 0 }
0x1e0c   :  { %v5876_v50 = vand.u32 4294901760, %v5805_v49 }
0x1e0e   :  { %v5877_v52 = vsub.f32 %v5805_v49, %v5876_v50 }
0x1e10   :  { %v5878_v53 = vand.u32 4294901760, %v5877_v52 }
0x1e12   :  { %v5879_v56 = vsub.f32 %v5877_v52, %v5878_v53 }
0x1e14   :  { %v5880_v58 = vand.u32 4294901760, %v5879_v56 }
0x1e16   :  { %11379 = vmatmul.mubr.f32.vlgmr.msra.gmra.mrb[12].mxu0 %v5880_v58 }
0x1e17   :  { %12266 = vmatpush3.bf16.msra.mxu0 %v13947_v55  ;;  %11389 = vmatprep.mubr.msk.f32.mxu0 %vm13176_vm1, %v13177_v21 }
0x1e18   :  { %12267 = vmatprep.subr.bf16.mxu0 %v13175_v57 }
0x1e1b   :  { %12269 = vmatpush3.bf16.msra.mxu0 %v13951_v54 }
0x1e1c   :  { %12270 = vmatprep.subr.bf16.mxu0 %v13175_v57 }
0x1e1e   :  { %11390 = vmatmul.mubr.f32.vlgmr.msra.gmra.mrb[12].mxu0 %v5876_v50 }
0x1e1f   :  { %12272 = vmatpush3.bf16.msra.mxu0 %v13953_v16  ;;  %11400 = vmatprep.mubr.msk.f32.mxu0 %vm13176_vm1, %v13177_v21 }
0x1e20   :  { %12273 = vmatprep.subr.bf16.mxu0 %v13175_v57 }
0x1e23   :  { %12275 = vmatpush3.bf16.msra.mxu0 %v13955_v10 }
0x1e24   :  { %12276 = vmatprep.subr.bf16.mxu0 %v13175_v57 }
0x1e26   :  { %11401 = vmatmul.mubr.f32.vlgmr.msra.gmra.mrb[12].mxu0 %v5877_v52 }
0x1e27   :  { %12278 = vmatpush3.bf16.msra.mxu0 %v13935_v30  ;;  %11411 = vmatprep.mubr.msk.f32.mxu0 %vm13176_vm1, %v13177_v21 }
0x1e28   :  { %12279 = vmatprep.subr.bf16.mxu0 %v13175_v57 }
0x1e2b   :  { %12281 = vmatpush3.bf16.msra.mxu0 %v13941_v42 }
0x1e2c   :  { %12282 = vmatprep.subr.bf16.mxu0 %v13175_v57 }
0x1e2e   :  { %11412 = vmatmul.mubr.f32.vlgmr.msra.gmra.mrb[12].mxu0 %v5878_v53 }
0x1e2f   :  { %12284 = vmatpush3.bf16.msra.mxu0 %v13957_v11  ;;  %11422 = vmatprep.mubr.msk.f32.mxu0 %vm13176_vm1, %v13177_v21 }
0x1e30   :  { %12285 = vmatprep.subr.bf16.mxu0 %v13175_v57 }
0x1e33   :  { %12287 = vmatpush3.bf16.msra.mxu0 %v13959_v6 }
0x1e34   :  { %12288 = vmatprep.subr.bf16.mxu0 %v13175_v57 }
0x1e36   :  { %11423 = vmatmul.mubr.f32.vlgmr.msra.gmra.mrb[12].mxu0 %v5876_v50 }
0x1e37   :  { %12290 = vmatpush3.bf16.msra.mxu0 %v13935_v30  ;;  %11433 = vmatprep.mubr.msk.f32.mxu0 %vm13176_vm1, %v13177_v21 }
0x1e38   :  { %12291 = vmatprep.subr.bf16.mxu0 %v13175_v57 }
0x1e3b   :  { %12293 = vmatpush3.bf16.msra.mxu0 %v13941_v42 }
0x1e3c   :  { %12330 = vmatprep.subr.bf16.mxu0 %v13175_v57 }
0x1e3e   :  { %11434 = vmatmul.mubr.f32.vlgmr.msra.gmra.mrb[12].mxu0 %v5876_v50 }
0x1e3f   :  { %12332 = vmatpush3.bf16.msra.mxu0 %v13935_v30  ;;  %11510 = vmatprep.mubr.msk.f32.mxu0 %vm13176_vm1, %v13177_v21 }
0x1e40   :  { %12333 = vmatprep.subr.bf16.mxu0 %v13175_v57 }
0x1e43   :  { %12335 = vmatpush3.bf16.msra.mxu0 %v13941_v42 }
0x1e44   :  { %12336 = vmatprep.subr.bf16.mxu0 %v13175_v57 }
0x1f11   :  { %v6288_v59 = vpop.f32.mrb[12].mxu0 }
0x1f12   :  { %v6293_v28 = vrot.slane %v6288_v59, 6  ;;  %v6294_v23 = vrot.slane %v6288_v59, 7  ;;  %v11435_v4 = vpop.f32.mrb[13].mxu0 }
0x1f14   :  { %v6297_v8 = vadd.f32 %v13917_v3, %v6293_v28  ;;  %v6298_v9 = vadd.f32 %v13915_v5, %v6294_v23 }
0x1f16   :  { %12905 = vtanh.f32 %v6297_v8  ;;  %v10180_v61 = vmul.f32 -1.442695, %v6297_v8  ;;  %v10181_v62 = vmul.f32 -1.442695, %v6298_v9 }
0x1f17   :  { %12907 = vtanh.f32 %v6298_v9 }
0x1f18   :  { %12909 = vpow2.f32 %v10180_v61 }
0x1f19   :  { %12911 = vpow2.f32 %v10181_v62 }
0x1f20   :  { %v12906_v63 = vpop.eup %12905 }
0x1f21   :  { %v12908_v0 = vpop.eup %12907  ;;  %6323 = vrot.lane.b32.xlu1 %v12906_v63, %s13173_s15 }
0x1f22   :  { %6325 = vrot.lane.b32.xlu0 %v12908_v0, %s13173_s15  ;;  %v12910_v12 = vpop.eup %12909 }
0x1f23   :  { %v12912_v13 = vpop.eup %12911  ;;  %v6305_v1 = vadd.f32 1.0, %v12910_v12 }
0x1f24   :  { %v6306_v2 = vadd.f32 1.0, %v12912_v13 }
0x1f25   :  { %12913 = vrcp.f32 %v6305_v1 }
0x1f26   :  { %12915 = vrcp.f32 %v6306_v2 }
0x1f2f   :  { %v12914_v14 = vpop.eup %12913 }
0x1f30   :  { %v12916_v15 = vpop.eup %12915  ;;  %v6319_v31 = vmul.f32 %v12914_v14, %v6315_v26 }
0x1f31   :  { %v6320_v33 = vmul.f32 %v12916_v15, %v6316_v29 }
0x1f93   :  { %v6324_v51 = vpop.permute.xlu1 %6323 }
0x1f94   :  { %v6326_v17 = vpop.permute.xlu0 %6325  ;;  %v6329_v18 = vmul.f32 %v12914_v14, %v6324_v51 }
0x1f95   :  { %v6330_v19 = vmul.f32 %v12916_v15, %v6326_v17 }
0x1f96   :  { %6333 = vrot.lane.b32.xlu1 %v6329_v18, %s13174_s3 }
0x1f97   :  { %6335 = vrot.lane.b32.xlu0 %v6330_v19, %s13174_s3 }
0x2008   :  { %v6334_v7 = vpop.permute.xlu1 %6333 }
0x2009   :  { %v6336_v20 = vpop.permute.xlu0 %6335  ;;  %v14061_v25 = vadd.f32 %v6334_v7, %v6319_v31 }
0x200a   :  { %v14063_v35 = vadd.f32 %v6336_v20, %v6320_v33 }
0x200b   :  { %12917 = vtanh.f32 %v14061_v25  ;;  %v6870_v1 = vrot.slane %v14061_v25, 7 }
0x200c   :  { %12919 = vtanh.f32 %v14063_v35  ;;  %v6871_v2 = vrot.slane %v14063_v35, 7 }
0x2015   :  { %v12918_v60 = vpop.eup %12917 }
0x2016   :  { %v12920_v41 = vpop.eup %12919  ;;  %6345 = vrot.lane.b32.xlu1 %v12918_v60, %s13173_s15 }
0x2017   :  { %6347 = vrot.lane.b32.xlu0 %v12920_v41, %s13173_s15 }
0x2088   :  { %v6346_v36 = vpop.permute.xlu1 %6345 }
0x2089   :  { %v6348_v24 = vpop.permute.xlu0 %6347  ;;  %v6351_v37 = vmul.f32 %v12914_v14, %v6346_v36 }
0x208a   :  { %v6352_v38 = vmul.f32 %v12916_v15, %v6348_v24 }
0x208b   :  { %v6355_v39 = vrot.slane %v6351_v37, 2 }
0x208c   :  { %v6356_v40 = vrot.slane %v6352_v38, 1 }
0x208e   :  { %v6357_v34 = vsel %vm701_vm2, %v6356_v40, %v6355_v39 }
0x208f   :  { %6358 = vrot.lane.b32.xlu1 %v6357_v34, %s13174_s3 }
0x2101   :  { %v6359_v32 = vpop.permute.xlu1 %6358 }
0x2102   :  { %v6360_v43 = vsel %vm705_vm3, %v6359_v32, 0 }
0x2103   :  { %v6431_v22 = vand.u32 4294901760, %v6360_v43 }
0x2105   :  { %v6432_v44 = vsub.f32 %v6360_v43, %v6431_v22 }
0x2107   :  { %v6433_v27 = vand.u32 4294901760, %v6432_v44 }
0x2109   :  { %v6434_v45 = vsub.f32 %v6432_v44, %v6433_v27 }
0x210b   :  { %v6435_v46 = vand.u32 4294901760, %v6434_v45 }
0x210d   :  { %11445 = vmatmul.mubr.f32.vlgmr.msra.gmra.mrb[10].mxu1 %v6435_v46 }
0x210e   :  { %12302 = vmatpush3.bf16.msra.mxu1 %v13947_v55  ;;  %11455 = vmatprep.mubr.msk.f32.mxu1 %vm13176_vm1, %v13177_v21 }
0x210f   :  { %12303 = vmatprep.subr.bf16.mxu1 %v13175_v57 }
0x2112   :  { %12305 = vmatpush3.bf16.msra.mxu1 %v13951_v54 }
0x2113   :  { %12306 = vmatprep.subr.bf16.mxu1 %v13175_v57 }
0x2115   :  { %11456 = vmatmul.mubr.f32.vlgmr.msra.gmra.mrb[10].mxu1 %v6431_v22 }
0x2116   :  { %12308 = vmatpush3.bf16.msra.mxu1 %v13953_v16  ;;  %11466 = vmatprep.mubr.msk.f32.mxu1 %vm13176_vm1, %v13177_v21 }
0x2117   :  { %12309 = vmatprep.subr.bf16.mxu1 %v13175_v57 }
0x211a   :  { %12311 = vmatpush3.bf16.msra.mxu1 %v13955_v10 }
0x211b   :  { %12312 = vmatprep.subr.bf16.mxu1 %v13175_v57 }
0x211d   :  { %11467 = vmatmul.mubr.f32.vlgmr.msra.gmra.mrb[10].mxu1 %v6432_v44 }
0x211e   :  { %12314 = vmatpush3.bf16.msra.mxu1 %v13935_v30  ;;  %11477 = vmatprep.mubr.msk.f32.mxu1 %vm13176_vm1, %v13177_v21 }
0x211f   :  { %12315 = vmatprep.subr.bf16.mxu1 %v13175_v57 }
0x2122   :  { %12317 = vmatpush3.bf16.msra.mxu1 %v13941_v42 }
0x2123   :  { %12318 = vmatprep.subr.bf16.mxu1 %v13175_v57 }
0x2125   :  { %11478 = vmatmul.mubr.f32.vlgmr.msra.gmra.mrb[10].mxu1 %v6433_v27 }
0x2126   :  { %12320 = vmatpush3.bf16.msra.mxu1 %v13957_v11  ;;  %11488 = vmatprep.mubr.msk.f32.mxu1 %vm13176_vm1, %v13177_v21 }
0x2127   :  { %12321 = vmatprep.subr.bf16.mxu1 %v13175_v57 }
0x212a   :  { %12323 = vmatpush3.bf16.msra.mxu1 %v13959_v6 }
0x212b   :  { %12324 = vmatprep.subr.bf16.mxu1 %v13175_v57 }
0x212d   :  { %11489 = vmatmul.mubr.f32.vlgmr.msra.gmra.mrb[10].mxu1 %v6431_v22 }
0x212e   :  { %12326 = vmatpush3.bf16.msra.mxu1 %v13935_v30  ;;  %11499 = vmatprep.mubr.msk.f32.mxu1 %vm13176_vm1, %v13177_v21 }
0x212f   :  { %12327 = vmatprep.subr.bf16.mxu1 %v13175_v57 }
0x2132   :  { %12329 = vmatpush3.bf16.msra.mxu1 %v13941_v42 }
0x2133   :  { %12366 = vmatprep.subr.bf16.mxu1 %v13175_v57 }
0x2135   :  { %11500 = vmatmul.mubr.f32.vlgmr.msra.gmra.mrb[10].mxu1 %v6431_v22 }
0x2136   :  { %12368 = vmatpush3.bf16.msra.mxu1 %v13935_v30  ;;  %11576 = vmatprep.mubr.msk.f32.mxu1 %vm13176_vm1, %v13177_v21 }
0x2137   :  { %12369 = vmatprep.subr.bf16.mxu1 %v13175_v57 }
0x213a   :  { %12371 = vmatpush3.bf16.msra.mxu1 %v13941_v42 }
0x213b   :  { %12372 = vmatprep.subr.bf16.mxu1 %v13175_v57 }
0x2208   :  { %v6843_v47 = vpop.f32.mrb[10].mxu1 }
0x2209   :  { %v6848_v48 = vrot.slane %v6843_v47, 5  ;;  %v6849_v49 = vrot.slane %v6843_v47, 6  ;;  %v11501_v50 = vpop.f32.mrb[11].mxu1 }
0x220b   :  { %v6852_v52 = vadd.f32 %v13917_v3, %v6848_v48  ;;  %v6853_v53 = vadd.f32 %v13915_v5, %v6849_v49 }
0x220d   :  { %12921 = vtanh.f32 %v6852_v52  ;;  %v10182_v59 = vmul.f32 -1.442695, %v6852_v52  ;;  %v10183_v28 = vmul.f32 -1.442695, %v6853_v53 }
0x220e   :  { %12923 = vtanh.f32 %v6853_v53 }
0x220f   :  { %12925 = vpow2.f32 %v10182_v59 }
0x2210   :  { %12927 = vpow2.f32 %v10183_v28 }
0x2217   :  { %v12922_v56 = vpop.eup %12921 }
0x2218   :  { %v12924_v58 = vpop.eup %12923  ;;  %6878 = vrot.lane.b32.xlu0 %v12922_v56, %s13173_s15 }
0x2219   :  { %6880 = vrot.lane.b32.xlu1 %v12924_v58, %s13173_s15  ;;  %v12926_v23 = vpop.eup %12925 }
0x221a   :  { %v12928_v4 = vpop.eup %12927  ;;  %v6860_v8 = vadd.f32 1.0, %v12926_v23 }
0x221b   :  { %v6861_v9 = vadd.f32 1.0, %v12928_v4 }
0x221c   :  { %12929 = vrcp.f32 %v6860_v8 }
0x221d   :  { %12931 = vrcp.f32 %v6861_v9 }
0x2226   :  { %v12930_v63 = vpop.eup %12929 }
0x2227   :  { %v12932_v61 = vpop.eup %12931  ;;  %v6874_v14 = vmul.f32 %v12930_v63, %v6870_v1 }
0x2228   :  { %v6875_v51 = vmul.f32 %v12932_v61, %v6871_v2 }
0x228a   :  { %v6879_v0 = vpop.permute.xlu0 %6878 }
0x228b   :  { %v6881_v62 = vpop.permute.xlu1 %6880  ;;  %v6884_v12 = vmul.f32 %v12930_v63, %v6879_v0 }
0x228c   :  { %v6885_v13 = vmul.f32 %v12932_v61, %v6881_v62 }
0x228d   :  { %6888 = vrot.lane.b32.xlu0 %v6884_v12, %s13174_s3 }
0x228e   :  { %6890 = vrot.lane.b32.xlu1 %v6885_v13, %s13174_s3 }
0x22ff   :  { %v6889_v15 = vpop.permute.xlu0 %6888 }
0x2300   :  { %v6891_v17 = vpop.permute.xlu1 %6890  ;;  %v14116_v18 = vadd.f32 %v6889_v15, %v6874_v14 }
0x2301   :  { %v14118_v19 = vadd.f32 %v6891_v17, %v6875_v51 }
0x2302   :  { %12933 = vtanh.f32 %v14116_v18  ;;  %v7425_v8 = vrot.slane %v14116_v18, 7 }
0x2303   :  { %12935 = vtanh.f32 %v14118_v19  ;;  %v7426_v9 = vrot.slane %v14118_v19, 7 }
0x230c   :  { %v12934_v26 = vpop.eup %12933 }
0x230d   :  { %v12936_v29 = vpop.eup %12935  ;;  %6900 = vrot.lane.b32.xlu0 %v12934_v26, %s13173_s15 }
0x230e   :  { %6902 = vrot.lane.b32.xlu1 %v12936_v29, %s13173_s15 }
0x237f   :  { %v6901_v31 = vpop.permute.xlu0 %6900 }
0x2380   :  { %v6903_v33 = vpop.permute.xlu1 %6902  ;;  %v6906_v7 = vmul.f32 %v12930_v63, %v6901_v31 }
0x2381   :  { %v6907_v20 = vmul.f32 %v12932_v61, %v6903_v33 }
0x2382   :  { %v6910_v25 = vrot.slane %v6906_v7, 3 }
0x2383   :  { %v6911_v35 = vrot.slane %v6907_v20, 2 }
0x2385   :  { %v6912_v60 = vsel %vm701_vm2, %v6911_v35, %v6910_v25 }
0x2386   :  { %6913 = vrot.lane.b32.xlu0 %v6912_v60, %s13174_s3 }
0x23f8   :  { %v6914_v41 = vpop.permute.xlu0 %6913 }
0x23f9   :  { %v6915_v36 = vsel %vm705_vm3, %v6914_v41, 0 }
0x23fa   :  { %v6986_v24 = vand.u32 4294901760, %v6915_v36 }
0x23fc   :  { %v6987_v37 = vsub.f32 %v6915_v36, %v6986_v24 }
0x23fe   :  { %v6988_v38 = vand.u32 4294901760, %v6987_v37 }
0x2400   :  { %v6989_v39 = vsub.f32 %v6987_v37, %v6988_v38 }
0x2402   :  { %v6990_v40 = vand.u32 4294901760, %v6989_v39 }
0x2404   :  { %11511 = vmatmul.mubr.f32.vlgmr.msra.gmra.mrb[14].mxu0 %v6990_v40 }
0x2405   :  { %12338 = vmatpush3.bf16.msra.mxu0 %v13947_v55  ;;  %11521 = vmatprep.mubr.msk.f32.mxu0 %vm13176_vm1, %v13177_v21 }
0x2406   :  { %12339 = vmatprep.subr.bf16.mxu0 %v13175_v57 }
0x2409   :  { %12341 = vmatpush3.bf16.msra.mxu0 %v13951_v54 }
0x240a   :  { %12342 = vmatprep.subr.bf16.mxu0 %v13175_v57 }
0x240c   :  { %11522 = vmatmul.mubr.f32.vlgmr.msra.gmra.mrb[14].mxu0 %v6986_v24 }
0x240d   :  { %12344 = vmatpush3.bf16.msra.mxu0 %v13953_v16  ;;  %11532 = vmatprep.mubr.msk.f32.mxu0 %vm13176_vm1, %v13177_v21 }
0x240e   :  { %12345 = vmatprep.subr.bf16.mxu0 %v13175_v57 }
0x2411   :  { %12347 = vmatpush3.bf16.msra.mxu0 %v13955_v10 }
0x2412   :  { %12348 = vmatprep.subr.bf16.mxu0 %v13175_v57 }
0x2414   :  { %11533 = vmatmul.mubr.f32.vlgmr.msra.gmra.mrb[14].mxu0 %v6987_v37 }
0x2415   :  { %12350 = vmatpush3.bf16.msra.mxu0 %v13935_v30  ;;  %11543 = vmatprep.mubr.msk.f32.mxu0 %vm13176_vm1, %v13177_v21 }
0x2416   :  { %12351 = vmatprep.subr.bf16.mxu0 %v13175_v57 }
0x2419   :  { %12353 = vmatpush3.bf16.msra.mxu0 %v13941_v42 }
0x241a   :  { %12354 = vmatprep.subr.bf16.mxu0 %v13175_v57 }
0x241c   :  { %11544 = vmatmul.mubr.f32.vlgmr.msra.gmra.mrb[14].mxu0 %v6988_v38 }
0x241d   :  { %12356 = vmatpush3.bf16.msra.mxu0 %v13957_v11  ;;  %11554 = vmatprep.mubr.msk.f32.mxu0 %vm13176_vm1, %v13177_v21 }
0x241e   :  { %12357 = vmatprep.subr.bf16.mxu0 %v13175_v57 }
0x2421   :  { %12359 = vmatpush3.bf16.msra.mxu0 %v13959_v6 }
0x2422   :  { %12360 = vmatprep.subr.bf16.mxu0 %v13175_v57 }
0x2424   :  { %11555 = vmatmul.mubr.f32.vlgmr.msra.gmra.mrb[14].mxu0 %v6986_v24 }
0x2425   :  { %12362 = vmatpush3.bf16.msra.mxu0 %v13935_v30  ;;  %11565 = vmatprep.mubr.msk.f32.mxu0 %vm13176_vm1, %v13177_v21 }
0x2426   :  { %12363 = vmatprep.subr.bf16.mxu0 %v13175_v57 }
0x2429   :  { %12365 = vmatpush3.bf16.msra.mxu0 %v13941_v42 }
0x242a   :  { %12402 = vmatprep.subr.bf16.mxu0 %v13175_v57 }
0x242c   :  { %11566 = vmatmul.mubr.f32.vlgmr.msra.gmra.mrb[14].mxu0 %v6986_v24 }
0x242d   :  { %12404 = vmatpush3.bf16.msra.mxu0 %v13935_v30  ;;  %11642 = vmatprep.mubr.msk.f32.mxu0 %vm13176_vm1, %v13177_v21 }
0x242e   :  { %12405 = vmatprep.subr.bf16.mxu0 %v13175_v57 }
0x2431   :  { %12407 = vmatpush3.bf16.msra.mxu0 %v13941_v42 }
0x2432   :  { %12408 = vmatprep.subr.bf16.mxu0 %v13175_v57 }
0x24ff   :  { %v7398_v34 = vpop.f32.mrb[14].mxu0 }
0x2500   :  { %v7403_v32 = vrot.slane %v7398_v34, 4  ;;  %v7404_v43 = vrot.slane %v7398_v34, 5  ;;  %v11567_v22 = vpop.f32.mrb[15].mxu0 }
0x2502   :  { %v7407_v44 = vadd.f32 %v13917_v3, %v7403_v32  ;;  %v7408_v27 = vadd.f32 %v13915_v5, %v7404_v43 }
0x2504   :  { %12937 = vtanh.f32 %v7407_v44  ;;  %v10184_v47 = vmul.f32 -1.442695, %v7407_v44  ;;  %v10185_v48 = vmul.f32 -1.442695, %v7408_v27 }
0x2505   :  { %12939 = vtanh.f32 %v7408_v27 }
0x2506   :  { %12941 = vpow2.f32 %v10184_v47 }
0x2507   :  { %12943 = vpow2.f32 %v10185_v48 }
0x250e   :  { %v12938_v45 = vpop.eup %12937 }
0x250f   :  { %v12940_v46 = vpop.eup %12939  ;;  %7433 = vrot.lane.b32.xlu1 %v12938_v45, %s13173_s15 }
0x2510   :  { %7435 = vrot.lane.b32.xlu0 %v12940_v46, %s13173_s15  ;;  %v12942_v49 = vpop.eup %12941 }
0x2511   :  { %v12944_v50 = vpop.eup %12943  ;;  %v7415_v52 = vadd.f32 1.0, %v12942_v49 }
0x2512   :  { %v7416_v53 = vadd.f32 1.0, %v12944_v50 }
0x2513   :  { %12945 = vrcp.f32 %v7415_v52 }
0x2514   :  { %12947 = vrcp.f32 %v7416_v53 }
0x251d   :  { %v12946_v56 = vpop.eup %12945 }
0x251e   :  { %v12948_v59 = vpop.eup %12947  ;;  %v7429_v63 = vmul.f32 %v12946_v56, %v7425_v8 }
0x251f   :  { %v7430_v0 = vmul.f32 %v12948_v59, %v7426_v9 }
0x2581   :  { %v7434_v58 = vpop.permute.xlu1 %7433 }
0x2582   :  { %v7436_v28 = vpop.permute.xlu0 %7435  ;;  %v7439_v23 = vmul.f32 %v12946_v56, %v7434_v58 }
0x2583   :  { %v7440_v4 = vmul.f32 %v12948_v59, %v7436_v28 }
0x2584   :  { %7443 = vrot.lane.b32.xlu1 %v7439_v23, %s13174_s3 }
0x2585   :  { %7445 = vrot.lane.b32.xlu0 %v7440_v4, %s13174_s3 }
0x25f6   :  { %v7444_v61 = vpop.permute.xlu1 %7443 }
0x25f7   :  { %v7446_v62 = vpop.permute.xlu0 %7445  ;;  %v14171_v12 = vadd.f32 %v7444_v61, %v7429_v63 }
0x25f8   :  { %v14173_v13 = vadd.f32 %v7446_v62, %v7430_v0 }
0x25f9   :  { %12949 = vtanh.f32 %v14171_v12  ;;  %v7980_v52 = vrot.slane %v14171_v12, 7 }
0x25fa   :  { %12951 = vtanh.f32 %v14173_v13  ;;  %v7981_v53 = vrot.slane %v14173_v13, 7 }
0x2603   :  { %v12950_v1 = vpop.eup %12949 }
0x2604   :  { %v12952_v2 = vpop.eup %12951  ;;  %7455 = vrot.lane.b32.xlu1 %v12950_v1, %s13173_s15 }
0x2605   :  { %7457 = vrot.lane.b32.xlu0 %v12952_v2, %s13173_s15 }
0x2676   :  { %v7456_v14 = vpop.permute.xlu1 %7455 }
0x2677   :  { %v7458_v51 = vpop.permute.xlu0 %7457  ;;  %v7461_v15 = vmul.f32 %v12946_v56, %v7456_v14 }
0x2678   :  { %v7462_v17 = vmul.f32 %v12948_v59, %v7458_v51 }
0x2679   :  { %v7465_v18 = vrot.slane %v7461_v15, 4 }
0x267a   :  { %v7466_v19 = vrot.slane %v7462_v17, 3 }
0x267c   :  { %v7467_v26 = vsel %vm701_vm2, %v7466_v19, %v7465_v18 }
0x267d   :  { %7468 = vrot.lane.b32.xlu1 %v7467_v26, %s13174_s3 }
0x26ef   :  { %v7469_v29 = vpop.permute.xlu1 %7468 }
0x26f0   :  { %v7470_v31 = vsel %vm705_vm3, %v7469_v29, 0 }
0x26f1   :  { %v7541_v33 = vand.u32 4294901760, %v7470_v31 }
0x26f3   :  { %v7542_v7 = vsub.f32 %v7470_v31, %v7541_v33 }
0x26f5   :  { %v7543_v20 = vand.u32 4294901760, %v7542_v7 }
0x26f7   :  { %v7544_v25 = vsub.f32 %v7542_v7, %v7543_v20 }
0x26f9   :  { %v7545_v35 = vand.u32 4294901760, %v7544_v25 }
0x26fb   :  { %11577 = vmatmul.mubr.f32.vlgmr.msra.gmra.mrb[12].mxu1 %v7545_v35 }
0x26fc   :  { %12374 = vmatpush3.bf16.msra.mxu1 %v13947_v55  ;;  %11587 = vmatprep.mubr.msk.f32.mxu1 %vm13176_vm1, %v13177_v21 }
0x26fd   :  { %12375 = vmatprep.subr.bf16.mxu1 %v13175_v57 }
0x2700   :  { %12377 = vmatpush3.bf16.msra.mxu1 %v13951_v54 }
0x2701   :  { %12378 = vmatprep.subr.bf16.mxu1 %v13175_v57 }
0x2703   :  { %11588 = vmatmul.mubr.f32.vlgmr.msra.gmra.mrb[12].mxu1 %v7541_v33 }
0x2704   :  { %12380 = vmatpush3.bf16.msra.mxu1 %v13953_v16  ;;  %11598 = vmatprep.mubr.msk.f32.mxu1 %vm13176_vm1, %v13177_v21 }
0x2705   :  { %12381 = vmatprep.subr.bf16.mxu1 %v13175_v57 }
0x2708   :  { %12383 = vmatpush3.bf16.msra.mxu1 %v13955_v10 }
0x2709   :  { %12384 = vmatprep.subr.bf16.mxu1 %v13175_v57 }
0x270b   :  { %11599 = vmatmul.mubr.f32.vlgmr.msra.gmra.mrb[12].mxu1 %v7542_v7 }
0x270c   :  { %12386 = vmatpush3.bf16.msra.mxu1 %v13935_v30  ;;  %11609 = vmatprep.mubr.msk.f32.mxu1 %vm13176_vm1, %v13177_v21 }
0x270d   :  { %12387 = vmatprep.subr.bf16.mxu1 %v13175_v57 }
0x2710   :  { %12389 = vmatpush3.bf16.msra.mxu1 %v13941_v42 }
0x2711   :  { %12390 = vmatprep.subr.bf16.mxu1 %v13175_v57 }
0x2713   :  { %11610 = vmatmul.mubr.f32.vlgmr.msra.gmra.mrb[12].mxu1 %v7543_v20 }
0x2714   :  { %12392 = vmatpush3.bf16.msra.mxu1 %v13957_v11  ;;  %11620 = vmatprep.mubr.msk.f32.mxu1 %vm13176_vm1, %v13177_v21 }
0x2715   :  { %12393 = vmatprep.subr.bf16.mxu1 %v13175_v57 }
0x2718   :  { %12395 = vmatpush3.bf16.msra.mxu1 %v13959_v6 }
0x2719   :  { %12396 = vmatprep.subr.bf16.mxu1 %v13175_v57 }
0x271b   :  { %11621 = vmatmul.mubr.f32.vlgmr.msra.gmra.mrb[12].mxu1 %v7541_v33 }
0x271c   :  { %12398 = vmatpush3.bf16.msra.mxu1 %v13935_v30  ;;  %11631 = vmatprep.mubr.msk.f32.mxu1 %vm13176_vm1, %v13177_v21 }
0x271d   :  { %12399 = vmatprep.subr.bf16.mxu1 %v13175_v57 }
0x2720   :  { %12401 = vmatpush3.bf16.msra.mxu1 %v13941_v42 }
0x2721   :  { %12438 = vmatprep.subr.bf16.mxu1 %v13175_v57 }
0x2723   :  { %11632 = vmatmul.mubr.f32.vlgmr.msra.gmra.mrb[12].mxu1 %v7541_v33 }
0x2724   :  { %12440 = vmatpush3.bf16.msra.mxu1 %v13935_v30  ;;  %11708 = vmatprep.mubr.msk.f32.mxu1 %vm13176_vm1, %v13177_v21 }
0x2725   :  { %12441 = vmatprep.subr.bf16.mxu1 %v13175_v57 }
0x2728   :  { %12443 = vmatpush3.bf16.msra.mxu1 %v13941_v42 }
0x2729   :  { %12444 = vmatprep.subr.bf16.mxu1 %v13175_v57 }
0x27f6   :  { %v7953_v60 = vpop.f32.mrb[12].mxu1 }
0x27f7   :  { %v7958_v41 = vrot.slane %v7953_v60, 3  ;;  %v7959_v36 = vrot.slane %v7953_v60, 4  ;;  %v11633_v24 = vpop.f32.mrb[13].mxu1 }
0x27f9   :  { %v7962_v37 = vadd.f32 %v13917_v3, %v7958_v41  ;;  %v7963_v38 = vadd.f32 %v13915_v5, %v7959_v36 }
0x27fb   :  { %12953 = vtanh.f32 %v7962_v37  ;;  %v10186_v34 = vmul.f32 -1.442695, %v7962_v37  ;;  %v10187_v32 = vmul.f32 -1.442695, %v7963_v38 }
0x27fc   :  { %12955 = vtanh.f32 %v7963_v38 }
0x27fd   :  { %12957 = vpow2.f32 %v10186_v34 }
0x27fe   :  { %12959 = vpow2.f32 %v10187_v32 }
0x2805   :  { %v12954_v39 = vpop.eup %12953 }
0x2806   :  { %v12956_v40 = vpop.eup %12955  ;;  %7988 = vrot.lane.b32.xlu0 %v12954_v39, %s13173_s15 }
0x2807   :  { %7990 = vrot.lane.b32.xlu1 %v12956_v40, %s13173_s15  ;;  %v12958_v43 = vpop.eup %12957 }
0x2808   :  { %v12960_v22 = vpop.eup %12959  ;;  %v7970_v44 = vadd.f32 1.0, %v12958_v43 }
0x2809   :  { %v7971_v27 = vadd.f32 1.0, %v12960_v22 }
0x280a   :  { %12961 = vrcp.f32 %v7970_v44 }
0x280b   :  { %12963 = vrcp.f32 %v7971_v27 }
0x2814   :  { %v12962_v45 = vpop.eup %12961 }
0x2815   :  { %v12964_v47 = vpop.eup %12963  ;;  %v7984_v56 = vmul.f32 %v12962_v45, %v7980_v52 }
0x2816   :  { %v7985_v58 = vmul.f32 %v12964_v47, %v7981_v53 }
0x2878   :  { %v7989_v46 = vpop.permute.xlu0 %7988 }
0x2879   :  { %v7991_v48 = vpop.permute.xlu1 %7990  ;;  %v7994_v49 = vmul.f32 %v12962_v45, %v7989_v46 }
0x287a   :  { %v7995_v50 = vmul.f32 %v12964_v47, %v7991_v48 }
0x287b   :  { %7998 = vrot.lane.b32.xlu0 %v7994_v49, %s13174_s3 }
0x287c   :  { %8000 = vrot.lane.b32.xlu1 %v7995_v50, %s13174_s3 }
0x28ed   :  { %v7999_v59 = vpop.permute.xlu0 %7998 }
0x28ee   :  { %v8001_v28 = vpop.permute.xlu1 %8000  ;;  %v14226_v23 = vadd.f32 %v7999_v59, %v7984_v56 }
0x28ef   :  { %v14228_v4 = vadd.f32 %v8001_v28, %v7985_v58 }
0x28f0   :  { %12965 = vtanh.f32 %v14226_v23  ;;  %v8535_v44 = vrot.slane %v14226_v23, 7 }
0x28f1   :  { %12967 = vtanh.f32 %v14228_v4  ;;  %v8536_v27 = vrot.slane %v14228_v4, 7 }
0x28fa   :  { %v12966_v8 = vpop.eup %12965 }
0x28fb   :  { %v12968_v9 = vpop.eup %12967  ;;  %8010 = vrot.lane.b32.xlu0 %v12966_v8, %s13173_s15 }
0x28fc   :  { %8012 = vrot.lane.b32.xlu1 %v12968_v9, %s13173_s15 }
0x296d   :  { %v8011_v63 = vpop.permute.xlu0 %8010 }
0x296e   :  { %v8013_v0 = vpop.permute.xlu1 %8012  ;;  %v8016_v61 = vmul.f32 %v12962_v45, %v8011_v63 }
0x296f   :  { %v8017_v62 = vmul.f32 %v12964_v47, %v8013_v0 }
0x2970   :  { %v8020_v12 = vrot.slane %v8016_v61, 5 }
0x2971   :  { %v8021_v13 = vrot.slane %v8017_v62, 4 }
0x2973   :  { %v8022_v1 = vsel %vm701_vm2, %v8021_v13, %v8020_v12 }
0x2974   :  { %8023 = vrot.lane.b32.xlu0 %v8022_v1, %s13174_s3 }
0x29e6   :  { %v8024_v2 = vpop.permute.xlu0 %8023 }
0x29e7   :  { %v8025_v14 = vsel %vm705_vm3, %v8024_v2, 0 }
0x29e8   :  { %v8096_v51 = vand.u32 4294901760, %v8025_v14 }
0x29ea   :  { %v8097_v15 = vsub.f32 %v8025_v14, %v8096_v51 }
0x29ec   :  { %v8098_v17 = vand.u32 4294901760, %v8097_v15 }
0x29ee   :  { %v8099_v18 = vsub.f32 %v8097_v15, %v8098_v17 }
0x29f0   :  { %v8100_v19 = vand.u32 4294901760, %v8099_v18 }
0x29f2   :  { %11643 = vmatmul.mubr.f32.vlgmr.msra.gmra.mrb[16].mxu0 %v8100_v19 }
0x29f3   :  { %12410 = vmatpush3.bf16.msra.mxu0 %v13947_v55  ;;  %11653 = vmatprep.mubr.msk.f32.mxu0 %vm13176_vm1, %v13177_v21 }
0x29f4   :  { %12411 = vmatprep.subr.bf16.mxu0 %v13175_v57 }
0x29f7   :  { %12413 = vmatpush3.bf16.msra.mxu0 %v13951_v54 }
0x29f8   :  { %12414 = vmatprep.subr.bf16.mxu0 %v13175_v57 }
0x29fa   :  { %11654 = vmatmul.mubr.f32.vlgmr.msra.gmra.mrb[16].mxu0 %v8096_v51 }
0x29fb   :  { %12416 = vmatpush3.bf16.msra.mxu0 %v13953_v16  ;;  %11664 = vmatprep.mubr.msk.f32.mxu0 %vm13176_vm1, %v13177_v21 }
0x29fc   :  { %12417 = vmatprep.subr.bf16.mxu0 %v13175_v57 }
0x29ff   :  { %12419 = vmatpush3.bf16.msra.mxu0 %v13955_v10 }
0x2a00   :  { %12420 = vmatprep.subr.bf16.mxu0 %v13175_v57 }
0x2a02   :  { %11665 = vmatmul.mubr.f32.vlgmr.msra.gmra.mrb[16].mxu0 %v8097_v15 }
0x2a03   :  { %12422 = vmatpush3.bf16.msra.mxu0 %v13935_v30  ;;  %11675 = vmatprep.mubr.msk.f32.mxu0 %vm13176_vm1, %v13177_v21 }
0x2a04   :  { %12423 = vmatprep.subr.bf16.mxu0 %v13175_v57 }
0x2a07   :  { %12425 = vmatpush3.bf16.msra.mxu0 %v13941_v42 }
0x2a08   :  { %12426 = vmatprep.subr.bf16.mxu0 %v13175_v57 }
0x2a0a   :  { %11676 = vmatmul.mubr.f32.vlgmr.msra.gmra.mrb[16].mxu0 %v8098_v17 }
0x2a0b   :  { %12428 = vmatpush3.bf16.msra.mxu0 %v13957_v11  ;;  %11686 = vmatprep.mubr.msk.f32.mxu0 %vm13176_vm1, %v13177_v21 }
0x2a0c   :  { %12429 = vmatprep.subr.bf16.mxu0 %v13175_v57 }
0x2a0f   :  { %12431 = vmatpush3.bf16.msra.mxu0 %v13959_v6 }
0x2a10   :  { %12432 = vmatprep.subr.bf16.mxu0 %v13175_v57 }
0x2a12   :  { %11687 = vmatmul.mubr.f32.vlgmr.msra.gmra.mrb[16].mxu0 %v8096_v51 }
0x2a13   :  { %12434 = vmatpush3.bf16.msra.mxu0 %v13935_v30  ;;  %11697 = vmatprep.mubr.msk.f32.mxu0 %vm13176_vm1, %v13177_v21 }
0x2a14   :  { %12435 = vmatprep.subr.bf16.mxu0 %v13175_v57 }
0x2a17   :  { %12437 = vmatpush3.bf16.msra.mxu0 %v13941_v42 }
0x2a18   :  { %12474 = vmatprep.subr.bf16.mxu0 %v13175_v57 }
0x2a1a   :  { %11698 = vmatmul.mubr.f32.vlgmr.msra.gmra.mrb[16].mxu0 %v8096_v51 }
0x2a1b   :  { %11774 = vmatprep.mubr.msk.f32.mxu0 %vm13176_vm1, %v13177_v21 }
0x2aed   :  { %v8508_v26 = vpop.f32.mrb[16].mxu0 }
0x2aee   :  { %v8513_v29 = vrot.slane %v8508_v26, 2  ;;  %v8514_v31 = vrot.slane %v8508_v26, 3  ;;  %v11699_v33 = vpop.f32.mrb[17].mxu0 }
0x2af0   :  { %v8517_v7 = vadd.f32 %v13917_v3, %v8513_v29  ;;  %v8518_v20 = vadd.f32 %v13915_v5, %v8514_v31 }
0x2af2   :  { %12969 = vtanh.f32 %v8517_v7  ;;  %v10188_v60 = vmul.f32 -1.442695, %v8517_v7  ;;  %v10189_v41 = vmul.f32 -1.442695, %v8518_v20 }
0x2af3   :  { %12971 = vtanh.f32 %v8518_v20 }
0x2af4   :  { %12973 = vpow2.f32 %v10188_v60 }
0x2af5   :  { %12975 = vpow2.f32 %v10189_v41 }
0x2afc   :  { %v12970_v25 = vpop.eup %12969 }
0x2afd   :  { %v12972_v35 = vpop.eup %12971  ;;  %8543 = vrot.lane.b32.xlu1 %v12970_v25, %s13173_s15 }
0x2afe   :  { %8545 = vrot.lane.b32.xlu0 %v12972_v35, %s13173_s15  ;;  %v12974_v36 = vpop.eup %12973 }
0x2aff   :  { %v12976_v24 = vpop.eup %12975  ;;  %v8525_v37 = vadd.f32 1.0, %v12974_v36 }
0x2b00   :  { %v8526_v38 = vadd.f32 1.0, %v12976_v24 }
0x2b01   :  { %12977 = vrcp.f32 %v8525_v37  ;;  %v9128_v37 = vld [vmem:[#allocation9] sm:$0xff] }
0x2b02   :  { %12979 = vrcp.f32 %v8526_v38  ;;  %v9129_v38 = vld [vmem:[#allocation9 + $0x8] sm:$0xff] }
0x2b0b   :  { %v12978_v39 = vpop.eup %12977 }
0x2b0c   :  { %v12980_v34 = vpop.eup %12979  ;;  %v8539_v45 = vmul.f32 %v12978_v39, %v8535_v44  ;;  %v9131_v44 = vld [vmem:[#allocation9 + $0x18] sm:$0xff] }
0x2b0d   :  { %v8540_v46 = vmul.f32 %v12980_v34, %v8536_v27 }
0x2b6f   :  { %v8544_v40 = vpop.permute.xlu1 %8543 }
0x2b70   :  { %v8546_v32 = vpop.permute.xlu0 %8545  ;;  %v8549_v43 = vmul.f32 %v12978_v39, %v8544_v40  ;;  %v9152_v40 = vand.u32 4294901760, %v9129_v38 }
0x2b71   :  { %v8550_v22 = vmul.f32 %v12980_v34, %v8546_v32 }
0x2b72   :  { %8553 = vrot.lane.b32.xlu1 %v8549_v43, %s13174_s3  ;;  %v9236_v43 = vsub.f32 %v9129_v38, %v9152_v40 }
0x2b73   :  { %8555 = vrot.lane.b32.xlu0 %v8550_v22, %s13174_s3  ;;  %v9130_v22 = vld [vmem:[#allocation9 + $0x10] sm:$0xff] }
0x2b74   :  { %v9155_v27 = vand.u32 4294901760, %v9130_v22 }
0x2be4   :  { %v8554_v47 = vpop.permute.xlu1 %8553 }
0x2be5   :  { %v8556_v48 = vpop.permute.xlu0 %8555  ;;  %v14277_v49 = vadd.f32 %v8554_v47, %v8539_v45  ;;  %v9158_v45 = vand.u32 4294901760, %v9131_v44  ;;  %v9237_v47 = vand.u32 4294901760, %v9236_v43 }
0x2be6   :  { %v14279_v50 = vadd.f32 %v8556_v48, %v8540_v46 }
0x2be7   :  { %12981 = vtanh.f32 %v14277_v49  ;;  %v9090_v31 = vrot.slane %v14277_v49, 7  ;;  %v12478_v49 = vpack.c.bf16 %v9158_v45, %v9155_v27 }
0x2be8   :  { %12983 = vtanh.f32 %v14279_v50  ;;  %v9091_v33 = vrot.slane %v14279_v50, 7  ;;  %v9243_v50 = vsub.f32 %v9130_v22, %v9155_v27 }
0x2bf1   :  { %v12982_v52 = vpop.eup %12981 }
0x2bf2   :  { %v12984_v53 = vpop.eup %12983  ;;  %8565 = vrot.lane.b32.xlu1 %v12982_v52, %s13173_s15  ;;  %v9250_v52 = vsub.f32 %v9131_v44, %v9158_v45 }
0x2bf3   :  { %8567 = vrot.lane.b32.xlu0 %v12984_v53, %s13173_s15 }
0x2c64   :  { %v8566_v56 = vpop.permute.xlu1 %8565 }
0x2c65   :  { %v8568_v58 = vpop.permute.xlu0 %8567  ;;  %v8571_v59 = vmul.f32 %v12978_v39, %v8566_v56  ;;  %v9149_v39 = vand.u32 4294901760, %v9128_v37 }
0x2c66   :  { %v8572_v28 = vmul.f32 %v12980_v34, %v8568_v58 }
0x2c67   :  { %v8575_v23 = vrot.slane %v8571_v59, 6  ;;  %v14330_v34 = vpack.c.bf16 %v9152_v40, %v9149_v39  ;;  %v9229_v32 = vsub.f32 %v9128_v37, %v9149_v39  ;;  %v9238_v59 = vsub.f32 %v9236_v43, %v9237_v47 }
0x2c68   :  { %v8576_v4 = vrot.slane %v8572_v28, 5 }
0x2c69   :  { %12476 = vmatpush3.bf16.msra.mxu0 %v14330_v34  ;;  %v9230_v46 = vand.u32 4294901760, %v9229_v32 }
0x2c6a   :  { %v8577_v8 = vsel %vm701_vm2, %v8576_v4, %v8575_v23  ;;  %12477 = vmatprep.subr.bf16.mxu0 %v13175_v57  ;;  %v9244_v4 = vand.u32 4294901760, %v9243_v50 }
0x2c6b   :  { %8578 = vrot.lane.b32.xlu1 %v8577_v8, %s13174_s3  ;;  %v9231_v53 = vsub.f32 %v9229_v32, %v9230_v46  ;;  %v9251_v8 = vand.u32 4294901760, %v9250_v52 }
0x2c6d   :  { %12479 = vmatpush3.bf16.msra.mxu0 %v12478_v49  ;;  %v9232_v23 = vand.u32 4294901760, %v9231_v53 }
0x2c6e   :  { %12480 = vmatprep.subr.bf16.mxu0 %v13175_v57 }
0x2cdd   :  { %v8579_v9 = vpop.permute.xlu1 %8578 }
0x2cde   :  { %v8580_v63 = vsel %vm705_vm3, %v8579_v9, 0 }
0x2cdf   :  { %v8651_v0 = vand.u32 4294901760, %v8580_v63 }
0x2ce1   :  { %v8652_v61 = vsub.f32 %v8580_v63, %v8651_v0  ;;  %v9239_v63 = vand.u32 4294901760, %v9238_v59 }
0x2ce3   :  { %v8653_v62 = vand.u32 4294901760, %v8652_v61 }
0x2ce5   :  { %v8654_v12 = vsub.f32 %v8652_v61, %v8653_v62 }
0x2ce7   :  { %v8655_v13 = vand.u32 4294901760, %v8654_v12  ;;  %v12481_v12 = vpack.c.bf16 %v9239_v63, %v9232_v23 }
0x2ce9   :  { %11709 = vmatmul.mubr.f32.vlgmr.msra.gmra.mrb[14].mxu1 %v8655_v13 }
0x2cea   :  { %12446 = vmatpush3.bf16.msra.mxu1 %v13947_v55  ;;  %11719 = vmatprep.mubr.msk.f32.mxu1 %vm13176_vm1, %v13177_v21 }
0x2ceb   :  { %12447 = vmatprep.subr.bf16.mxu1 %v13175_v57 }
0x2cee   :  { %12449 = vmatpush3.bf16.msra.mxu1 %v13951_v54 }
0x2cef   :  { %12450 = vmatprep.subr.bf16.mxu1 %v13175_v57 }
0x2cf1   :  { %11720 = vmatmul.mubr.f32.vlgmr.msra.gmra.mrb[14].mxu1 %v8651_v0 }
0x2cf2   :  { %12452 = vmatpush3.bf16.msra.mxu1 %v13953_v16  ;;  %11730 = vmatprep.mubr.msk.f32.mxu1 %vm13176_vm1, %v13177_v21 }
0x2cf3   :  { %12453 = vmatprep.subr.bf16.mxu1 %v13175_v57 }
0x2cf6   :  { %12455 = vmatpush3.bf16.msra.mxu1 %v13955_v10 }
0x2cf7   :  { %12456 = vmatprep.subr.bf16.mxu1 %v13175_v57 }
0x2cf9   :  { %11731 = vmatmul.mubr.f32.vlgmr.msra.gmra.mrb[14].mxu1 %v8652_v61  ;;  %v9245_v61 = vsub.f32 %v9243_v50, %v9244_v4 }
0x2cfa   :  { %12458 = vmatpush3.bf16.msra.mxu1 %v13935_v30  ;;  %11741 = vmatprep.mubr.msk.f32.mxu1 %vm13176_vm1, %v13177_v21 }
0x2cfb   :  { %12459 = vmatprep.subr.bf16.mxu1 %v13175_v57 }
0x2cfe   :  { %12461 = vmatpush3.bf16.msra.mxu1 %v13941_v42 }
0x2cff   :  { %12462 = vmatprep.subr.bf16.mxu1 %v13175_v57 }
0x2d01   :  { %11742 = vmatmul.mubr.f32.vlgmr.msra.gmra.mrb[14].mxu1 %v8653_v62  ;;  %v9252_v62 = vsub.f32 %v9250_v52, %v9251_v8 }
0x2d02   :  { %12464 = vmatpush3.bf16.msra.mxu1 %v13957_v11  ;;  %11752 = vmatprep.mubr.msk.f32.mxu1 %vm13176_vm1, %v13177_v21 }
0x2d03   :  { %12465 = vmatprep.subr.bf16.mxu1 %v13175_v57 }
0x2d06   :  { %12467 = vmatpush3.bf16.msra.mxu1 %v13959_v6 }
0x2d07   :  { %12468 = vmatprep.subr.bf16.mxu1 %v13175_v57 }
0x2d09   :  { %11753 = vmatmul.mubr.f32.vlgmr.msra.gmra.mrb[14].mxu1 %v8651_v0 }
0x2d0a   :  { %12470 = vmatpush3.bf16.msra.mxu1 %v13935_v30  ;;  %11763 = vmatprep.mubr.msk.f32.mxu1 %vm13176_vm1, %v13177_v21 }
0x2d0b   :  { %12471 = vmatprep.subr.bf16.mxu1 %v13175_v57 }
0x2d0e   :  { %12473 = vmatpush3.bf16.msra.mxu1 %v13941_v42 }
0x2d0f   :  { %12510 = vmatprep.subr.bf16.mxu1 %v13175_v57 }
0x2d11   :  { %11764 = vmatmul.mubr.f32.vlgmr.msra.gmra.mrb[14].mxu1 %v8651_v0 }
0x2d12   :  { %11840 = vmatprep.mubr.msk.f32.mxu1 %vm13176_vm1, %v13177_v21 }
0x2de4   :  { %v9063_v55 = vpop.f32.mrb[14].mxu1 }
0x2de5   :  { %v9068_v54 = vrot.slane %v9063_v55, 1  ;;  %v9069_v16 = vrot.slane %v9063_v55, 2  ;;  %v11765_v10 = vpop.f32.mrb[15].mxu1  ;;  %v9246_v55 = vand.u32 4294901760, %v9245_v61  ;;  %v10193_v61 = vld [vmem:[#allocation12] ss:$0 sm:$0xff] }
0x2de6   :  { %v12487_v10 = vpack.c.bf16 %v9236_v43, %v9229_v32 }
0x2de7   :  { %v9072_v11 = vadd.f32 %v13917_v3, %v9068_v54  ;;  %v9073_v30 = vadd.f32 %v13915_v5, %v9069_v16  ;;  %v9253_v54 = vand.u32 4294901760, %v9252_v62 }
0x2de9   :  { %12985 = vtanh.f32 %v9072_v11  ;;  %v10190_v42 = vmul.f32 -1.442695, %v9072_v11  ;;  %v10191_v2 = vmul.f32 -1.442695, %v9073_v30  ;;  %v12484_v16 = vpack.c.bf16 %v9253_v54, %v9246_v55 }
0x2dea   :  { %12987 = vtanh.f32 %v9073_v30  ;;  %v12490_v11 = vpack.c.bf16 %v9250_v52, %v9243_v50  ;;  %v12499_v30 = vpack.c.bf16 %v9237_v47, %v9230_v46  ;;  %v10192_v52 = vld [vmem:[#allocation11] ss:$0 sm:$0xff] }
0x2deb   :  { %12989 = vpow2.f32 %v10190_v42 }
0x2dec   :  { %12991 = vpow2.f32 %v10191_v2 }
0x2df3   :  { %v12986_v6 = vpop.eup %12985 }
0x2df4   :  { %v12988_v1 = vpop.eup %12987  ;;  %9098 = vrot.lane.b32.xlu0 %v12986_v6, %s13173_s15  ;;  %v12502_v6 = vpack.c.bf16 %v9251_v8, %v9244_v4 }
0x2df5   :  { %9100 = vrot.lane.b32.xlu1 %v12988_v1, %s13173_s15  ;;  %v12990_v14 = vpop.eup %12989 }
0x2df6   :  { %v12992_v51 = vpop.eup %12991  ;;  %v9080_v15 = vadd.f32 1.0, %v12990_v14 }
0x2df7   :  { %v9081_v17 = vadd.f32 1.0, %v12992_v51 }
0x2df8   :  { %12993 = vrcp.f32 %v9080_v15 }
0x2df9   :  { %12995 = vrcp.f32 %v9081_v17 }
0x2e02   :  { %v12994_v3 = vpop.eup %12993 }
0x2e03   :  { %v12996_v18 = vpop.eup %12995  ;;  %v9094_v7 = vmul.f32 %v12994_v3, %v9090_v31 }
0x2e04   :  { %v9095_v20 = vmul.f32 %v12996_v18, %v9091_v33  ;;  %v9638_v33 = vld [vmem:[%s14419_s9 + $0x10] sm:$0xff] }
0x2e66   :  { %v9099_v5 = vpop.permute.xlu0 %9098 }
0x2e67   :  { %v9101_v19 = vpop.permute.xlu1 %9100  ;;  %v9104_v26 = vmul.f32 %v12994_v3, %v9099_v5  ;;  %v9637_v5 = vld [vmem:[%s14419_s9 + $0x8] sm:$0xff] }
0x2e68   :  { %v9105_v29 = vmul.f32 %v12996_v18, %v9101_v19  ;;  %v9654_v19 = vand.u32 4294901760, %v9637_v5 }
0x2e69   :  { %9108 = vrot.lane.b32.xlu0 %v9104_v26, %s13174_s3 }
0x2e6a   :  { %9110 = vrot.lane.b32.xlu1 %v9105_v29, %s13174_s3  ;;  %v9738_v31 = vsub.f32 %v9637_v5, %v9654_v19 }
0x2edb   :  { %v9109_v25 = vpop.permute.xlu0 %9108 }
0x2edc   :  { %v9111_v35 = vpop.permute.xlu1 %9110  ;;  %v9114_v60 = vadd.f32 %v9109_v25, %v9094_v7  ;;  %v9639_v7 = vld [vmem:[%s14419_s9 + $0x18] sm:$0xff] }
0x2edd   :  { %v9115_v41 = vadd.f32 %v9111_v35, %v9095_v20  ;;  %v9657_v20 = vand.u32 4294901760, %v9638_v33  ;;  %v9660_v25 = vand.u32 4294901760, %v9639_v7 }
0x2ede   :  { %12997 = vtanh.f32 %v9114_v60  ;;  %v9739_v60 = vand.u32 4294901760, %v9738_v31 }
0x2edf   :  { %12999 = vtanh.f32 %v9115_v41  ;;  %v12514_v41 = vpack.c.bf16 %v9660_v25, %v9657_v20 }
0x2ee0   :  { %v9740_v38 = vsub.f32 %v9738_v31, %v9739_v60 }
0x2ee2   :  { %v9741_v32 = vand.u32 4294901760, %v9740_v38 }
0x2ee8   :  { %v12998_v36 = vpop.eup %12997 }
0x2ee9   :  { %v13000_v24 = vpop.eup %12999  ;;  %9120 = vrot.lane.b32.xlu0 %v12998_v36, %s13173_s15  ;;  %v9745_v36 = vsub.f32 %v9638_v33, %v9657_v20 }
0x2eea   :  { %9122 = vrot.lane.b32.xlu1 %v13000_v24, %s13173_s15  ;;  %v9752_v24 = vsub.f32 %v9639_v7, %v9660_v25 }
0x2eeb   :  { %v9746_v40 = vand.u32 4294901760, %v9745_v36 }
0x2eed   :  { %v9747_v43 = vsub.f32 %v9745_v36, %v9746_v40 }
0x2eef   :  { %v9748_v27 = vand.u32 4294901760, %v9747_v43 }
0x2f5b   :  { %v9121_v48 = vpop.permute.xlu0 %9120 }
0x2f5c   :  { %v9123_v56 = vpop.permute.xlu1 %9122  ;;  %v9126_v58 = vmul.f32 %v12994_v3, %v9121_v48  ;;  %v9636_v3 = vld [vmem:[%s14419_s9] sm:$0xff]  ;;  %v12526_v48 = vpack.c.bf16 %v9752_v24, %v9745_v36  ;;  %s13178_s9 = smov [#allocation14]  }
0x2f5d   :  { %v9127_v28 = vmul.f32 %v12996_v18, %v9123_v56  ;;  %v9651_v18 = vand.u32 4294901760, %v9636_v3  ;;  %s10146_s14 = sshll.u32 %s13178_s9, 4  ;;  %s10147_s14 = int_to_ptr.vmem [resolvable:$true] %s10146_s14 }
0x2f5e   :  { %v9141_v9 = vrot.slane %v9126_v58, 7  ;;  %s13133_s15 = scalar_lea.vmem %s10147_s14, 32  ;;  %p13138_p7 = scmp.lt.s32.totalorder %s10147_s14, %s10147_s14 }
0x2f5f   :  { %v9142_v0 = vrot.slane %v9127_v28, 6  ;;  %v14365_v26 = vpack.c.bf16 %v9654_v19, %v9651_v18  ;;  %v9731_v29 = vsub.f32 %v9636_v3, %v9651_v18  ;;  %p13134_p6 = scmp.ne.s32.totalorder %s10147_s14, %s13133_s15  ;;  %p13139_p8 = scmp.lt.s32.totalorder %s13133_s15, %s13133_s15 }
0x2f61   :  { %v9143_v13 = vsel %vm701_vm2, %v9142_v0, %v9141_v9  ;;  %12512 = vmatpush3.bf16.msra.mxu1 %v14365_v26  ;;  %v9732_v35 = vand.u32 4294901760, %v9731_v29  ;;  %v12523_v47 = vpack.c.bf16 %v9738_v31, %v9731_v29  ;;  %p13140_p9 = por %p13139_p8, %p13138_p7 }
0x2f62   :  { %9144 = vrot.lane.b32.xlu0 %v9143_v13, %s13174_s3  ;;  %12513 = vmatprep.subr.bf16.mxu1 %v13175_v57 }
0x2f63   :  { %v9733_v37 = vsub.f32 %v9731_v29, %v9732_v35  ;;  %p13141_p10 = pnand %p13140_p9, %p13134_p6 }
0x2f65   :  { %12515 = vmatpush3.bf16.msra.mxu1 %v12514_v41  ;;  %v9734_v39 = vand.u32 4294901760, %v9733_v37 }
0x2f66   :  { %12516 = vmatprep.subr.bf16.mxu1 %v13175_v57 }
0x2f67   :  { %v12517_v44 = vpack.c.bf16 %v9741_v32, %v9734_v39 }
0x2fd4   :  { %v9145_v1 = vpop.permute.xlu0 %9144 }
0x2fd5   :  { %v9146_v42 = vsel %vm705_vm3, %v9145_v1, 0 }
0x2fd6   :  { %v9217_v2 = vand.u32 4294901760, %v9146_v42 }
0x2fd8   :  { %v9218_v14 = vsub.f32 %v9146_v42, %v9217_v2 }
0x2fda   :  { %v9219_v51 = vand.u32 4294901760, %v9218_v14 }
0x2fdc   :  { %v9220_v15 = vsub.f32 %v9218_v14, %v9219_v51 }
0x2fde   :  { %v9221_v17 = vand.u32 4294901760, %v9220_v15 }
0x2fe0   :  { %11775 = vmatmul.mubr.f32.vlgmr.msra.gmra.mrb[18].mxu0 %v9221_v17 }
0x2fe1   :  { %12482 = vmatpush3.bf16.msra.mxu0 %v12481_v12  ;;  %11785 = vmatprep.mubr.msk.f32.mxu0 %vm13176_vm1, %v13177_v21 }
0x2fe2   :  { %12483 = vmatprep.subr.bf16.mxu0 %v13175_v57 }
0x2fe5   :  { %12485 = vmatpush3.bf16.msra.mxu0 %v12484_v16 }
0x2fe6   :  { %12486 = vmatprep.subr.bf16.mxu0 %v13175_v57 }
0x2fe8   :  { %11786 = vmatmul.mubr.f32.vlgmr.msra.gmra.mrb[18].mxu0 %v9217_v2 }
0x2fe9   :  { %12488 = vmatpush3.bf16.msra.mxu0 %v12487_v10  ;;  %11796 = vmatprep.mubr.msk.f32.mxu0 %vm13176_vm1, %v13177_v21 }
0x2fea   :  { %12489 = vmatprep.subr.bf16.mxu0 %v13175_v57 }
0x2fed   :  { %12491 = vmatpush3.bf16.msra.mxu0 %v12490_v11 }
0x2fee   :  { %12492 = vmatprep.subr.bf16.mxu0 %v13175_v57 }
0x2ff0   :  { %11797 = vmatmul.mubr.f32.vlgmr.msra.gmra.mrb[18].mxu0 %v9218_v14 }
0x2ff1   :  { %12494 = vmatpush3.bf16.msra.mxu0 %v14330_v34  ;;  %11807 = vmatprep.mubr.msk.f32.mxu0 %vm13176_vm1, %v13177_v21 }
0x2ff2   :  { %12495 = vmatprep.subr.bf16.mxu0 %v13175_v57 }
0x2ff5   :  { %12497 = vmatpush3.bf16.msra.mxu0 %v12478_v49 }
0x2ff6   :  { %12498 = vmatprep.subr.bf16.mxu0 %v13175_v57 }
0x2ff8   :  { %11808 = vmatmul.mubr.f32.vlgmr.msra.gmra.mrb[18].mxu0 %v9219_v51 }
0x2ff9   :  { %12500 = vmatpush3.bf16.msra.mxu0 %v12499_v30  ;;  %11818 = vmatprep.mubr.msk.f32.mxu0 %vm13176_vm1, %v13177_v21 }
0x2ffa   :  { %12501 = vmatprep.subr.bf16.mxu0 %v13175_v57 }
0x2ffd   :  { %12503 = vmatpush3.bf16.msra.mxu0 %v12502_v6 }
0x2ffe   :  { %12504 = vmatprep.subr.bf16.mxu0 %v13175_v57 }
0x3000   :  { %11819 = vmatmul.mubr.f32.vlgmr.msra.gmra.mrb[18].mxu0 %v9217_v2 }
0x3001   :  { %12506 = vmatpush3.bf16.msra.mxu0 %v14330_v34  ;;  %11829 = vmatprep.mubr.msk.f32.mxu0 %vm13176_vm1, %v13177_v21  ;;  %v9753_v34 = vand.u32 4294901760, %v9752_v24 }
0x3002   :  { %12507 = vmatprep.subr.bf16.mxu0 %v13175_v57 }
0x3003   :  { %v9754_v22 = vsub.f32 %v9752_v24, %v9753_v34  ;;  %v12538_v50 = vpack.c.bf16 %v9753_v34, %v9746_v40 }
0x3005   :  { %12509 = vmatpush3.bf16.msra.mxu0 %v12478_v49  ;;  %v9755_v45 = vand.u32 4294901760, %v9754_v22  ;;  %v12535_v49 = vpack.c.bf16 %v9739_v60, %v9732_v35 }
0x3007   :  { %v12520_v46 = vpack.c.bf16 %v9755_v45, %v9748_v27 }
0x3008   :  { %11830 = vmatmul.mubr.f32.vlgmr.msra.gmra.mrb[18].mxu0 %v9217_v2 }
0x30db   :  { %v9629_v53 = vpop.f32.mrb[18].mxu0 }
0x30dc   :  { %v12551_v56 = vadd.f32 %v10192_v52, %v9629_v53  ;;  %v11831_v58 = vpop.f32.mrb[19].mxu0 }
0x30de   :  { %vm9633_vm12 = vcmp.gt.f32.partialorder %v12551_v56, 0.0  ;;  %v9634_v59 = vmul.f32 0.05, %v12551_v56 }
0x30e0   :  { %v9635_v28 = vsel %vm9633_vm12, %v12551_v56, %v9634_v59 }
0x30e1   :  { %v9648_v23 = vsel %vm705_vm3, %v9635_v28, 0 }
0x30e2   :  { %v9719_v4 = vand.u32 4294901760, %v9648_v23 }
0x30e4   :  { %v9720_v8 = vsub.f32 %v9648_v23, %v9719_v4 }
0x30e6   :  { %v9721_v9 = vand.u32 4294901760, %v9720_v8 }
0x30e8   :  { %v9722_v63 = vsub.f32 %v9720_v8, %v9721_v9 }
0x30ea   :  { %v9723_v0 = vand.u32 4294901760, %v9722_v63 }
0x30ec   :  { %11841 = vmatmul.mubr.f32.vlgmr.msra.gmra.mrb[16].mxu1 %v9723_v0 }
0x30ed   :  { %12518 = vmatpush3.bf16.msra.mxu1 %v12517_v44  ;;  %11851 = vmatprep.mubr.msk.f32.mxu1 %vm13176_vm1, %v13177_v21 }
0x30ee   :  { %12519 = vmatprep.subr.bf16.mxu1 %v13175_v57 }
0x30f1   :  { %12521 = vmatpush3.bf16.msra.mxu1 %v12520_v46 }
0x30f2   :  { %12522 = vmatprep.subr.bf16.mxu1 %v13175_v57 }
0x30f4   :  { %11852 = vmatmul.mubr.f32.vlgmr.msra.gmra.mrb[16].mxu1 %v9719_v4 }
0x30f5   :  { %12524 = vmatpush3.bf16.msra.mxu1 %v12523_v47  ;;  %11862 = vmatprep.mubr.msk.f32.mxu1 %vm13176_vm1, %v13177_v21 }
0x30f6   :  { %12525 = vmatprep.subr.bf16.mxu1 %v13175_v57 }
0x30f9   :  { %12527 = vmatpush3.bf16.msra.mxu1 %v12526_v48 }
0x30fa   :  { %12528 = vmatprep.subr.bf16.mxu1 %v13175_v57 }
0x30fc   :  { %11863 = vmatmul.mubr.f32.vlgmr.msra.gmra.mrb[16].mxu1 %v9720_v8 }
0x30fd   :  { %12530 = vmatpush3.bf16.msra.mxu1 %v14365_v26  ;;  %11873 = vmatprep.mubr.msk.f32.mxu1 %vm13176_vm1, %v13177_v21 }
0x30fe   :  { %12531 = vmatprep.subr.bf16.mxu1 %v13175_v57 }
0x3101   :  { %12533 = vmatpush3.bf16.msra.mxu1 %v12514_v41 }
0x3102   :  { %12534 = vmatprep.subr.bf16.mxu1 %v13175_v57 }
0x3104   :  { %11874 = vmatmul.mubr.f32.vlgmr.msra.gmra.mrb[16].mxu1 %v9721_v9 }
0x3105   :  { %12536 = vmatpush3.bf16.msra.mxu1 %v12535_v49  ;;  %11884 = vmatprep.mubr.msk.f32.mxu1 %vm13176_vm1, %v13177_v21 }
0x3106   :  { %12537 = vmatprep.subr.bf16.mxu1 %v13175_v57 }
0x3109   :  { %12539 = vmatpush3.bf16.msra.mxu1 %v12538_v50 }
0x310a   :  { %12540 = vmatprep.subr.bf16.mxu1 %v13175_v57 }
0x310c   :  { %11885 = vmatmul.mubr.f32.vlgmr.msra.gmra.mrb[16].mxu1 %v9719_v4 }
0x310d   :  { %12542 = vmatpush3.bf16.msra.mxu1 %v14365_v26  ;;  %11895 = vmatprep.mubr.msk.f32.mxu1 %vm13176_vm1, %v13177_v21 }
0x310e   :  { %12543 = vmatprep.subr.bf16.mxu1 %v13175_v57 }
0x3111   :  { %12545 = vmatpush3.bf16.msra.mxu1 %v12514_v41 }
0x3114   :  { %11896 = vmatmul.mubr.f32.vlgmr.msra.gmra.mrb[16].mxu1 %v9719_v4 }
0x31e7   :  { %v10131_v62 = vpop.f32.mrb[16].mxu1 }
0x31e8   :  { %v12552_v12 = vadd.f32 %v10193_v61, %v10131_v62  ;;  %v11897_v13 = vpop.f32.mrb[17].mxu1 }
0x31ea   :  { %vm10135_vm13 = vcmp.gt.f32.partialorder %v12552_v12, 0.0  ;;  %v10136_v55 = vmul.f32 0.05, %v12552_v12 }
0x31ec   :  { %v10137_v54 = vsel %vm10135_vm13, %v12552_v12, %v10136_v55 }
0x31ed   :  { %10139 = vst.msk [vmem:[#allocation14] sm:$0x3] %vm10138_vm14, %v10137_v54 }
0x31ee   :  { %13144 = shalt.err (!%p13141_p10)
}
0x31ef   :  { %s13145_s17 = scalar_lea.hbm %s14421_s11, 32 }
0x31f0   :  { %p13146_p11 = scmp.ne.s32.totalorder %s14421_s11, %s13145_s17  ;;  %p13149_p12 = scmp.lt.u32.totalorder %s13145_s17, %s14421_s11 }
0x31f2   :  { %p13151_p13 = pnand %p13149_p12, %p13146_p11 }
0x31f4   :  { %13154 = shalt.err (!%p13151_p13)
}
0x31f5   :  { %10149 = dma.vmem_to_hbm [thread:$0]  %s10147_s14, 32, %s14421_s11, [#allocation5]  }
0x31f6   :  { %13163 = dma.done.wait [#allocation5], 32  }
0x31f7   :  { %13164 = vsyncadd [#allocation5], 4294967264 }
0x31f8   :  { %10153 = vsyncpa [#allocation4], 1 }
0x31f9   :  { %10154 = vsyncpa [#allocation7], 1 }
0x31fa   :  { %10155 = vsyncpa [#allocation10], 1 }
0x31fb   :  { %10156 = vsyncpa [#allocation13], 1 }
0x31fc   :  { %10157 = vsyncpa [#allocation5], 1 }

</bundles_post_ra>
